<compile_context>
chip_gen: v7x
topology: tpu7x:2x2x1
jax: 0.10.0
libtpu: 0.0.40
codegen_flags: <defaults>
</compile_context>

<pallas_src>
import functools

import jax
import jax.numpy as jnp
from jax.experimental import pallas as pl
from jax.experimental.pallas import tpu as pltpu


_LANE = 128          # TPU lane width: pad output channels / K / classes to this
_TILE_M = 256        # rows of the im2col matrix per grid step
_VMEM_LIMIT = 32 * 1024 * 1024   # explicit scoped-VMEM limit (safe on v5e..v7x)

_VMEM_SPEC = pl.BlockSpec(memory_space=pltpu.MemorySpace.VMEM)


def _round_up(x, m):
    return (x + m - 1) // m * m


# ----------------------------------------------------------------------------
# Pallas kernels
# ----------------------------------------------------------------------------
def _make_conv_mm_kernel(relu: bool, has_res: bool):
    """Fused (im2col-matmul, bf16 in / f32 acc) + BN bias + residual + ReLU."""
    if has_res:
        def kernel(x_ref, w_ref, b_ref, r_ref, o_ref):
            acc = jnp.dot(x_ref[...], w_ref[...],
                          preferred_element_type=jnp.float32)
            acc = acc + b_ref[...] + r_ref[...]
            if relu:
                acc = jnp.maximum(acc, 0.0)
            o_ref[...] = acc
    else:
        def kernel(x_ref, w_ref, b_ref, o_ref):
            acc = jnp.dot(x_ref[...], w_ref[...],
                          preferred_element_type=jnp.float32)
            acc = acc + b_ref[...]
            if relu:
                acc = jnp.maximum(acc, 0.0)
            o_ref[...] = acc
    return kernel


def _pool_linear_kernel(x_ref, w_ref, b_ref, o_ref):
    """Global average pool over the spatial axis + final linear (f32, tiny)."""
    hw = x_ref.shape[1]
    pooled = jnp.sum(x_ref[...], axis=1) * (1.0 / hw)            # (N, C)
    o_ref[...] = jnp.dot(pooled, w_ref[...],
                         preferred_element_type=jnp.float32) + b_ref[...]


# ----------------------------------------------------------------------------
# JAX glue: im2col, conv+bn+relu wrapper, BasicBlock, full forward
# ----------------------------------------------------------------------------
def _im2col_3x3(x_nhwc, stride):
    """3x3, padding=1 im2col.  Returns (M, 9*Cin) patches + output dims."""
    n, h, w, c = x_nhwc.shape
    xp = jnp.pad(x_nhwc, ((0, 0), (1, 1), (1, 1), (0, 0)))
    ho = (h + 2 - 3) // stride + 1
    wo = (w + 2 - 3) // stride + 1
    taps = []
    for ky in range(3):
        for kx in range(3):
            taps.append(xp[:, ky:ky + (ho - 1) * stride + 1:stride,
                           kx:kx + (wo - 1) * stride + 1:stride, :])
    patches = jnp.concatenate(taps, axis=-1)                     # (N,Ho,Wo,9*C)
    return patches.reshape(n * ho * wo, 9 * c), (n, ho, wo)


def conv3x3_bn(x_nhwc, w_oihw, bn_scale, bn_bias, stride, relu, residual=None):
    """Conv(3x3, pad=1, no bias) + folded BN + optional residual + ReLU."""
    cout, cin = w_oihw.shape[0], w_oihw.shape[1]
    # Cast activations to bf16 *before* im2col so the materialized patches
    # (the dominant HBM buffer) are half-size and MXU-native.
    patches, (n, ho, wo) = _im2col_3x3(x_nhwc.astype(jnp.bfloat16), stride)
    m, k = patches.shape

    # Lane padding: Cout -> multiple of 128; K -> at least 128 (conv1: K=27).
    cp = _round_up(cout, _LANE)
    kp = k if k >= _LANE else _LANE
    if kp != k:
        patches = jnp.pad(patches, ((0, 0), (0, kp - k)))

    # Weight: (Cout,Cin,3,3) -> (ky,kx,Cin,Cout) -> (K,Cout); fold BN scale in
    # f32, zero-pad to (Kp, Cp), then cast to bf16.
    w_flat = jnp.transpose(w_oihw, (2, 3, 1, 0)).reshape(k, cout)
    w_flat = w_flat * bn_scale.reshape(1, cout)
    w_flat = jnp.pad(w_flat, ((0, kp - k), (0, cp - cout))).astype(jnp.bfloat16)
    bias = jnp.pad(bn_bias.reshape(1, cout).astype(jnp.float32),
                   ((0, 0), (0, cp - cout)))

    has_res = residual is not None
    tile_m = min(_TILE_M, _round_up(m, 8))
    grid = (pl.cdiv(m, tile_m),)

    in_specs = [
        pl.BlockSpec((tile_m, kp), lambda i: (i, 0)),   # patches tile (bf16)
        pl.BlockSpec((kp, cp), lambda i: (0, 0)),       # weights, resident
        pl.BlockSpec((1, cp), lambda i: (0, 0)),        # BN bias, resident
    ]
    args = [patches, w_flat, bias]
    if has_res:
        res = jnp.pad(residual.reshape(m, cout).astype(jnp.float32),
                      ((0, 0), (0, cp - cout)))
        in_specs.append(pl.BlockSpec((tile_m, cp), lambda i: (i, 0)))
        args.append(res)

    bytes_accessed = (m * kp * 2 + kp * cp * 2 + cp * 4 + m * cp * 4
                      + (m * cp * 4 if has_res else 0))
    out_flat = pl.pallas_call(
        _make_conv_mm_kernel(relu=relu, has_res=has_res),
        out_shape=jax.ShapeDtypeStruct((m, cp), jnp.float32),
        grid=grid,
        in_specs=in_specs,
        out_specs=pl.BlockSpec((tile_m, cp), lambda i: (i, 0)),
        compiler_params=pltpu.CompilerParams(
            dimension_semantics=("parallel",),
            vmem_limit_bytes=_VMEM_LIMIT),
        cost_estimate=pl.CostEstimate(flops=2 * m * kp * cp,
                                      transcendentals=0,
                                      bytes_accessed=bytes_accessed),
    )(*args)
    # Slice the lane padding off and restore NHWC.
    return out_flat[:, :cout].reshape(n, ho, wo, cout)


def basic_block(x_nhwc, p, stride):
    """CIFAR BasicBlock: conv-bn-relu, conv-bn, (+shortcut), relu."""
    planes = p["conv1_w"].shape[0]
    out = conv3x3_bn(x_nhwc, p["conv1_w"], p["bn1_scale"], p["bn1_bias"],
                     stride, relu=True)
    # option-'A' shortcut (the LambdaLayer): ::2 subsample + zero channel pad
    if stride != 1 or x_nhwc.shape[-1] != planes:
        sc = x_nhwc[:, ::stride, ::stride, :]
        pad = (planes - x_nhwc.shape[-1]) // 2
        sc = jnp.pad(sc, ((0, 0), (0, 0), (0, 0), (pad, pad)))
    else:
        sc = x_nhwc
    # TODO(synk): fuse conv1->relu->conv2->residual->relu into one pallas_call
    # over a spatial tile to halve launch count / inter-layer HBM traffic.
    out = conv3x3_bn(out, p["conv2_w"], p["bn2_scale"], p["bn2_bias"],
                     1, relu=True, residual=sc)
    return out


def resnet_forward(params, x_nchw):
    x = jnp.transpose(x_nchw, (0, 2, 3, 1)).astype(jnp.float32)   # NCHW -> NHWC
    out = conv3x3_bn(x, params["conv1_w"], params["bn1_scale"],
                     params["bn1_bias"], 1, relu=True)
    for layer in ("layer1", "layer2", "layer3"):
        for blk in params[layer]:
            out = basic_block(out, blk, blk["stride"])

    n, h, w, c = out.shape
    feats = out.reshape(n, h * w, c)
    num_classes = params["linear_w"].shape[1]
    ncp = _round_up(num_classes, _LANE)               # lane-dense logits store
    wlin = jnp.pad(params["linear_w"], ((0, 0), (0, ncp - num_classes)))
    blin = jnp.pad(params["linear_b"].reshape(1, -1),
                   ((0, 0), (0, ncp - num_classes)))
    logits = pl.pallas_call(
        _pool_linear_kernel,
        out_shape=jax.ShapeDtypeStruct((n, ncp), jnp.float32),
        in_specs=[_VMEM_SPEC] * 3,
        out_specs=_VMEM_SPEC,
        compiler_params=pltpu.CompilerParams(vmem_limit_bytes=_VMEM_LIMIT),
    )(feats, wlin, blin)
    return logits[:, :num_classes]


# ----------------------------------------------------------------------------
# Deterministic parameter construction (kaiming-normal weights, folded BN)
# ----------------------------------------------------------------------------
def _kaiming(key, shape, fan_in):
    return jax.random.normal(key, shape, jnp.float32) * jnp.sqrt(2.0 / fan_in)


def _bn_params(key, c):
    k1, k2, k3, k4 = jax.random.split(key, 4)
    gamma = 1.0 + 0.1 * jax.random.normal(k1, (c,), jnp.float32)
    beta = 0.1 * jax.random.normal(k2, (c,), jnp.float32)
    mean = 0.1 * jax.random.normal(k3, (c,), jnp.float32)
    var = 1.0 + 0.1 * jnp.abs(jax.random.normal(k4, (c,), jnp.float32))
    scale = gamma * jax.lax.rsqrt(var + 1e-5)
    bias = beta - mean * scale
    return scale, bias


def _make_block_params(key, in_planes, planes, stride):
    k1, k2, k3, k4 = jax.random.split(key, 4)
    s1, b1 = _bn_params(k3, planes)
    s2, b2 = _bn_params(k4, planes)
    return {
        "stride": stride,
        "conv1_w": _kaiming(k1, (planes, in_planes, 3, 3), in_planes * 9),
        "bn1_scale": s1, "bn1_bias": b1,
        "conv2_w": _kaiming(k2, (planes, planes, 3, 3), planes * 9),
        "bn2_scale": s2, "bn2_bias": b2,
    }


def make_resnet_params(key, num_blocks=(1, 1, 1), num_classes=10):
    keys = jax.random.split(key, 16)
    params = {}
    params["conv1_w"] = _kaiming(keys[0], (16, 3, 3, 3), 3 * 9)
    params["bn1_scale"], params["bn1_bias"] = _bn_params(keys[1], 16)
    in_planes = 16
    ki = 2
    for li, (planes, nb, stride0) in enumerate(
            zip((16, 32, 64), num_blocks, (1, 2, 2)), start=1):
        blocks = []
        strides = [stride0] + [1] * (nb - 1)
        for s in strides:
            blocks.append(_make_block_params(keys[ki], in_planes, planes, s))
            in_planes = planes
            ki += 1
        params[f"layer{li}"] = blocks
    # PyTorch Linear: y = x @ W.T + b ; store transposed (64, num_classes)
    lw = _kaiming(keys[ki], (num_classes, 64), 64)
    params["linear_w"] = jnp.transpose(lw)
    params["linear_b"] = 0.01 * jax.random.normal(keys[ki + 1], (num_classes,),
                                                  jnp.float32)
    return params


# ----------------------------------------------------------------------------
if __name__ == "__main__":
    key = jax.random.PRNGKey(0)
    pkey, xkey = jax.random.split(key)
    params = make_resnet_params(pkey, num_blocks=(1, 1, 1), num_classes=10)

    # Input in PyTorch NCHW convention: batch=2, 3 channels, 16x16 spatial.
    x = jax.random.normal(xkey, (2, 3, 16, 16), jnp.float32)

    out = jax.jit(functools.partial(resnet_forward, params))(x)
    out = jax.block_until_ready(out)
    assert out.shape == (2, 10) and out.dtype == jnp.float32
    print("KERNEL_OK")
</pallas_src>

<mosaic_0001>
module attributes {stable_mosaic.version = 11 : i64} {
  func.func @kernel(%arg0: i32, %arg1: memref<256x128xbf16, #tpu.memory_space<vmem>>, %arg2: memref<128x128xbf16, #tpu.memory_space<vmem>>, %arg3: memref<1x128xf32, #tpu.memory_space<vmem>>, %arg4: memref<256x128xf32, #tpu.memory_space<vmem>>) attributes {dimension_semantics = [#tpu.dimension_semantics<parallel>], iteration_bounds = array<i64: 2>, scalar_prefetch = 0 : i64, scratch_operands = 0 : i64, tpu.core_type = #tpu.core_type<tc>, window_params = [{transform_indices = @transform_0, window_bounds = array<i64: 256, 128>}, {pipeline_mode = #tpu.pipeline_mode<synchronous>, transform_indices = @transform_1, window_bounds = array<i64: 128, 128>}, {pipeline_mode = #tpu.pipeline_mode<synchronous>, transform_indices = @transform_2, window_bounds = array<i64: 1, 128>}, {transform_indices = @transform_3, window_bounds = array<i64: 256, 128>}]} {
    %c0 = arith.constant 0 : index
    %c0_0 = arith.constant 0 : index
    %0 = vector.load %arg1[%c0, %c0_0] : memref<256x128xbf16, #tpu.memory_space<vmem>>, vector<256x128xbf16>
    %c0_1 = arith.constant 0 : index
    %c0_2 = arith.constant 0 : index
    %1 = vector.load %arg2[%c0_1, %c0_2] : memref<128x128xbf16, #tpu.memory_space<vmem>>, vector<128x128xbf16>
    %cst = arith.constant dense<0.000000e+00> : vector<256x128xf32>
    %2 = tpu.matmul %0, %1, %cst {dimension_numbers = #tpu.dot_dimension_numbers<[1], [0], [0], [1], [0, 0, 1, 1], [], []>} : vector<256x128xbf16>, vector<128x128xbf16>, vector<256x128xf32> -> vector<256x128xf32>
    %c0_3 = arith.constant 0 : index
    %c0_4 = arith.constant 0 : index
    %3 = vector.load %arg3[%c0_3, %c0_4] : memref<1x128xf32, #tpu.memory_space<vmem>>, vector<1x128xf32>
    %4 = vector.broadcast %3 : vector<1x128xf32> to vector<256x128xf32>
    %5 = arith.addf %2, %4 : vector<256x128xf32>
    %cst_5 = arith.constant 0.000000e+00 : f32
    %6 = vector.broadcast %cst_5 : f32 to vector<256x128xf32>
    %7 = arith.maximumf %5, %6 : vector<256x128xf32>
    %c0_6 = arith.constant 0 : index
    %c0_7 = arith.constant 0 : index
    %8 = vector.load %arg4[%c0_6, %c0_7] : memref<256x128xf32, #tpu.memory_space<vmem>>, vector<256x128xf32>
    tpu.vector_store %arg4[%c0_6, %c0_7], %7 {strides = array<i32>} : memref<256x128xf32, #tpu.memory_space<vmem>>, vector<256x128xf32>,
    return
  }
  func.func @transform_0(%arg0: i32) -> (i32, i32) {
    %c0_i32 = arith.constant 0 : i32
    %c0_i32_0 = arith.constant 0 : i32
    return %arg0, %c0_i32 : i32, i32
  }
  func.func @transform_1(%arg0: i32) -> (i32, i32) {
    %c0_i32 = arith.constant 0 : i32
    %c0_i32_0 = arith.constant 0 : i32
    %c0_i32_1 = arith.constant 0 : i32
    return %c0_i32, %c0_i32_0 : i32, i32
  }
  func.func @transform_2(%arg0: i32) -> (i32, i32) {
    %c0_i32 = arith.constant 0 : i32
    %c0_i32_0 = arith.constant 0 : i32
    %c0_i32_1 = arith.constant 0 : i32
    return %c0_i32, %c0_i32_0 : i32, i32
  }
  func.func @transform_3(%arg0: i32) -> (i32, i32) {
    %c0_i32 = arith.constant 0 : i32
    %c0_i32_0 = arith.constant 0 : i32
    return %arg0, %c0_i32 : i32, i32
  }
}

module attributes {stable_mosaic.version = 11 : i64} {
  func.func @kernel(%arg0: i32, %arg1: memref<256x144xbf16, #tpu.memory_space<vmem>>, %arg2: memref<144x128xbf16, #tpu.memory_space<vmem>>, %arg3: memref<1x128xf32, #tpu.memory_space<vmem>>, %arg4: memref<256x128xf32, #tpu.memory_space<vmem>>) attributes {dimension_semantics = [#tpu.dimension_semantics<parallel>], iteration_bounds = array<i64: 2>, scalar_prefetch = 0 : i64, scratch_operands = 0 : i64, tpu.core_type = #tpu.core_type<tc>, window_params = [{transform_indices = @transform_0, window_bounds = array<i64: 256, 144>}, {pipeline_mode = #tpu.pipeline_mode<synchronous>, transform_indices = @transform_1, window_bounds = array<i64: 144, 128>}, {pipeline_mode = #tpu.pipeline_mode<synchronous>, transform_indices = @transform_2, window_bounds = array<i64: 1, 128>}, {transform_indices = @transform_3, window_bounds = array<i64: 256, 128>}]} {
    %c0 = arith.constant 0 : index
    %c0_0 = arith.constant 0 : index
    %0 = vector.load %arg1[%c0, %c0_0] : memref<256x144xbf16, #tpu.memory_space<vmem>>, vector<256x144xbf16>
    %c0_1 = arith.constant 0 : index
    %c0_2 = arith.constant 0 : index
    %1 = vector.load %arg2[%c0_1, %c0_2] : memref<144x128xbf16, #tpu.memory_space<vmem>>, vector<144x128xbf16>
    %cst = arith.constant dense<0.000000e+00> : vector<256x128xf32>
    %2 = tpu.matmul %0, %1, %cst {dimension_numbers = #tpu.dot_dimension_numbers<[1], [0], [0], [1], [0, 0, 1, 1], [], []>} : vector<256x144xbf16>, vector<144x128xbf16>, vector<256x128xf32> -> vector<256x128xf32>
    %c0_3 = arith.constant 0 : index
    %c0_4 = arith.constant 0 : index
    %3 = vector.load %arg3[%c0_3, %c0_4] : memref<1x128xf32, #tpu.memory_space<vmem>>, vector<1x128xf32>
    %4 = vector.broadcast %3 : vector<1x128xf32> to vector<256x128xf32>
    %5 = arith.addf %2, %4 : vector<256x128xf32>
    %cst_5 = arith.constant 0.000000e+00 : f32
    %6 = vector.broadcast %cst_5 : f32 to vector<256x128xf32>
    %7 = arith.maximumf %5, %6 : vector<256x128xf32>
    %c0_6 = arith.constant 0 : index
    %c0_7 = arith.constant 0 : index
    %8 = vector.load %arg4[%c0_6, %c0_7] : memref<256x128xf32, #tpu.memory_space<vmem>>, vector<256x128xf32>
    tpu.vector_store %arg4[%c0_6, %c0_7], %7 {strides = array<i32>} : memref<256x128xf32, #tpu.memory_space<vmem>>, vector<256x128xf32>,
    return
  }
  func.func @transform_0(%arg0: i32) -> (i32, i32) {
    %c0_i32 = arith.constant 0 : i32
    %c0_i32_0 = arith.constant 0 : i32
    return %arg0, %c0_i32 : i32, i32
  }
  func.func @transform_1(%arg0: i32) -> (i32, i32) {
    %c0_i32 = arith.constant 0 : i32
    %c0_i32_0 = arith.constant 0 : i32
    %c0_i32_1 = arith.constant 0 : i32
    return %c0_i32, %c0_i32_0 : i32, i32
  }
  func.func @transform_2(%arg0: i32) -> (i32, i32) {
    %c0_i32 = arith.constant 0 : i32
    %c0_i32_0 = arith.constant 0 : i32
    %c0_i32_1 = arith.constant 0 : i32
    return %c0_i32, %c0_i32_0 : i32, i32
  }
  func.func @transform_3(%arg0: i32) -> (i32, i32) {
    %c0_i32 = arith.constant 0 : i32
    %c0_i32_0 = arith.constant 0 : i32
    return %arg0, %c0_i32 : i32, i32
  }
}

module attributes {stable_mosaic.version = 11 : i64} {
  func.func @kernel(%arg0: i32, %arg1: memref<256x144xbf16, #tpu.memory_space<vmem>>, %arg2: memref<144x128xbf16, #tpu.memory_space<vmem>>, %arg3: memref<1x128xf32, #tpu.memory_space<vmem>>, %arg4: memref<256x128xf32, #tpu.memory_space<vmem>>, %arg5: memref<256x128xf32, #tpu.memory_space<vmem>>) attributes {dimension_semantics = [#tpu.dimension_semantics<parallel>], iteration_bounds = array<i64: 2>, scalar_prefetch = 0 : i64, scratch_operands = 0 : i64, tpu.core_type = #tpu.core_type<tc>, window_params = [{transform_indices = @transform_0, window_bounds = array<i64: 256, 144>}, {pipeline_mode = #tpu.pipeline_mode<synchronous>, transform_indices = @transform_1, window_bounds = array<i64: 144, 128>}, {pipeline_mode = #tpu.pipeline_mode<synchronous>, transform_indices = @transform_2, window_bounds = array<i64: 1, 128>}, {transform_indices = @transform_3, window_bounds = array<i64: 256, 128>}, {transform_indices = @transform_4, window_bounds = array<i64: 256, 128>}]} {
    %c0 = arith.constant 0 : index
    %c0_0 = arith.constant 0 : index
    %0 = vector.load %arg1[%c0, %c0_0] : memref<256x144xbf16, #tpu.memory_space<vmem>>, vector<256x144xbf16>
    %c0_1 = arith.constant 0 : index
    %c0_2 = arith.constant 0 : index
    %1 = vector.load %arg2[%c0_1, %c0_2] : memref<144x128xbf16, #tpu.memory_space<vmem>>, vector<144x128xbf16>
    %cst = arith.constant dense<0.000000e+00> : vector<256x128xf32>
    %2 = tpu.matmul %0, %1, %cst {dimension_numbers = #tpu.dot_dimension_numbers<[1], [0], [0], [1], [0, 0, 1, 1], [], []>} : vector<256x144xbf16>, vector<144x128xbf16>, vector<256x128xf32> -> vector<256x128xf32>
    %c0_3 = arith.constant 0 : index
    %c0_4 = arith.constant 0 : index
    %3 = vector.load %arg3[%c0_3, %c0_4] : memref<1x128xf32, #tpu.memory_space<vmem>>, vector<1x128xf32>
    %4 = vector.broadcast %3 : vector<1x128xf32> to vector<256x128xf32>
    %5 = arith.addf %2, %4 : vector<256x128xf32>
    %c0_5 = arith.constant 0 : index
    %c0_6 = arith.constant 0 : index
    %6 = vector.load %arg4[%c0_5, %c0_6] : memref<256x128xf32, #tpu.memory_space<vmem>>, vector<256x128xf32>
    %7 = arith.addf %5, %6 : vector<256x128xf32>
    %cst_7 = arith.constant 0.000000e+00 : f32
    %8 = vector.broadcast %cst_7 : f32 to vector<256x128xf32>
    %9 = arith.maximumf %7, %8 : vector<256x128xf32>
    %c0_8 = arith.constant 0 : index
    %c0_9 = arith.constant 0 : index
    %10 = vector.load %arg5[%c0_8, %c0_9] : memref<256x128xf32, #tpu.memory_space<vmem>>, vector<256x128xf32>
    tpu.vector_store %arg5[%c0_8, %c0_9], %9 {strides = array<i32>} : memref<256x128xf32, #tpu.memory_space<vmem>>, vector<256x128xf32>,
    return
  }
  func.func @transform_0(%arg0: i32) -> (i32, i32) {
    %c0_i32 = arith.constant 0 : i32
    %c0_i32_0 = arith.constant 0 : i32
    return %arg0, %c0_i32 : i32, i32
  }
  func.func @transform_1(%arg0: i32) -> (i32, i32) {
    %c0_i32 = arith.constant 0 : i32
    %c0_i32_0 = arith.constant 0 : i32
    %c0_i32_1 = arith.constant 0 : i32
    return %c0_i32, %c0_i32_0 : i32, i32
  }
  func.func @transform_2(%arg0: i32) -> (i32, i32) {
    %c0_i32 = arith.constant 0 : i32
    %c0_i32_0 = arith.constant 0 : i32
    %c0_i32_1 = arith.constant 0 : i32
    return %c0_i32, %c0_i32_0 : i32, i32
  }
  func.func @transform_3(%arg0: i32) -> (i32, i32) {
    %c0_i32 = arith.constant 0 : i32
    %c0_i32_0 = arith.constant 0 : i32
    return %arg0, %c0_i32 : i32, i32
  }
  func.func @transform_4(%arg0: i32) -> (i32, i32) {
    %c0_i32 = arith.constant 0 : i32
    %c0_i32_0 = arith.constant 0 : i32
    return %arg0, %c0_i32 : i32, i32
  }
}

module attributes {stable_mosaic.version = 11 : i64} {
  func.func @kernel(%arg0: i32, %arg1: memref<128x144xbf16, #tpu.memory_space<vmem>>, %arg2: memref<144x128xbf16, #tpu.memory_space<vmem>>, %arg3: memref<1x128xf32, #tpu.memory_space<vmem>>, %arg4: memref<128x128xf32, #tpu.memory_space<vmem>>) attributes {dimension_semantics = [#tpu.dimension_semantics<parallel>], iteration_bounds = array<i64: 1>, scalar_prefetch = 0 : i64, scratch_operands = 0 : i64, tpu.core_type = #tpu.core_type<tc>, window_params = [{transform_indices = @transform_0, window_bounds = array<i64: 128, 144>}, {pipeline_mode = #tpu.pipeline_mode<synchronous>, transform_indices = @transform_1, window_bounds = array<i64: 144, 128>}, {pipeline_mode = #tpu.pipeline_mode<synchronous>, transform_indices = @transform_2, window_bounds = array<i64: 1, 128>}, {transform_indices = @transform_3, window_bounds = array<i64: 128, 128>}]} {
    %c0 = arith.constant 0 : index
    %c0_0 = arith.constant 0 : index
    %0 = vector.load %arg1[%c0, %c0_0] : memref<128x144xbf16, #tpu.memory_space<vmem>>, vector<128x144xbf16>
    %c0_1 = arith.constant 0 : index
    %c0_2 = arith.constant 0 : index
    %1 = vector.load %arg2[%c0_1, %c0_2] : memref<144x128xbf16, #tpu.memory_space<vmem>>, vector<144x128xbf16>
    %cst = arith.constant dense<0.000000e+00> : vector<128x128xf32>
    %2 = tpu.matmul %0, %1, %cst {dimension_numbers = #tpu.dot_dimension_numbers<[1], [0], [0], [1], [0, 0, 1, 1], [], []>} : vector<128x144xbf16>, vector<144x128xbf16>, vector<128x128xf32> -> vector<128x128xf32>
    %c0_3 = arith.constant 0 : index
    %c0_4 = arith.constant 0 : index
    %3 = vector.load %arg3[%c0_3, %c0_4] : memref<1x128xf32, #tpu.memory_space<vmem>>, vector<1x128xf32>
    %4 = vector.broadcast %3 : vector<1x128xf32> to vector<128x128xf32>
    %5 = arith.addf %2, %4 : vector<128x128xf32>
    %cst_5 = arith.constant 0.000000e+00 : f32
    %6 = vector.broadcast %cst_5 : f32 to vector<128x128xf32>
    %7 = arith.maximumf %5, %6 : vector<128x128xf32>
    %c0_6 = arith.constant 0 : index
    %c0_7 = arith.constant 0 : index
    %8 = vector.load %arg4[%c0_6, %c0_7] : memref<128x128xf32, #tpu.memory_space<vmem>>, vector<128x128xf32>
    tpu.vector_store %arg4[%c0_6, %c0_7], %7 {strides = array<i32>} : memref<128x128xf32, #tpu.memory_space<vmem>>, vector<128x128xf32>,
    return
  }
  func.func @transform_0(%arg0: i32) -> (i32, i32) {
    %c0_i32 = arith.constant 0 : i32
    %c0_i32_0 = arith.constant 0 : i32
    return %arg0, %c0_i32 : i32, i32
  }
  func.func @transform_1(%arg0: i32) -> (i32, i32) {
    %c0_i32 = arith.constant 0 : i32
    %c0_i32_0 = arith.constant 0 : i32
    %c0_i32_1 = arith.constant 0 : i32
    return %c0_i32, %c0_i32_0 : i32, i32
  }
  func.func @transform_2(%arg0: i32) -> (i32, i32) {
    %c0_i32 = arith.constant 0 : i32
    %c0_i32_0 = arith.constant 0 : i32
    %c0_i32_1 = arith.constant 0 : i32
    return %c0_i32, %c0_i32_0 : i32, i32
  }
  func.func @transform_3(%arg0: i32) -> (i32, i32) {
    %c0_i32 = arith.constant 0 : i32
    %c0_i32_0 = arith.constant 0 : i32
    return %arg0, %c0_i32 : i32, i32
  }
}

module attributes {stable_mosaic.version = 11 : i64} {
  func.func @kernel(%arg0: i32, %arg1: memref<128x288xbf16, #tpu.memory_space<vmem>>, %arg2: memref<288x128xbf16, #tpu.memory_space<vmem>>, %arg3: memref<1x128xf32, #tpu.memory_space<vmem>>, %arg4: memref<128x128xf32, #tpu.memory_space<vmem>>, %arg5: memref<128x128xf32, #tpu.memory_space<vmem>>) attributes {dimension_semantics = [#tpu.dimension_semantics<parallel>], iteration_bounds = array<i64: 1>, scalar_prefetch = 0 : i64, scratch_operands = 0 : i64, tpu.core_type = #tpu.core_type<tc>, window_params = [{transform_indices = @transform_0, window_bounds = array<i64: 128, 288>}, {pipeline_mode = #tpu.pipeline_mode<synchronous>, transform_indices = @transform_1, window_bounds = array<i64: 288, 128>}, {pipeline_mode = #tpu.pipeline_mode<synchronous>, transform_indices = @transform_2, window_bounds = array<i64: 1, 128>}, {transform_indices = @transform_3, window_bounds = array<i64: 128, 128>}, {transform_indices = @transform_4, window_bounds = array<i64: 128, 128>}]} {
    %c0 = arith.constant 0 : index
    %c0_0 = arith.constant 0 : index
    %0 = vector.load %arg1[%c0, %c0_0] : memref<128x288xbf16, #tpu.memory_space<vmem>>, vector<128x288xbf16>
    %c0_1 = arith.constant 0 : index
    %c0_2 = arith.constant 0 : index
    %1 = vector.load %arg2[%c0_1, %c0_2] : memref<288x128xbf16, #tpu.memory_space<vmem>>, vector<288x128xbf16>
    %cst = arith.constant dense<0.000000e+00> : vector<128x128xf32>
    %2 = tpu.matmul %0, %1, %cst {dimension_numbers = #tpu.dot_dimension_numbers<[1], [0], [0], [1], [0, 0, 1, 1], [], []>} : vector<128x288xbf16>, vector<288x128xbf16>, vector<128x128xf32> -> vector<128x128xf32>
    %c0_3 = arith.constant 0 : index
    %c0_4 = arith.constant 0 : index
    %3 = vector.load %arg3[%c0_3, %c0_4] : memref<1x128xf32, #tpu.memory_space<vmem>>, vector<1x128xf32>
    %4 = vector.broadcast %3 : vector<1x128xf32> to vector<128x128xf32>
    %5 = arith.addf %2, %4 : vector<128x128xf32>
    %c0_5 = arith.constant 0 : index
    %c0_6 = arith.constant 0 : index
    %6 = vector.load %arg4[%c0_5, %c0_6] : memref<128x128xf32, #tpu.memory_space<vmem>>, vector<128x128xf32>
    %7 = arith.addf %5, %6 : vector<128x128xf32>
    %cst_7 = arith.constant 0.000000e+00 : f32
    %8 = vector.broadcast %cst_7 : f32 to vector<128x128xf32>
    %9 = arith.maximumf %7, %8 : vector<128x128xf32>
    %c0_8 = arith.constant 0 : index
    %c0_9 = arith.constant 0 : index
    %10 = vector.load %arg5[%c0_8, %c0_9] : memref<128x128xf32, #tpu.memory_space<vmem>>, vector<128x128xf32>
    tpu.vector_store %arg5[%c0_8, %c0_9], %9 {strides = array<i32>} : memref<128x128xf32, #tpu.memory_space<vmem>>, vector<128x128xf32>,
    return
  }
  func.func @transform_0(%arg0: i32) -> (i32, i32) {
    %c0_i32 = arith.constant 0 : i32
    %c0_i32_0 = arith.constant 0 : i32
    return %arg0, %c0_i32 : i32, i32
  }
  func.func @transform_1(%arg0: i32) -> (i32, i32) {
    %c0_i32 = arith.constant 0 : i32
    %c0_i32_0 = arith.constant 0 : i32
    %c0_i32_1 = arith.constant 0 : i32
    return %c0_i32, %c0_i32_0 : i32, i32
  }
  func.func @transform_2(%arg0: i32) -> (i32, i32) {
    %c0_i32 = arith.constant 0 : i32
    %c0_i32_0 = arith.constant 0 : i32
    %c0_i32_1 = arith.constant 0 : i32
    return %c0_i32, %c0_i32_0 : i32, i32
  }
  func.func @transform_3(%arg0: i32) -> (i32, i32) {
    %c0_i32 = arith.constant 0 : i32
    %c0_i32_0 = arith.constant 0 : i32
    return %arg0, %c0_i32 : i32, i32
  }
  func.func @transform_4(%arg0: i32) -> (i32, i32) {
    %c0_i32 = arith.constant 0 : i32
    %c0_i32_0 = arith.constant 0 : i32
    return %arg0, %c0_i32 : i32, i32
  }
}

module attributes {stable_mosaic.version = 11 : i64} {
  func.func @kernel(%arg0: i32, %arg1: memref<32x288xbf16, #tpu.memory_space<vmem>>, %arg2: memref<288x128xbf16, #tpu.memory_space<vmem>>, %arg3: memref<1x128xf32, #tpu.memory_space<vmem>>, %arg4: memref<32x128xf32, #tpu.memory_space<vmem>>) attributes {dimension_semantics = [#tpu.dimension_semantics<parallel>], iteration_bounds = array<i64: 1>, scalar_prefetch = 0 : i64, scratch_operands = 0 : i64, tpu.core_type = #tpu.core_type<tc>, window_params = [{transform_indices = @transform_0, window_bounds = array<i64: 32, 288>}, {pipeline_mode = #tpu.pipeline_mode<synchronous>, transform_indices = @transform_1, window_bounds = array<i64: 288, 128>}, {pipeline_mode = #tpu.pipeline_mode<synchronous>, transform_indices = @transform_2, window_bounds = array<i64: 1, 128>}, {transform_indices = @transform_3, window_bounds = array<i64: 32, 128>}]} {
    %c0 = arith.constant 0 : index
    %c0_0 = arith.constant 0 : index
    %0 = vector.load %arg1[%c0, %c0_0] : memref<32x288xbf16, #tpu.memory_space<vmem>>, vector<32x288xbf16>
    %c0_1 = arith.constant 0 : index
    %c0_2 = arith.constant 0 : index
    %1 = vector.load %arg2[%c0_1, %c0_2] : memref<288x128xbf16, #tpu.memory_space<vmem>>, vector<288x128xbf16>
    %cst = arith.constant dense<0.000000e+00> : vector<32x128xf32>
    %2 = tpu.matmul %0, %1, %cst {dimension_numbers = #tpu.dot_dimension_numbers<[1], [0], [0], [1], [0, 0, 1, 1], [], []>} : vector<32x288xbf16>, vector<288x128xbf16>, vector<32x128xf32> -> vector<32x128xf32>
    %c0_3 = arith.constant 0 : index
    %c0_4 = arith.constant 0 : index
    %3 = vector.load %arg3[%c0_3, %c0_4] : memref<1x128xf32, #tpu.memory_space<vmem>>, vector<1x128xf32>
    %4 = vector.broadcast %3 : vector<1x128xf32> to vector<32x128xf32>
    %5 = arith.addf %2, %4 : vector<32x128xf32>
    %cst_5 = arith.constant 0.000000e+00 : f32
    %6 = vector.broadcast %cst_5 : f32 to vector<32x128xf32>
    %7 = arith.maximumf %5, %6 : vector<32x128xf32>
    %c0_6 = arith.constant 0 : index
    %c0_7 = arith.constant 0 : index
    %8 = vector.load %arg4[%c0_6, %c0_7] : memref<32x128xf32, #tpu.memory_space<vmem>>, vector<32x128xf32>
    tpu.vector_store %arg4[%c0_6, %c0_7], %7 {strides = array<i32>} : memref<32x128xf32, #tpu.memory_space<vmem>>, vector<32x128xf32>,
    return
  }
  func.func @transform_0(%arg0: i32) -> (i32, i32) {
    %c0_i32 = arith.constant 0 : i32
    %c0_i32_0 = arith.constant 0 : i32
    return %arg0, %c0_i32 : i32, i32
  }
  func.func @transform_1(%arg0: i32) -> (i32, i32) {
    %c0_i32 = arith.constant 0 : i32
    %c0_i32_0 = arith.constant 0 : i32
    %c0_i32_1 = arith.constant 0 : i32
    return %c0_i32, %c0_i32_0 : i32, i32
  }
  func.func @transform_2(%arg0: i32) -> (i32, i32) {
    %c0_i32 = arith.constant 0 : i32
    %c0_i32_0 = arith.constant 0 : i32
    %c0_i32_1 = arith.constant 0 : i32
    return %c0_i32, %c0_i32_0 : i32, i32
  }
  func.func @transform_3(%arg0: i32) -> (i32, i32) {
    %c0_i32 = arith.constant 0 : i32
    %c0_i32_0 = arith.constant 0 : i32
    return %arg0, %c0_i32 : i32, i32
  }
}

module attributes {stable_mosaic.version = 11 : i64} {
  func.func @_pool_linear_kernel(%arg0: memref<2x16x64xf32, #tpu.memory_space<vmem>>, %arg1: memref<64x128xf32, #tpu.memory_space<vmem>>, %arg2: memref<1x128xf32, #tpu.memory_space<vmem>>, %arg3: memref<2x128xf32, #tpu.memory_space<vmem>>) attributes {dimension_semantics = [], scalar_prefetch = 0 : i64, scratch_operands = 0 : i64, tpu.core_type = #tpu.core_type<tc>} {
    %c0 = arith.constant 0 : index
    %c0_0 = arith.constant 0 : index
    %c0_1 = arith.constant 0 : index
    %0 = vector.load %arg0[%c0, %c0_0, %c0_1] : memref<2x16x64xf32, #tpu.memory_space<vmem>>, vector<2x16x64xf32>
    %cst = arith.constant dense<0.000000e+00> : vector<2x64xf32>
    %1 = vector.multi_reduction <add>, %0, %cst [1] : vector<2x16x64xf32> to vector<2x64xf32>
    %cst_2 = arith.constant 6.250000e-02 : f32
    %2 = vector.broadcast %cst_2 : f32 to vector<2x64xf32>
    %3 = arith.mulf %1, %2 : vector<2x64xf32>
    %c0_3 = arith.constant 0 : index
    %c0_4 = arith.constant 0 : index
    %4 = vector.load %arg1[%c0_3, %c0_4] : memref<64x128xf32, #tpu.memory_space<vmem>>, vector<64x128xf32>
    %cst_5 = arith.constant dense<0.000000e+00> : vector<2x128xf32>
    %5 = tpu.matmul %3, %4, %cst_5 {dimension_numbers = #tpu.dot_dimension_numbers<[1], [0], [0], [1], [0, 0, 1, 1], [], []>} : vector<2x64xf32>, vector<64x128xf32>, vector<2x128xf32> -> vector<2x128xf32>
    %c0_6 = arith.constant 0 : index
    %c0_7 = arith.constant 0 : index
    %6 = vector.load %arg2[%c0_6, %c0_7] : memref<1x128xf32, #tpu.memory_space<vmem>>, vector<1x128xf32>
    %7 = vector.broadcast %6 : vector<1x128xf32> to vector<2x128xf32>
    %8 = arith.addf %5, %7 : vector<2x128xf32>
    %c0_8 = arith.constant 0 : index
    %c0_9 = arith.constant 0 : index
    %9 = vector.load %arg3[%c0_8, %c0_9] : memref<2x128xf32, #tpu.memory_space<vmem>>, vector<2x128xf32>
    tpu.vector_store %arg3[%c0_8, %c0_9], %8 {strides = array<i32>} : memref<2x128xf32, #tpu.memory_space<vmem>>, vector<2x128xf32>,
    return
  }
}

module attributes {stable_mosaic.version = 11 : i64} {
  func.func @kernel(%arg0: i32, %arg1: memref<32x576xbf16, #tpu.memory_space<vmem>>, %arg2: memref<576x128xbf16, #tpu.memory_space<vmem>>, %arg3: memref<1x128xf32, #tpu.memory_space<vmem>>, %arg4: memref<32x128xf32, #tpu.memory_space<vmem>>, %arg5: memref<32x128xf32, #tpu.memory_space<vmem>>) attributes {dimension_semantics = [#tpu.dimension_semantics<parallel>], iteration_bounds = array<i64: 1>, scalar_prefetch = 0 : i64, scratch_operands = 0 : i64, tpu.core_type = #tpu.core_type<tc>, window_params = [{transform_indices = @transform_0, window_bounds = array<i64: 32, 576>}, {pipeline_mode = #tpu.pipeline_mode<synchronous>, transform_indices = @transform_1, window_bounds = array<i64: 576, 128>}, {pipeline_mode = #tpu.pipeline_mode<synchronous>, transform_indices = @transform_2, window_bounds = array<i64: 1, 128>}, {transform_indices = @transform_3, window_bounds = array<i64: 32, 128>}, {transform_indices = @transform_4, window_bounds = array<i64: 32, 128>}]} {
    %c0 = arith.constant 0 : index
    %c0_0 = arith.constant 0 : index
    %0 = vector.load %arg1[%c0, %c0_0] : memref<32x576xbf16, #tpu.memory_space<vmem>>, vector<32x576xbf16>
    %c0_1 = arith.constant 0 : index
    %c0_2 = arith.constant 0 : index
    %1 = vector.load %arg2[%c0_1, %c0_2] : memref<576x128xbf16, #tpu.memory_space<vmem>>, vector<576x128xbf16>
    %cst = arith.constant dense<0.000000e+00> : vector<32x128xf32>
    %2 = tpu.matmul %0, %1, %cst {dimension_numbers = #tpu.dot_dimension_numbers<[1], [0], [0], [1], [0, 0, 1, 1], [], []>} : vector<32x576xbf16>, vector<576x128xbf16>, vector<32x128xf32> -> vector<32x128xf32>
    %c0_3 = arith.constant 0 : index
    %c0_4 = arith.constant 0 : index
    %3 = vector.load %arg3[%c0_3, %c0_4] : memref<1x128xf32, #tpu.memory_space<vmem>>, vector<1x128xf32>
    %4 = vector.broadcast %3 : vector<1x128xf32> to vector<32x128xf32>
    %5 = arith.addf %2, %4 : vector<32x128xf32>
    %c0_5 = arith.constant 0 : index
    %c0_6 = arith.constant 0 : index
    %6 = vector.load %arg4[%c0_5, %c0_6] : memref<32x128xf32, #tpu.memory_space<vmem>>, vector<32x128xf32>
    %7 = arith.addf %5, %6 : vector<32x128xf32>
    %cst_7 = arith.constant 0.000000e+00 : f32
    %8 = vector.broadcast %cst_7 : f32 to vector<32x128xf32>
    %9 = arith.maximumf %7, %8 : vector<32x128xf32>
    %c0_8 = arith.constant 0 : index
    %c0_9 = arith.constant 0 : index
    %10 = vector.load %arg5[%c0_8, %c0_9] : memref<32x128xf32, #tpu.memory_space<vmem>>, vector<32x128xf32>
    tpu.vector_store %arg5[%c0_8, %c0_9], %9 {strides = array<i32>} : memref<32x128xf32, #tpu.memory_space<vmem>>, vector<32x128xf32>,
    return
  }
  func.func @transform_0(%arg0: i32) -> (i32, i32) {
    %c0_i32 = arith.constant 0 : i32
    %c0_i32_0 = arith.constant 0 : i32
    return %arg0, %c0_i32 : i32, i32
  }
  func.func @transform_1(%arg0: i32) -> (i32, i32) {
    %c0_i32 = arith.constant 0 : i32
    %c0_i32_0 = arith.constant 0 : i32
    %c0_i32_1 = arith.constant 0 : i32
    return %c0_i32, %c0_i32_0 : i32, i32
  }
  func.func @transform_2(%arg0: i32) -> (i32, i32) {
    %c0_i32 = arith.constant 0 : i32
    %c0_i32_0 = arith.constant 0 : i32
    %c0_i32_1 = arith.constant 0 : i32
    return %c0_i32, %c0_i32_0 : i32, i32
  }
  func.func @transform_3(%arg0: i32) -> (i32, i32) {
    %c0_i32 = arith.constant 0 : i32
    %c0_i32_0 = arith.constant 0 : i32
    return %arg0, %c0_i32 : i32, i32
  }
  func.func @transform_4(%arg0: i32) -> (i32, i32) {
    %c0_i32 = arith.constant 0 : i32
    %c0_i32_0 = arith.constant 0 : i32
    return %arg0, %c0_i32 : i32, i32
  }
}

</mosaic_0001>

<bundles_post_ra>
// kernel: resnet_forward.8
= control target key start
LH: loop header
LB: loop body
LE: loop exit
PB: predicated region body
PF: predicated region fallthrough
CT: control target
= control target key end

     0   :  { %s839_s12 = smov 0   ;;  %s973_s0 = inlined_call_operand.vmem [shape: bf16[512,128], index: 0, kind: input, shape index: {}]   ;;  %s974_s1 = inlined_call_operand.vmem [shape: bf16[128,128], index: 1, kind: input, shape index: {}]   ;;  %s975_s2 = inlined_call_operand.vmem [shape: f32[1,128], index: 2, kind: input, shape index: {}]   ;;  %s976_s3 = inlined_call_operand.vmem [shape: f32[512,128], index: 3, kind: output, shape index: {}]  }
   0x1 LB: > { %s655_s13 = sadd.s32 4294967295, %s817_s12   ;;  %p659_p0 = scmp.ge.s32.totalorder %s817_s12, 1  ;;  %s817_s12 = sphi %s839_s12, %s13_s12  }
   0x2   : > { %p138_p1 = scmp.lt.s32.totalorder %s817_s12, 3 }
   0x4   : > { %p139_p2 = pnand %p659_p0, %p138_p1 }
   0x5   : > { %v787_v0 = vld [vmem:[%s974_s1] sm:$0xff] (!%p139_p2)   ;;  %s660_s16 = sshll.u32 (!%p139_p2), %s655_s13, 5  ;;  %v788_v1 = vld [vmem:[%s974_s1 + $0x8] sm:$0xff] (!%p139_p2)   ;;  %v789_v2 = vld [vmem:[%s974_s1 + $0x10] sm:$0xff] (!%p139_p2)  }
   0x6   : > { %142 = sbr.rel (%p139_p2) target bundleno = 282 (0x11a), region = 32  ;;  %p163_p3 = scmp.lt.s32.totalorder (!%p139_p2), %s660_s16, 63  ;;  %715 = vmatprep.subr.bf16.mxu0 (!%p139_p2), %v787_v0  ;;  %763 = vmatprep.subr.bf16.mxu1 (!%p139_p2), %v787_v0  ;;  %v790_v3 = vld [vmem:[%s974_s1 + $0x18] sm:$0xff] (!%p139_p2)   ;;  %v791_v6 = vld [vmem:[%s974_s1 + $0x20] sm:$0xff] (!%p139_p2)   ;;  %v792_v7 = vld [vmem:[%s974_s1 + $0x28] sm:$0xff] (!%p139_p2)  }
   0x7   : > { %716 = vmatpush3.bf16.msra.mxu0 (!%p139_p2), %v787_v0  ;;  %771 = vmatpush3.bf16.msra.mxu1 (!%p139_p2), %v787_v0  ;;  %v793_v8 = vld [vmem:[%s974_s1 + $0x30] sm:$0xff] (!%p139_p2)   ;;  %v794_v9 = vld [vmem:[%s974_s1 + $0x38] sm:$0xff] (!%p139_p2)   ;;  %v898_v24 = vld [vmem:[%s975_s2] ss:$0 sm:$0xff] (!%p139_p2) }
   0x8   : > { %717 = vmatprep.subr.bf16.mxu0 (!%p139_p2), %v788_v1  ;;  %764 = vmatprep.subr.bf16.mxu1 (!%p139_p2), %v788_v1 }
   0xb   : > { %718 = vmatpush3.bf16.msra.mxu0 (!%p139_p2), %v788_v1  ;;  %772 = vmatpush3.bf16.msra.mxu1 (!%p139_p2), %v788_v1 }
   0xc   : > { %719 = vmatprep.subr.bf16.mxu0 (!%p139_p2), %v789_v2  ;;  %765 = vmatprep.subr.bf16.mxu1 (!%p139_p2), %v789_v2 }
   0xd   : > { %s978_s16 = smov (!%p163_p3, %s660_s16), 63 }
   0xe   : > { %s661_s21 = sshll.u32 %s978_s16, 2  ;;  %s663_s10 = sshll.u32 %s978_s16, 3 }
   0xf   : > { %s862_s24 = scalar_lea.vmem %s973_s0, %s661_s21  ;;  %720 = vmatpush3.bf16.msra.mxu0 %v789_v2  ;;  %773 = vmatpush3.bf16.msra.mxu1 %v789_v2  ;;  %s906_s14 = scalar_lea.vmem %s976_s3, %s663_s10 }
  0x10   : > { %v795_v4 = vld [vmem:[%s862_s24] sm:$0xff]   ;;  %721 = vmatprep.subr.bf16.mxu0 %v790_v3  ;;  %766 = vmatprep.subr.bf16.mxu1 %v790_v3  ;;  %v797_v10 = vld [vmem:[%s862_s24 + $0x8] sm:$0xff]   ;;  %v799_v12 = vld [vmem:[%s862_s24 + $0x10] sm:$0xff]  }
  0x11   : > { %v796_v5 = vld [vmem:[%s862_s24 + $0x40] sm:$0xff]   ;;  %731 = vmatprep.mubr.bf16.mxu0 %v795_v4  ;;  %v798_v11 = vld [vmem:[%s862_s24 + $0x48] sm:$0xff]   ;;  %v800_v13 = vld [vmem:[%s862_s24 + $0x50] sm:$0xff]  }
  0x12   : > { %747 = vmatprep.mubr.bf16.mxu1 %v796_v5  ;;  %v801_v14 = vld [vmem:[%s862_s24 + $0x18] sm:$0xff]   ;;  %v803_v16 = vld [vmem:[%s862_s24 + $0x20] sm:$0xff]   ;;  %v805_v18 = vld [vmem:[%s862_s24 + $0x28] sm:$0xff]  }
  0x13   : > { %722 = vmatpush3.bf16.msra.mxu0 %v790_v3  ;;  %774 = vmatpush3.bf16.msra.mxu1 %v790_v3  ;;  %v802_v15 = vld [vmem:[%s862_s24 + $0x58] sm:$0xff]   ;;  %v804_v17 = vld [vmem:[%s862_s24 + $0x60] sm:$0xff]   ;;  %v806_v19 = vld [vmem:[%s862_s24 + $0x68] sm:$0xff]  }
  0x14   : > { %723 = vmatprep.subr.bf16.mxu0 %v791_v6  ;;  %767 = vmatprep.subr.bf16.mxu1 %v791_v6  ;;  %v807_v20 = vld [vmem:[%s862_s24 + $0x30] sm:$0xff]   ;;  %v809_v22 = vld [vmem:[%s862_s24 + $0x38] sm:$0xff]  }
  0x15   : > { %v808_v21 = vld [vmem:[%s862_s24 + $0x70] sm:$0xff]   ;;  %v810_v23 = vld [vmem:[%s862_s24 + $0x78] sm:$0xff]  }
  0x17   : > { %724 = vmatpush3.bf16.msra.mxu0 %v791_v6  ;;  %775 = vmatpush3.bf16.msra.mxu1 %v791_v6 }
  0x18   : > { %725 = vmatprep.subr.bf16.mxu0 %v792_v7  ;;  %768 = vmatprep.subr.bf16.mxu1 %v792_v7 }
  0x1b   : > { %726 = vmatpush3.bf16.msra.mxu0 %v792_v7  ;;  %776 = vmatpush3.bf16.msra.mxu1 %v792_v7 }
  0x1c   : > { %727 = vmatprep.subr.bf16.mxu0 %v793_v8  ;;  %769 = vmatprep.subr.bf16.mxu1 %v793_v8 }
  0x1f   : > { %728 = vmatpush3.bf16.msra.mxu0 %v793_v8  ;;  %777 = vmatpush3.bf16.msra.mxu1 %v793_v8 }
  0x20   : > { %729 = vmatprep.subr.bf16.mxu0 %v794_v9  ;;  %770 = vmatprep.subr.bf16.mxu1 %v794_v9 }
  0x23   : > { %730 = vmatpush3.bf16.msra.mxu0 %v794_v9  ;;  %778 = vmatpush3.bf16.msra.mxu1 %v794_v9 }
  0x26   : > { %732 = vmatmul.mubr.bf16.vlgmr.msra.gmra.mrb[0].mxu0 %v797_v10  ;;  %748 = vmatmul.mubr.bf16.vlgmr.msra.gmra.mrb[0].mxu1 %v798_v11 }
  0x27   : > { %735 = vmatprep.mubr.bf16.mxu0 %v799_v12  ;;  %751 = vmatprep.mubr.bf16.mxu1 %v800_v13 }
  0x2e   : > { %736 = vmatmul.mubr.bf16.gmra.mrb[4].mxu0 %v801_v14  ;;  %752 = vmatmul.mubr.bf16.gmra.mrb[4].mxu1 %v802_v15 }
  0x2f   : > { %739 = vmatprep.mubr.bf16.mxu0 %v803_v16  ;;  %755 = vmatprep.mubr.bf16.mxu1 %v804_v17 }
  0x36   : > { %740 = vmatmul.mubr.bf16.gmra.mrb[8].mxu0 %v805_v18  ;;  %756 = vmatmul.mubr.bf16.gmra.mrb[8].mxu1 %v806_v19 }
  0x37   : > { %743 = vmatprep.mubr.bf16.mxu0 %v807_v20  ;;  %759 = vmatprep.mubr.bf16.mxu1 %v808_v21 }
  0x3e   : > { %744 = vmatmul.mubr.bf16.gmra.mrb[12].mxu0 %v809_v22  ;;  %760 = vmatmul.mubr.bf16.gmra.mrb[12].mxu1 %v810_v23 }
  0xf9   : > { %v733_v25 = vpop.f32.mrb[0].mxu0  ;;  %v749_v26 = vpop.f32.mrb[0].mxu1 }
  0xfa   : > { %v417_v27 = vadd.f32 %v733_v25, %v898_v24  ;;  %v481_v28 = vadd.f32 %v749_v26, %v898_v24  ;;  %v408_v29 = vpop.f32.mrb[1].mxu0  ;;  %v472_v30 = vpop.f32.mrb[1].mxu1 }
  0xfb   : > { %v409_v31 = vadd.f32 %v898_v24, %v408_v29  ;;  %v473_v32 = vadd.f32 %v898_v24, %v472_v30  ;;  %v734_v33 = vpop.f32.mrb[2].mxu0  ;;  %v750_v34 = vpop.f32.mrb[2].mxu1 }
  0xfc   : > { %v537_v35 = vmax.f32 %v417_v27, 0.0  ;;  %v553_v36 = vmax.f32 %v481_v28, 0.0  ;;  %v420_v37 = vadd.f32 %v734_v33, %v898_v24  ;;  %v484_v38 = vadd.f32 %v750_v34, %v898_v24  ;;  %v411_v39 = vpop.f32.mrb[3].mxu0  ;;  %v475_v40 = vpop.f32.mrb[3].mxu1 }
  0xfd   : > { %v535_v41 = vmax.f32 %v409_v31, 0.0  ;;  %v551_v42 = vmax.f32 %v473_v32, 0.0  ;;  %v412_v43 = vadd.f32 %v898_v24, %v411_v39  ;;  %v476_v44 = vadd.f32 %v898_v24, %v475_v40 }
  0xfe   : > { %569 = vst [vmem:[%s906_s14 + $0x10] sm:$0xff] %v537_v35  ;;  %585 = vst [vmem:[%s906_s14 + $0x90] sm:$0xff] %v553_v36  ;;  %v538_v45 = vmax.f32 %v420_v37, 0.0  ;;  %v554_v46 = vmax.f32 %v484_v38, 0.0 }
  0xff   : > { %567 = vst [vmem:[%s906_s14] sm:$0xff] %v535_v41  ;;  %583 = vst [vmem:[%s906_s14 + $0x80] sm:$0xff] %v551_v42  ;;  %v536_v47 = vmax.f32 %v412_v43, 0.0  ;;  %v552_v48 = vmax.f32 %v476_v44, 0.0 }
 0x100   : > { %570 = vst [vmem:[%s906_s14 + $0x18] sm:$0xff] %v538_v45  ;;  %586 = vst [vmem:[%s906_s14 + $0x98] sm:$0xff] %v554_v46 }
 0x101   : > { %568 = vst [vmem:[%s906_s14 + $0x8] sm:$0xff] %v536_v47  ;;  %584 = vst [vmem:[%s906_s14 + $0x88] sm:$0xff] %v552_v48  ;;  %v737_v49 = vpop.f32.mrb[4].mxu0  ;;  %v753_v50 = vpop.f32.mrb[4].mxu1 }
 0x102   : > { %v433_v51 = vadd.f32 %v737_v49, %v898_v24  ;;  %v497_v52 = vadd.f32 %v753_v50, %v898_v24  ;;  %v424_v53 = vpop.f32.mrb[5].mxu0  ;;  %v488_v54 = vpop.f32.mrb[5].mxu1 }
 0x103   : > { %v425_v55 = vadd.f32 %v898_v24, %v424_v53  ;;  %v489_v56 = vadd.f32 %v898_v24, %v488_v54  ;;  %v738_v57 = vpop.f32.mrb[6].mxu0  ;;  %v754_v58 = vpop.f32.mrb[6].mxu1 }
 0x104   : > { %v541_v59 = vmax.f32 %v433_v51, 0.0  ;;  %v557_v60 = vmax.f32 %v497_v52, 0.0  ;;  %v436_v61 = vadd.f32 %v738_v57, %v898_v24  ;;  %v500_v62 = vadd.f32 %v754_v58, %v898_v24  ;;  %v427_v63 = vpop.f32.mrb[7].mxu0  ;;  %v491_v0 = vpop.f32.mrb[7].mxu1 }
 0x105   : > { %v539_v1 = vmax.f32 %v425_v55, 0.0  ;;  %v555_v2 = vmax.f32 %v489_v56, 0.0  ;;  %v428_v3 = vadd.f32 %v898_v24, %v427_v63  ;;  %v492_v4 = vadd.f32 %v898_v24, %v491_v0 }
 0x106   : > { %573 = vst [vmem:[%s906_s14 + $0x30] sm:$0xff] %v541_v59  ;;  %589 = vst [vmem:[%s906_s14 + $0xb0] sm:$0xff] %v557_v60  ;;  %v542_v5 = vmax.f32 %v436_v61, 0.0  ;;  %v558_v6 = vmax.f32 %v500_v62, 0.0 }
 0x107   : > { %571 = vst [vmem:[%s906_s14 + $0x20] sm:$0xff] %v539_v1  ;;  %587 = vst [vmem:[%s906_s14 + $0xa0] sm:$0xff] %v555_v2  ;;  %v540_v7 = vmax.f32 %v428_v3, 0.0  ;;  %v556_v8 = vmax.f32 %v492_v4, 0.0 }
 0x108   : > { %574 = vst [vmem:[%s906_s14 + $0x38] sm:$0xff] %v542_v5  ;;  %590 = vst [vmem:[%s906_s14 + $0xb8] sm:$0xff] %v558_v6 }
 0x109   : > { %572 = vst [vmem:[%s906_s14 + $0x28] sm:$0xff] %v540_v7  ;;  %588 = vst [vmem:[%s906_s14 + $0xa8] sm:$0xff] %v556_v8  ;;  %v741_v9 = vpop.f32.mrb[8].mxu0  ;;  %v757_v10 = vpop.f32.mrb[8].mxu1 }
 0x10a   : > { %v449_v11 = vadd.f32 %v741_v9, %v898_v24  ;;  %v513_v12 = vadd.f32 %v757_v10, %v898_v24  ;;  %v440_v13 = vpop.f32.mrb[9].mxu0  ;;  %v504_v14 = vpop.f32.mrb[9].mxu1 }
 0x10b   : > { %v441_v15 = vadd.f32 %v898_v24, %v440_v13  ;;  %v505_v16 = vadd.f32 %v898_v24, %v504_v14  ;;  %v742_v17 = vpop.f32.mrb[10].mxu0  ;;  %v758_v18 = vpop.f32.mrb[10].mxu1 }
 0x10c   : > { %v545_v19 = vmax.f32 %v449_v11, 0.0  ;;  %v561_v20 = vmax.f32 %v513_v12, 0.0  ;;  %v452_v21 = vadd.f32 %v742_v17, %v898_v24  ;;  %v516_v22 = vadd.f32 %v758_v18, %v898_v24  ;;  %v443_v23 = vpop.f32.mrb[11].mxu0  ;;  %v507_v25 = vpop.f32.mrb[11].mxu1 }
 0x10d   : > { %v543_v26 = vmax.f32 %v441_v15, 0.0  ;;  %v559_v27 = vmax.f32 %v505_v16, 0.0  ;;  %v444_v28 = vadd.f32 %v898_v24, %v443_v23  ;;  %v508_v29 = vadd.f32 %v898_v24, %v507_v25 }
 0x10e   : > { %577 = vst [vmem:[%s906_s14 + $0x50] sm:$0xff] %v545_v19  ;;  %593 = vst [vmem:[%s906_s14 + $0xd0] sm:$0xff] %v561_v20  ;;  %v546_v30 = vmax.f32 %v452_v21, 0.0  ;;  %v562_v31 = vmax.f32 %v516_v22, 0.0 }
 0x10f   : > { %575 = vst [vmem:[%s906_s14 + $0x40] sm:$0xff] %v543_v26  ;;  %591 = vst [vmem:[%s906_s14 + $0xc0] sm:$0xff] %v559_v27  ;;  %v544_v32 = vmax.f32 %v444_v28, 0.0  ;;  %v560_v33 = vmax.f32 %v508_v29, 0.0 }
 0x110   : > { %578 = vst [vmem:[%s906_s14 + $0x58] sm:$0xff] %v546_v30  ;;  %594 = vst [vmem:[%s906_s14 + $0xd8] sm:$0xff] %v562_v31 }
 0x111   : > { %576 = vst [vmem:[%s906_s14 + $0x48] sm:$0xff] %v544_v32  ;;  %592 = vst [vmem:[%s906_s14 + $0xc8] sm:$0xff] %v560_v33  ;;  %v745_v34 = vpop.f32.mrb[12].mxu0  ;;  %v761_v35 = vpop.f32.mrb[12].mxu1 }
 0x112   : > { %v465_v36 = vadd.f32 %v745_v34, %v898_v24  ;;  %v529_v37 = vadd.f32 %v761_v35, %v898_v24  ;;  %v456_v38 = vpop.f32.mrb[13].mxu0  ;;  %v520_v39 = vpop.f32.mrb[13].mxu1 }
 0x113   : > { %v457_v40 = vadd.f32 %v898_v24, %v456_v38  ;;  %v521_v41 = vadd.f32 %v898_v24, %v520_v39  ;;  %v746_v42 = vpop.f32.mrb[14].mxu0  ;;  %v762_v43 = vpop.f32.mrb[14].mxu1 }
 0x114   : > { %v549_v44 = vmax.f32 %v465_v36, 0.0  ;;  %v565_v45 = vmax.f32 %v529_v37, 0.0  ;;  %v468_v46 = vadd.f32 %v746_v42, %v898_v24  ;;  %v532_v47 = vadd.f32 %v762_v43, %v898_v24  ;;  %v459_v48 = vpop.f32.mrb[15].mxu0  ;;  %v523_v49 = vpop.f32.mrb[15].mxu1 }
 0x115   : > { %v547_v50 = vmax.f32 %v457_v40, 0.0  ;;  %v563_v51 = vmax.f32 %v521_v41, 0.0  ;;  %v460_v52 = vadd.f32 %v898_v24, %v459_v48  ;;  %v524_v53 = vadd.f32 %v898_v24, %v523_v49 }
 0x116   : > { %581 = vst [vmem:[%s906_s14 + $0x70] sm:$0xff] %v549_v44  ;;  %597 = vst [vmem:[%s906_s14 + $0xf0] sm:$0xff] %v565_v45  ;;  %v550_v54 = vmax.f32 %v468_v46, 0.0  ;;  %v566_v55 = vmax.f32 %v532_v47, 0.0 }
 0x117   : > { %579 = vst [vmem:[%s906_s14 + $0x60] sm:$0xff] %v547_v50  ;;  %595 = vst [vmem:[%s906_s14 + $0xe0] sm:$0xff] %v563_v51  ;;  %v548_v56 = vmax.f32 %v460_v52, 0.0  ;;  %v564_v57 = vmax.f32 %v524_v53, 0.0 }
 0x118   : > { %582 = vst [vmem:[%s906_s14 + $0x78] sm:$0xff] %v550_v54  ;;  %598 = vst [vmem:[%s906_s14 + $0xf8] sm:$0xff] %v566_v55 }
 0x119   : > { %580 = vst [vmem:[%s906_s14 + $0x68] sm:$0xff] %v548_v56  ;;  %596 = vst [vmem:[%s906_s14 + $0xe8] sm:$0xff] %v564_v57 }
 0x11a PF: > { %s13_s12 = sadd.s32 1, %s817_s12  }
 0x11b   : > { %p10_p4 = scmp.ge.s32.totalorder %s13_s12, 4  }
 0x11d   :  { %12 = sbr.rel (!%p10_p4) target bundleno = 1 (0x1), region = 62 }

// kernel: resnet_forward.9
= control target key start
LH: loop header
LB: loop body
LE: loop exit
PB: predicated region body
PF: predicated region fallthrough
CT: control target
= control target key end

     0   :  { %s947_s12 = smov 0   ;;  %s1119_s0 = inlined_call_operand.vmem [shape: bf16[512,144], index: 0, kind: input, shape index: {}]   ;;  %s1120_s1 = inlined_call_operand.vmem [shape: bf16[144,128], index: 1, kind: input, shape index: {}]   ;;  %s1121_s2 = inlined_call_operand.vmem [shape: f32[1,128], index: 2, kind: input, shape index: {}]   ;;  %s1122_s3 = inlined_call_operand.vmem [shape: f32[512,128], index: 3, kind: output, shape index: {}]  }
   0x1 LB: > { %s763_s13 = sadd.s32 4294967295, %s924_s12   ;;  %p767_p0 = scmp.ge.s32.totalorder %s924_s12, 1  ;;  %s924_s12 = sphi %s947_s12, %s13_s12  }
   0x2   : > { %p139_p1 = scmp.lt.s32.totalorder %s924_s12, 3 }
   0x4   : > { %p140_p2 = pnand %p767_p0, %p139_p1 }
   0x5   : > { %v861_v0 = vld [vmem:[%s1120_s1] sm:$0xff] (!%p140_p2)   ;;  %v926_v1 = vmov (!%p140_p2), 0   ;;  %s768_s16 = sshll.u32 (!%p140_p2), %s763_s13, 5  ;;  %v862_v2 = vld [vmem:[%s1120_s1 + $0x8] sm:$0xff] (!%p140_p2)   ;;  %v863_v3 = vld [vmem:[%s1120_s1 + $0x10] sm:$0xff] (!%p140_p2)   ;;  %vm433_vm0 = vcmask (!%p140_p2), 130048  }
   0x6   : > { %143 = sbr.rel (%p140_p2) target bundleno = 317 (0x13d), region = 32  ;;  %482 = vmatprep.subr.bf16.mxu0 (!%p140_p2), %v926_v1  ;;  %834 = vmatprep.subr.bf16.mxu1 (!%p140_p2), %v926_v1  ;;  %p165_p3 = scmp.lt.s32.totalorder (!%p140_p2), %s768_s16, 63  ;;  %v864_v4 = vld [vmem:[%s1120_s1 + $0x18] sm:$0xff] (!%p140_p2)   ;;  %v865_v7 = vld [vmem:[%s1120_s1 + $0x20] sm:$0xff] (!%p140_p2)   ;;  %v866_v8 = vld [vmem:[%s1120_s1 + $0x28] sm:$0xff] (!%p140_p2)  }
   0x7   : > { %483 = vmatpush1.bf16.msra.mxu0 (!%p140_p2), %v861_v0  ;;  %843 = vmatpush1.bf16.msra.mxu1 (!%p140_p2), %v861_v0  ;;  %v867_v9 = vld [vmem:[%s1120_s1 + $0x30] sm:$0xff] (!%p140_p2)   ;;  %v868_v10 = vld [vmem:[%s1120_s1 + $0x38] sm:$0xff] (!%p140_p2)   ;;  %v869_v11 = vld [vmem:[%s1120_s1 + $0x40] sm:$0xff] (!%p140_p2)  }
   0x8   : > { %484 = vmatprep.subr.bf16.mxu0 (!%p140_p2), %v926_v1  ;;  %835 = vmatprep.subr.bf16.mxu1 (!%p140_p2), %v926_v1  ;;  %v1043_v42 = vld [vmem:[%s1121_s2] ss:$0 sm:$0xff] (!%p140_p2) }
   0xb   : > { %485 = vmatpush1.bf16.msra.mxu0 (!%p140_p2), %v862_v2  ;;  %844 = vmatpush1.bf16.msra.mxu1 (!%p140_p2), %v862_v2 }
   0xc   : > { %486 = vmatprep.subr.bf16.mxu0 (!%p140_p2), %v926_v1  ;;  %836 = vmatprep.subr.bf16.mxu1 (!%p140_p2), %v926_v1 }
   0xd   : > { %s1124_s16 = smov (!%p165_p3, %s768_s16), 63 }
   0xe   : > { %s833_s21 = sshll.u32 %s1124_s16, 3 }
   0xf   : > { %s972_s24 = scalar_lea.vmem %s1119_s0, %s833_s21  ;;  %487 = vmatpush1.bf16.msra.mxu0 %v863_v3  ;;  %845 = vmatpush1.bf16.msra.mxu1 %v863_v3  ;;  %s1052_s15 = scalar_lea.vmem %s1122_s3, %s833_s21 }
  0x10   : > { %v872_v5 = vld [vmem:[%s972_s24 + $0x4] ss:$8 sps:$4 sm:$0xff]   ;;  %488 = vmatprep.subr.bf16.mxu0 %v926_v1  ;;  %837 = vmatprep.subr.bf16.mxu1 %v926_v1  ;;  %v870_v12 = vld [vmem:[%s972_s24] ss:$8 sps:$4 sm:$0xff]   ;;  %v876_v14 = vld [vmem:[%s972_s24 + $0x14] ss:$8 sps:$4 sm:$0xff]  }
  0x11   : > { %v875_v6 = vld [vmem:[%s972_s24 + $0x84] ss:$8 sps:$4 sm:$0xff]   ;;  %815 = vmatprep.mubr.msk.bf16.mxu0 %vm433_vm0, %v872_v5  ;;  %v873_v13 = vld [vmem:[%s972_s24 + $0x80] ss:$8 sps:$4 sm:$0xff]   ;;  %v878_v15 = vld [vmem:[%s972_s24 + $0x94] ss:$8 sps:$4 sm:$0xff]  }
  0x12   : > { %823 = vmatprep.mubr.msk.bf16.mxu1 %vm433_vm0, %v875_v6  ;;  %v880_v16 = vld [vmem:[%s972_s24 + $0x10] ss:$8 sps:$4 sm:$0xff]   ;;  %v882_v18 = vld [vmem:[%s972_s24 + $0x24] ss:$8 sps:$4 sm:$0xff]   ;;  %v886_v20 = vld [vmem:[%s972_s24 + $0x20] ss:$8 sps:$4 sm:$0xff]  }
  0x13   : > { %489 = vmatpush1.bf16.msra.mxu0 %v864_v4  ;;  %846 = vmatpush1.bf16.msra.mxu1 %v864_v4  ;;  %v881_v17 = vld [vmem:[%s972_s24 + $0x90] ss:$8 sps:$4 sm:$0xff]   ;;  %v884_v19 = vld [vmem:[%s972_s24 + $0xa4] ss:$8 sps:$4 sm:$0xff]   ;;  %v887_v21 = vld [vmem:[%s972_s24 + $0xa0] ss:$8 sps:$4 sm:$0xff]  }
  0x14   : > { %490 = vmatprep.subr.bf16.mxu0 %v926_v1  ;;  %838 = vmatprep.subr.bf16.mxu1 %v926_v1  ;;  %v888_v22 = vld [vmem:[%s972_s24 + $0x34] ss:$8 sps:$4 sm:$0xff]   ;;  %v892_v24 = vld [vmem:[%s972_s24 + $0x30] ss:$8 sps:$4 sm:$0xff]   ;;  %v894_v26 = vld [vmem:[%s972_s24 + $0x44] ss:$8 sps:$4 sm:$0xff]  }
  0x15   : > { %v890_v23 = vld [vmem:[%s972_s24 + $0xb4] ss:$8 sps:$4 sm:$0xff]   ;;  %v893_v25 = vld [vmem:[%s972_s24 + $0xb0] ss:$8 sps:$4 sm:$0xff]   ;;  %v896_v27 = vld [vmem:[%s972_s24 + $0xc4] ss:$8 sps:$4 sm:$0xff]  }
  0x16   : > { %v898_v28 = vld [vmem:[%s972_s24 + $0x40] ss:$8 sps:$4 sm:$0xff]   ;;  %v900_v30 = vld [vmem:[%s972_s24 + $0x54] ss:$8 sps:$4 sm:$0xff]   ;;  %v904_v32 = vld [vmem:[%s972_s24 + $0x50] ss:$8 sps:$4 sm:$0xff]  }
  0x17   : > { %491 = vmatpush1.bf16.msra.mxu0 %v865_v7  ;;  %847 = vmatpush1.bf16.msra.mxu1 %v865_v7  ;;  %v899_v29 = vld [vmem:[%s972_s24 + $0xc0] ss:$8 sps:$4 sm:$0xff]   ;;  %v902_v31 = vld [vmem:[%s972_s24 + $0xd4] ss:$8 sps:$4 sm:$0xff]   ;;  %v905_v33 = vld [vmem:[%s972_s24 + $0xd0] ss:$8 sps:$4 sm:$0xff]  }
  0x18   : > { %492 = vmatprep.subr.bf16.mxu0 %v926_v1  ;;  %839 = vmatprep.subr.bf16.mxu1 %v926_v1  ;;  %v906_v34 = vld [vmem:[%s972_s24 + $0x64] ss:$8 sps:$4 sm:$0xff]   ;;  %v910_v36 = vld [vmem:[%s972_s24 + $0x60] ss:$8 sps:$4 sm:$0xff]   ;;  %v912_v38 = vld [vmem:[%s972_s24 + $0x74] ss:$8 sps:$4 sm:$0xff]  }
  0x19   : > { %v908_v35 = vld [vmem:[%s972_s24 + $0xe4] ss:$8 sps:$4 sm:$0xff]   ;;  %v911_v37 = vld [vmem:[%s972_s24 + $0xe0] ss:$8 sps:$4 sm:$0xff]   ;;  %v914_v39 = vld [vmem:[%s972_s24 + $0xf4] ss:$8 sps:$4 sm:$0xff]  }
  0x1a   : > { %v916_v40 = vld [vmem:[%s972_s24 + $0x70] ss:$8 sps:$4 sm:$0xff]  }
  0x1b   : > { %493 = vmatpush1.bf16.msra.mxu0 %v866_v8  ;;  %848 = vmatpush1.bf16.msra.mxu1 %v866_v8  ;;  %v917_v41 = vld [vmem:[%s972_s24 + $0xf0] ss:$8 sps:$4 sm:$0xff]  }
  0x1c   : > { %494 = vmatprep.subr.bf16.mxu0 %v926_v1  ;;  %840 = vmatprep.subr.bf16.mxu1 %v926_v1 }
  0x1f   : > { %495 = vmatpush1.bf16.msra.mxu0 %v867_v9  ;;  %849 = vmatpush1.bf16.msra.mxu1 %v867_v9 }
  0x20   : > { %496 = vmatprep.subr.bf16.mxu0 %v926_v1  ;;  %841 = vmatprep.subr.bf16.mxu1 %v926_v1 }
  0x23   : > { %497 = vmatpush1.bf16.msra.mxu0 %v868_v10  ;;  %850 = vmatpush1.bf16.msra.mxu1 %v868_v10 }
  0x24   : > { %498 = vmatprep.subr.bf16.mxu0 %v926_v1  ;;  %842 = vmatprep.subr.bf16.mxu1 %v926_v1 }
  0x27   : > { %499 = vmatpush1.bf16.msra.mxu0 %v869_v11  ;;  %851 = vmatpush1.bf16.msra.mxu1 %v869_v11 }
  0x2a   : > { %515 = vmatmul.mubr.bf16.vlgmr.msra.gmra.mrb[0].mxu0 %v870_v12  ;;  %579 = vmatmul.mubr.bf16.vlgmr.msra.gmra.mrb[0].mxu1 %v873_v13 }
  0x2b   : > { %816 = vmatprep.mubr.msk.bf16.mxu0 %vm433_vm0, %v876_v14  ;;  %824 = vmatprep.mubr.msk.bf16.mxu1 %vm433_vm0, %v878_v15 }
  0x32   : > { %523 = vmatmul.mubr.bf16.gmra.mrb[4].mxu0 %v880_v16  ;;  %587 = vmatmul.mubr.bf16.gmra.mrb[4].mxu1 %v881_v17 }
  0x33   : > { %817 = vmatprep.mubr.msk.bf16.mxu0 %vm433_vm0, %v882_v18  ;;  %825 = vmatprep.mubr.msk.bf16.mxu1 %vm433_vm0, %v884_v19 }
  0x3a   : > { %531 = vmatmul.mubr.bf16.gmra.mrb[8].mxu0 %v886_v20  ;;  %595 = vmatmul.mubr.bf16.gmra.mrb[8].mxu1 %v887_v21 }
  0x3b   : > { %818 = vmatprep.mubr.msk.bf16.mxu0 %vm433_vm0, %v888_v22  ;;  %826 = vmatprep.mubr.msk.bf16.mxu1 %vm433_vm0, %v890_v23 }
  0x42   : > { %539 = vmatmul.mubr.bf16.gmra.mrb[12].mxu0 %v892_v24  ;;  %603 = vmatmul.mubr.bf16.gmra.mrb[12].mxu1 %v893_v25 }
  0x43   : > { %819 = vmatprep.mubr.msk.bf16.mxu0 %vm433_vm0, %v894_v26  ;;  %827 = vmatprep.mubr.msk.bf16.mxu1 %vm433_vm0, %v896_v27 }
  0x4a   : > { %547 = vmatmul.mubr.bf16.gmra.mrb[16].mxu0 %v898_v28  ;;  %611 = vmatmul.mubr.bf16.gmra.mrb[16].mxu1 %v899_v29 }
  0x4b   : > { %820 = vmatprep.mubr.msk.bf16.mxu0 %vm433_vm0, %v900_v30  ;;  %828 = vmatprep.mubr.msk.bf16.mxu1 %vm433_vm0, %v902_v31 }
  0x52   : > { %555 = vmatmul.mubr.bf16.gmra.mrb[20].mxu0 %v904_v32  ;;  %619 = vmatmul.mubr.bf16.gmra.mrb[20].mxu1 %v905_v33 }
  0x53   : > { %821 = vmatprep.mubr.msk.bf16.mxu0 %vm433_vm0, %v906_v34  ;;  %829 = vmatprep.mubr.msk.bf16.mxu1 %vm433_vm0, %v908_v35 }
  0x5a   : > { %563 = vmatmul.mubr.bf16.gmra.mrb[24].mxu0 %v910_v36  ;;  %627 = vmatmul.mubr.bf16.gmra.mrb[24].mxu1 %v911_v37 }
  0x5b   : > { %822 = vmatprep.mubr.msk.bf16.mxu0 %vm433_vm0, %v912_v38  ;;  %830 = vmatprep.mubr.msk.bf16.mxu1 %vm433_vm0, %v914_v39 }
  0x62   : > { %571 = vmatmul.mubr.bf16.gmra.mrb[28].mxu0 %v916_v40  ;;  %635 = vmatmul.mubr.bf16.gmra.mrb[28].mxu1 %v917_v41 }
  0xfd   : > { %v516_v43 = vpop.f32.mrb[0].mxu0  ;;  %v580_v44 = vpop.f32.mrb[0].mxu1 }
  0xfe   : > { %v517_v45 = vadd.f32 %v1043_v42, %v516_v43  ;;  %v581_v46 = vadd.f32 %v1043_v42, %v580_v44  ;;  %v518_v47 = vpop.f32.mrb[1].mxu0  ;;  %v582_v48 = vpop.f32.mrb[1].mxu1 }
  0xff   : > { %v519_v49 = vpop.f32.mrb[2].mxu0  ;;  %v583_v50 = vpop.f32.mrb[2].mxu1 }
 0x100   : > { %v643_v51 = vmax.f32 %v517_v45, 0.0  ;;  %v659_v52 = vmax.f32 %v581_v46, 0.0  ;;  %v520_v53 = vadd.f32 %v1043_v42, %v519_v49  ;;  %v584_v54 = vadd.f32 %v1043_v42, %v583_v50  ;;  %v521_v55 = vpop.f32.mrb[3].mxu0  ;;  %v585_v56 = vpop.f32.mrb[3].mxu1 }
 0x102   : > { %675 = vst [vmem:[%s1052_s15] sm:$0xff] %v643_v51  ;;  %691 = vst [vmem:[%s1052_s15 + $0x80] sm:$0xff] %v659_v52  ;;  %v644_v57 = vmax.f32 %v520_v53, 0.0  ;;  %v660_v58 = vmax.f32 %v584_v54, 0.0 }
 0x104   : > { %676 = vst [vmem:[%s1052_s15 + $0x8] sm:$0xff] %v644_v57  ;;  %692 = vst [vmem:[%s1052_s15 + $0x88] sm:$0xff] %v660_v58 }
 0x105   : > { %v524_v59 = vpop.f32.mrb[4].mxu0  ;;  %v588_v60 = vpop.f32.mrb[4].mxu1 }
 0x106   : > { %v525_v61 = vadd.f32 %v1043_v42, %v524_v59  ;;  %v589_v62 = vadd.f32 %v1043_v42, %v588_v60  ;;  %v526_v63 = vpop.f32.mrb[5].mxu0  ;;  %v590_v0 = vpop.f32.mrb[5].mxu1 }
 0x107   : > { %v527_v1 = vpop.f32.mrb[6].mxu0  ;;  %v591_v2 = vpop.f32.mrb[6].mxu1 }
 0x108   : > { %v645_v3 = vmax.f32 %v525_v61, 0.0  ;;  %v661_v4 = vmax.f32 %v589_v62, 0.0  ;;  %v528_v5 = vadd.f32 %v1043_v42, %v527_v1  ;;  %v592_v6 = vadd.f32 %v1043_v42, %v591_v2  ;;  %v529_v7 = vpop.f32.mrb[7].mxu0  ;;  %v593_v8 = vpop.f32.mrb[7].mxu1 }
 0x10a   : > { %677 = vst [vmem:[%s1052_s15 + $0x10] sm:$0xff] %v645_v3  ;;  %693 = vst [vmem:[%s1052_s15 + $0x90] sm:$0xff] %v661_v4  ;;  %v646_v9 = vmax.f32 %v528_v5, 0.0  ;;  %v662_v10 = vmax.f32 %v592_v6, 0.0 }
 0x10c   : > { %678 = vst [vmem:[%s1052_s15 + $0x18] sm:$0xff] %v646_v9  ;;  %694 = vst [vmem:[%s1052_s15 + $0x98] sm:$0xff] %v662_v10 }
 0x10d   : > { %v532_v11 = vpop.f32.mrb[8].mxu0  ;;  %v596_v12 = vpop.f32.mrb[8].mxu1 }
 0x10e   : > { %v533_v13 = vadd.f32 %v1043_v42, %v532_v11  ;;  %v597_v14 = vadd.f32 %v1043_v42, %v596_v12  ;;  %v534_v15 = vpop.f32.mrb[9].mxu0  ;;  %v598_v16 = vpop.f32.mrb[9].mxu1 }
 0x10f   : > { %v535_v17 = vpop.f32.mrb[10].mxu0  ;;  %v599_v18 = vpop.f32.mrb[10].mxu1 }
 0x110   : > { %v647_v19 = vmax.f32 %v533_v13, 0.0  ;;  %v663_v20 = vmax.f32 %v597_v14, 0.0  ;;  %v536_v21 = vadd.f32 %v1043_v42, %v535_v17  ;;  %v600_v22 = vadd.f32 %v1043_v42, %v599_v18  ;;  %v537_v23 = vpop.f32.mrb[11].mxu0  ;;  %v601_v24 = vpop.f32.mrb[11].mxu1 }
 0x112   : > { %679 = vst [vmem:[%s1052_s15 + $0x20] sm:$0xff] %v647_v19  ;;  %695 = vst [vmem:[%s1052_s15 + $0xa0] sm:$0xff] %v663_v20  ;;  %v648_v25 = vmax.f32 %v536_v21, 0.0  ;;  %v664_v26 = vmax.f32 %v600_v22, 0.0 }
 0x114   : > { %680 = vst [vmem:[%s1052_s15 + $0x28] sm:$0xff] %v648_v25  ;;  %696 = vst [vmem:[%s1052_s15 + $0xa8] sm:$0xff] %v664_v26 }
 0x115   : > { %v540_v27 = vpop.f32.mrb[12].mxu0  ;;  %v604_v28 = vpop.f32.mrb[12].mxu1 }
 0x116   : > { %v541_v29 = vadd.f32 %v1043_v42, %v540_v27  ;;  %v605_v30 = vadd.f32 %v1043_v42, %v604_v28  ;;  %v542_v31 = vpop.f32.mrb[13].mxu0  ;;  %v606_v32 = vpop.f32.mrb[13].mxu1 }
 0x117   : > { %v543_v33 = vpop.f32.mrb[14].mxu0  ;;  %v607_v34 = vpop.f32.mrb[14].mxu1 }
 0x118   : > { %v649_v35 = vmax.f32 %v541_v29, 0.0  ;;  %v665_v36 = vmax.f32 %v605_v30, 0.0  ;;  %v544_v37 = vadd.f32 %v1043_v42, %v543_v33  ;;  %v608_v38 = vadd.f32 %v1043_v42, %v607_v34  ;;  %v545_v39 = vpop.f32.mrb[15].mxu0  ;;  %v609_v40 = vpop.f32.mrb[15].mxu1 }
 0x11a   : > { %681 = vst [vmem:[%s1052_s15 + $0x30] sm:$0xff] %v649_v35  ;;  %697 = vst [vmem:[%s1052_s15 + $0xb0] sm:$0xff] %v665_v36  ;;  %v650_v41 = vmax.f32 %v544_v37, 0.0  ;;  %v666_v43 = vmax.f32 %v608_v38, 0.0 }
 0x11c   : > { %682 = vst [vmem:[%s1052_s15 + $0x38] sm:$0xff] %v650_v41  ;;  %698 = vst [vmem:[%s1052_s15 + $0xb8] sm:$0xff] %v666_v43 }
 0x11d   : > { %v548_v44 = vpop.f32.mrb[16].mxu0  ;;  %v612_v45 = vpop.f32.mrb[16].mxu1 }
 0x11e   : > { %v549_v46 = vadd.f32 %v1043_v42, %v548_v44  ;;  %v613_v47 = vadd.f32 %v1043_v42, %v612_v45  ;;  %v550_v48 = vpop.f32.mrb[17].mxu0  ;;  %v614_v49 = vpop.f32.mrb[17].mxu1 }
 0x11f   : > { %v551_v50 = vpop.f32.mrb[18].mxu0  ;;  %v615_v51 = vpop.f32.mrb[18].mxu1 }
 0x120   : > { %v651_v52 = vmax.f32 %v549_v46, 0.0  ;;  %v667_v53 = vmax.f32 %v613_v47, 0.0  ;;  %v552_v54 = vadd.f32 %v1043_v42, %v551_v50  ;;  %v616_v55 = vadd.f32 %v1043_v42, %v615_v51  ;;  %v553_v56 = vpop.f32.mrb[19].mxu0  ;;  %v617_v57 = vpop.f32.mrb[19].mxu1 }
 0x122   : > { %683 = vst [vmem:[%s1052_s15 + $0x40] sm:$0xff] %v651_v52  ;;  %699 = vst [vmem:[%s1052_s15 + $0xc0] sm:$0xff] %v667_v53  ;;  %v652_v58 = vmax.f32 %v552_v54, 0.0  ;;  %v668_v59 = vmax.f32 %v616_v55, 0.0 }
 0x124   : > { %684 = vst [vmem:[%s1052_s15 + $0x48] sm:$0xff] %v652_v58  ;;  %700 = vst [vmem:[%s1052_s15 + $0xc8] sm:$0xff] %v668_v59 }
 0x125   : > { %v556_v60 = vpop.f32.mrb[20].mxu0  ;;  %v620_v61 = vpop.f32.mrb[20].mxu1 }
 0x126   : > { %v557_v62 = vadd.f32 %v1043_v42, %v556_v60  ;;  %v621_v63 = vadd.f32 %v1043_v42, %v620_v61  ;;  %v558_v0 = vpop.f32.mrb[21].mxu0  ;;  %v622_v1 = vpop.f32.mrb[21].mxu1 }
 0x127   : > { %v559_v2 = vpop.f32.mrb[22].mxu0  ;;  %v623_v3 = vpop.f32.mrb[22].mxu1 }
 0x128   : > { %v653_v4 = vmax.f32 %v557_v62, 0.0  ;;  %v669_v5 = vmax.f32 %v621_v63, 0.0  ;;  %v560_v6 = vadd.f32 %v1043_v42, %v559_v2  ;;  %v624_v7 = vadd.f32 %v1043_v42, %v623_v3  ;;  %v561_v8 = vpop.f32.mrb[23].mxu0  ;;  %v625_v9 = vpop.f32.mrb[23].mxu1 }
 0x12a   : > { %685 = vst [vmem:[%s1052_s15 + $0x50] sm:$0xff] %v653_v4  ;;  %701 = vst [vmem:[%s1052_s15 + $0xd0] sm:$0xff] %v669_v5  ;;  %v654_v10 = vmax.f32 %v560_v6, 0.0  ;;  %v670_v11 = vmax.f32 %v624_v7, 0.0 }
 0x12c   : > { %686 = vst [vmem:[%s1052_s15 + $0x58] sm:$0xff] %v654_v10  ;;  %702 = vst [vmem:[%s1052_s15 + $0xd8] sm:$0xff] %v670_v11 }
 0x12d   : > { %v564_v12 = vpop.f32.mrb[24].mxu0  ;;  %v628_v13 = vpop.f32.mrb[24].mxu1 }
 0x12e   : > { %v565_v14 = vadd.f32 %v1043_v42, %v564_v12  ;;  %v629_v15 = vadd.f32 %v1043_v42, %v628_v13  ;;  %v566_v16 = vpop.f32.mrb[25].mxu0  ;;  %v630_v17 = vpop.f32.mrb[25].mxu1 }
 0x12f   : > { %v567_v18 = vpop.f32.mrb[26].mxu0  ;;  %v631_v19 = vpop.f32.mrb[26].mxu1 }
 0x130   : > { %v655_v20 = vmax.f32 %v565_v14, 0.0  ;;  %v671_v21 = vmax.f32 %v629_v15, 0.0  ;;  %v568_v22 = vadd.f32 %v1043_v42, %v567_v18  ;;  %v632_v23 = vadd.f32 %v1043_v42, %v631_v19  ;;  %v569_v24 = vpop.f32.mrb[27].mxu0  ;;  %v633_v25 = vpop.f32.mrb[27].mxu1 }
 0x132   : > { %687 = vst [vmem:[%s1052_s15 + $0x60] sm:$0xff] %v655_v20  ;;  %703 = vst [vmem:[%s1052_s15 + $0xe0] sm:$0xff] %v671_v21  ;;  %v656_v26 = vmax.f32 %v568_v22, 0.0  ;;  %v672_v27 = vmax.f32 %v632_v23, 0.0 }
 0x134   : > { %688 = vst [vmem:[%s1052_s15 + $0x68] sm:$0xff] %v656_v26  ;;  %704 = vst [vmem:[%s1052_s15 + $0xe8] sm:$0xff] %v672_v27 }
 0x135   : > { %v572_v28 = vpop.f32.mrb[28].mxu0  ;;  %v636_v29 = vpop.f32.mrb[28].mxu1 }
 0x136   : > { %v573_v30 = vadd.f32 %v1043_v42, %v572_v28  ;;  %v637_v31 = vadd.f32 %v1043_v42, %v636_v29  ;;  %v574_v32 = vpop.f32.mrb[29].mxu0  ;;  %v638_v33 = vpop.f32.mrb[29].mxu1 }
 0x137   : > { %v575_v34 = vpop.f32.mrb[30].mxu0  ;;  %v639_v35 = vpop.f32.mrb[30].mxu1 }
 0x138   : > { %v657_v36 = vmax.f32 %v573_v30, 0.0  ;;  %v673_v37 = vmax.f32 %v637_v31, 0.0  ;;  %v576_v38 = vadd.f32 %v1043_v42, %v575_v34  ;;  %v640_v39 = vadd.f32 %v1043_v42, %v639_v35  ;;  %v577_v40 = vpop.f32.mrb[31].mxu0  ;;  %v641_v41 = vpop.f32.mrb[31].mxu1 }
 0x13a   : > { %689 = vst [vmem:[%s1052_s15 + $0x70] sm:$0xff] %v657_v36  ;;  %705 = vst [vmem:[%s1052_s15 + $0xf0] sm:$0xff] %v673_v37  ;;  %v658_v43 = vmax.f32 %v576_v38, 0.0  ;;  %v674_v44 = vmax.f32 %v640_v39, 0.0 }
 0x13c   : > { %690 = vst [vmem:[%s1052_s15 + $0x78] sm:$0xff] %v658_v43  ;;  %706 = vst [vmem:[%s1052_s15 + $0xf8] sm:$0xff] %v674_v44 }
 0x13d PF: > { %s13_s12 = sadd.s32 1, %s924_s12  }
 0x13e   : > { %p10_p4 = scmp.ge.s32.totalorder %s13_s12, 4  }
 0x140   :  { %12 = sbr.rel (!%p10_p4) target bundleno = 1 (0x1), region = 62 }

// kernel: resnet_forward.10
= control target key start
LH: loop header
LB: loop body
LE: loop exit
PB: predicated region body
PF: predicated region fallthrough
CT: control target
= control target key end

     0   :  { %s1079_s15 = smov 0   ;;  %s1286_s0 = inlined_call_operand.vmem [shape: bf16[512,144], index: 0, kind: input, shape index: {}]   ;;  %s1287_s1 = inlined_call_operand.vmem [shape: bf16[144,128], index: 1, kind: input, shape index: {}]   ;;  %s1288_s2 = inlined_call_operand.vmem [shape: f32[1,128], index: 2, kind: input, shape index: {}]   ;;  %s1289_s3 = inlined_call_operand.vmem [shape: f32[512,128], index: 3, kind: input, shape index: {}]   ;;  %s1290_s4 = inlined_call_operand.vmem [shape: f32[512,128], index: 4, kind: output, shape index: {}]  }
   0x1 LB: > { %s888_s16 = sadd.s32 4294967295, %s1051_s15   ;;  %p892_p0 = scmp.ge.s32.totalorder %s1051_s15, 1  ;;  %s1051_s15 = sphi %s1079_s15, %s14_s15  }
   0x2   : > { %p175_p1 = scmp.lt.s32.totalorder %s1051_s15, 3 }
   0x4   : > { %p176_p2 = pnand %p892_p0, %p175_p1 }
   0x5   : > { %v988_v0 = vld [vmem:[%s1287_s1] sm:$0xff] (!%p176_p2)   ;;  %v1053_v1 = vmov (!%p176_p2), 0   ;;  %s893_s19 = sshll.u32 (!%p176_p2), %s888_s16, 5  ;;  %v989_v2 = vld [vmem:[%s1287_s1 + $0x8] sm:$0xff] (!%p176_p2)   ;;  %v990_v3 = vld [vmem:[%s1287_s1 + $0x10] sm:$0xff] (!%p176_p2)   ;;  %vm482_vm0 = vcmask (!%p176_p2), 130048  }
   0x6   : > { %179 = sbr.rel (%p176_p2) target bundleno = 319 (0x13f), region = 36  ;;  %531 = vmatprep.subr.bf16.mxu0 (!%p176_p2), %v1053_v1  ;;  %961 = vmatprep.subr.bf16.mxu1 (!%p176_p2), %v1053_v1  ;;  %p208_p3 = scmp.lt.s32.totalorder (!%p176_p2), %s893_s19, 63  ;;  %v991_v4 = vld [vmem:[%s1287_s1 + $0x18] sm:$0xff] (!%p176_p2)   ;;  %v992_v7 = vld [vmem:[%s1287_s1 + $0x20] sm:$0xff] (!%p176_p2)   ;;  %v993_v8 = vld [vmem:[%s1287_s1 + $0x28] sm:$0xff] (!%p176_p2)  }
   0x7   : > { %532 = vmatpush1.bf16.msra.mxu0 (!%p176_p2), %v988_v0  ;;  %970 = vmatpush1.bf16.msra.mxu1 (!%p176_p2), %v988_v0  ;;  %v994_v9 = vld [vmem:[%s1287_s1 + $0x30] sm:$0xff] (!%p176_p2)   ;;  %v995_v10 = vld [vmem:[%s1287_s1 + $0x38] sm:$0xff] (!%p176_p2)   ;;  %v996_v11 = vld [vmem:[%s1287_s1 + $0x40] sm:$0xff] (!%p176_p2)  }
   0x8   : > { %533 = vmatprep.subr.bf16.mxu0 (!%p176_p2), %v1053_v1  ;;  %962 = vmatprep.subr.bf16.mxu1 (!%p176_p2), %v1053_v1  ;;  %v1179_v42 = vld [vmem:[%s1288_s2] ss:$0 sm:$0xff] (!%p176_p2) }
   0xb   : > { %534 = vmatpush1.bf16.msra.mxu0 (!%p176_p2), %v989_v2  ;;  %971 = vmatpush1.bf16.msra.mxu1 (!%p176_p2), %v989_v2 }
   0xc   : > { %535 = vmatprep.subr.bf16.mxu0 (!%p176_p2), %v1053_v1  ;;  %963 = vmatprep.subr.bf16.mxu1 (!%p176_p2), %v1053_v1 }
   0xd   : > { %s1292_s19 = smov (!%p208_p3, %s893_s19), 63 }
   0xe   : > { %s1096_s24 = sshll.u32 %s1292_s19, 3 }
   0xf   : > { %s1102_s27 = scalar_lea.vmem %s1286_s0, %s1096_s24  ;;  %536 = vmatpush1.bf16.msra.mxu0 %v990_v3  ;;  %972 = vmatpush1.bf16.msra.mxu1 %v990_v3  ;;  %s1174_s17 = scalar_lea.vmem %s1289_s3, %s1096_s24 }
  0x10   : > { %v999_v5 = vld [vmem:[%s1102_s27 + $0x4] ss:$8 sps:$4 sm:$0xff]   ;;  %537 = vmatprep.subr.bf16.mxu0 %v1053_v1  ;;  %964 = vmatprep.subr.bf16.mxu1 %v1053_v1  ;;  %v997_v12 = vld [vmem:[%s1102_s27] ss:$8 sps:$4 sm:$0xff]   ;;  %v1003_v14 = vld [vmem:[%s1102_s27 + $0x14] ss:$8 sps:$4 sm:$0xff]   ;;  %s1193_s22 = scalar_lea.vmem %s1290_s4, %s1096_s24 }
  0x11   : > { %v1002_v6 = vld [vmem:[%s1102_s27 + $0x84] ss:$8 sps:$4 sm:$0xff]   ;;  %942 = vmatprep.mubr.msk.bf16.mxu0 %vm482_vm0, %v999_v5  ;;  %v1000_v13 = vld [vmem:[%s1102_s27 + $0x80] ss:$8 sps:$4 sm:$0xff]   ;;  %v1005_v15 = vld [vmem:[%s1102_s27 + $0x94] ss:$8 sps:$4 sm:$0xff]  }
  0x12   : > { %950 = vmatprep.mubr.msk.bf16.mxu1 %vm482_vm0, %v1002_v6  ;;  %v1007_v16 = vld [vmem:[%s1102_s27 + $0x10] ss:$8 sps:$4 sm:$0xff]   ;;  %v1009_v18 = vld [vmem:[%s1102_s27 + $0x24] ss:$8 sps:$4 sm:$0xff]   ;;  %v1013_v20 = vld [vmem:[%s1102_s27 + $0x20] ss:$8 sps:$4 sm:$0xff]  }
  0x13   : > { %538 = vmatpush1.bf16.msra.mxu0 %v991_v4  ;;  %973 = vmatpush1.bf16.msra.mxu1 %v991_v4  ;;  %v1008_v17 = vld [vmem:[%s1102_s27 + $0x90] ss:$8 sps:$4 sm:$0xff]   ;;  %v1011_v19 = vld [vmem:[%s1102_s27 + $0xa4] ss:$8 sps:$4 sm:$0xff]   ;;  %v1014_v21 = vld [vmem:[%s1102_s27 + $0xa0] ss:$8 sps:$4 sm:$0xff]  }
  0x14   : > { %539 = vmatprep.subr.bf16.mxu0 %v1053_v1  ;;  %965 = vmatprep.subr.bf16.mxu1 %v1053_v1  ;;  %v1015_v22 = vld [vmem:[%s1102_s27 + $0x34] ss:$8 sps:$4 sm:$0xff]   ;;  %v1019_v24 = vld [vmem:[%s1102_s27 + $0x30] ss:$8 sps:$4 sm:$0xff]   ;;  %v1021_v26 = vld [vmem:[%s1102_s27 + $0x44] ss:$8 sps:$4 sm:$0xff]  }
  0x15   : > { %v1017_v23 = vld [vmem:[%s1102_s27 + $0xb4] ss:$8 sps:$4 sm:$0xff]   ;;  %v1020_v25 = vld [vmem:[%s1102_s27 + $0xb0] ss:$8 sps:$4 sm:$0xff]   ;;  %v1023_v27 = vld [vmem:[%s1102_s27 + $0xc4] ss:$8 sps:$4 sm:$0xff]  }
  0x16   : > { %v1025_v28 = vld [vmem:[%s1102_s27 + $0x40] ss:$8 sps:$4 sm:$0xff]   ;;  %v1027_v30 = vld [vmem:[%s1102_s27 + $0x54] ss:$8 sps:$4 sm:$0xff]   ;;  %v1031_v32 = vld [vmem:[%s1102_s27 + $0x50] ss:$8 sps:$4 sm:$0xff]  }
  0x17   : > { %540 = vmatpush1.bf16.msra.mxu0 %v992_v7  ;;  %974 = vmatpush1.bf16.msra.mxu1 %v992_v7  ;;  %v1026_v29 = vld [vmem:[%s1102_s27 + $0xc0] ss:$8 sps:$4 sm:$0xff]   ;;  %v1029_v31 = vld [vmem:[%s1102_s27 + $0xd4] ss:$8 sps:$4 sm:$0xff]   ;;  %v1032_v33 = vld [vmem:[%s1102_s27 + $0xd0] ss:$8 sps:$4 sm:$0xff]  }
  0x18   : > { %541 = vmatprep.subr.bf16.mxu0 %v1053_v1  ;;  %966 = vmatprep.subr.bf16.mxu1 %v1053_v1  ;;  %v1033_v34 = vld [vmem:[%s1102_s27 + $0x64] ss:$8 sps:$4 sm:$0xff]   ;;  %v1037_v36 = vld [vmem:[%s1102_s27 + $0x60] ss:$8 sps:$4 sm:$0xff]   ;;  %v1039_v38 = vld [vmem:[%s1102_s27 + $0x74] ss:$8 sps:$4 sm:$0xff]  }
  0x19   : > { %v1035_v35 = vld [vmem:[%s1102_s27 + $0xe4] ss:$8 sps:$4 sm:$0xff]   ;;  %v1038_v37 = vld [vmem:[%s1102_s27 + $0xe0] ss:$8 sps:$4 sm:$0xff]   ;;  %v1041_v39 = vld [vmem:[%s1102_s27 + $0xf4] ss:$8 sps:$4 sm:$0xff]  }
  0x1a   : > { %v1043_v40 = vld [vmem:[%s1102_s27 + $0x70] ss:$8 sps:$4 sm:$0xff]   ;;  %v692_v44 = vld [vmem:[%s1174_s17] sm:$0xff]  ;;  %v693_v52 = vld [vmem:[%s1174_s17 + $0x8] sm:$0xff] }
  0x1b   : > { %542 = vmatpush1.bf16.msra.mxu0 %v993_v8  ;;  %975 = vmatpush1.bf16.msra.mxu1 %v993_v8  ;;  %v1044_v41 = vld [vmem:[%s1102_s27 + $0xf0] ss:$8 sps:$4 sm:$0xff]   ;;  %v708_v46 = vld [vmem:[%s1174_s17 + $0x80] sm:$0xff]  ;;  %v709_v54 = vld [vmem:[%s1174_s17 + $0x88] sm:$0xff] }
  0x1c   : > { %543 = vmatprep.subr.bf16.mxu0 %v1053_v1  ;;  %967 = vmatprep.subr.bf16.mxu1 %v1053_v1  ;;  %v694_v4 = vld [vmem:[%s1174_s17 + $0x10] sm:$0xff] }
  0x1d   : > { %v710_v6 = vld [vmem:[%s1174_s17 + $0x90] sm:$0xff] }
  0x1f   : > { %544 = vmatpush1.bf16.msra.mxu0 %v994_v9  ;;  %976 = vmatpush1.bf16.msra.mxu1 %v994_v9 }
  0x20   : > { %545 = vmatprep.subr.bf16.mxu0 %v1053_v1  ;;  %968 = vmatprep.subr.bf16.mxu1 %v1053_v1 }
  0x23   : > { %546 = vmatpush1.bf16.msra.mxu0 %v995_v10  ;;  %977 = vmatpush1.bf16.msra.mxu1 %v995_v10 }
  0x24   : > { %547 = vmatprep.subr.bf16.mxu0 %v1053_v1  ;;  %969 = vmatprep.subr.bf16.mxu1 %v1053_v1 }
  0x27   : > { %548 = vmatpush1.bf16.msra.mxu0 %v996_v11  ;;  %978 = vmatpush1.bf16.msra.mxu1 %v996_v11 }
  0x2a   : > { %564 = vmatmul.mubr.bf16.vlgmr.msra.gmra.mrb[0].mxu0 %v997_v12  ;;  %628 = vmatmul.mubr.bf16.vlgmr.msra.gmra.mrb[0].mxu1 %v1000_v13  ;;  %v695_v12 = vld [vmem:[%s1174_s17 + $0x18] sm:$0xff] }
  0x2b   : > { %943 = vmatprep.mubr.msk.bf16.mxu0 %vm482_vm0, %v1003_v14  ;;  %951 = vmatprep.mubr.msk.bf16.mxu1 %vm482_vm0, %v1005_v15  ;;  %v711_v14 = vld [vmem:[%s1174_s17 + $0x98] sm:$0xff] }
  0x32   : > { %572 = vmatmul.mubr.bf16.gmra.mrb[4].mxu0 %v1007_v16  ;;  %636 = vmatmul.mubr.bf16.gmra.mrb[4].mxu1 %v1008_v17 }
  0x33   : > { %944 = vmatprep.mubr.msk.bf16.mxu0 %vm482_vm0, %v1009_v18  ;;  %952 = vmatprep.mubr.msk.bf16.mxu1 %vm482_vm0, %v1011_v19 }
  0x3a   : > { %580 = vmatmul.mubr.bf16.gmra.mrb[8].mxu0 %v1013_v20  ;;  %644 = vmatmul.mubr.bf16.gmra.mrb[8].mxu1 %v1014_v21 }
  0x3b   : > { %945 = vmatprep.mubr.msk.bf16.mxu0 %vm482_vm0, %v1015_v22  ;;  %953 = vmatprep.mubr.msk.bf16.mxu1 %vm482_vm0, %v1017_v23 }
  0x42   : > { %588 = vmatmul.mubr.bf16.gmra.mrb[12].mxu0 %v1019_v24  ;;  %652 = vmatmul.mubr.bf16.gmra.mrb[12].mxu1 %v1020_v25 }
  0x43   : > { %946 = vmatprep.mubr.msk.bf16.mxu0 %vm482_vm0, %v1021_v26  ;;  %954 = vmatprep.mubr.msk.bf16.mxu1 %vm482_vm0, %v1023_v27 }
  0x4a   : > { %596 = vmatmul.mubr.bf16.gmra.mrb[16].mxu0 %v1025_v28  ;;  %660 = vmatmul.mubr.bf16.gmra.mrb[16].mxu1 %v1026_v29  ;;  %v696_v28 = vld [vmem:[%s1174_s17 + $0x20] sm:$0xff] }
  0x4b   : > { %947 = vmatprep.mubr.msk.bf16.mxu0 %vm482_vm0, %v1027_v30  ;;  %955 = vmatprep.mubr.msk.bf16.mxu1 %vm482_vm0, %v1029_v31  ;;  %v712_v30 = vld [vmem:[%s1174_s17 + $0xa0] sm:$0xff] }
  0x52   : > { %604 = vmatmul.mubr.bf16.gmra.mrb[20].mxu0 %v1031_v32  ;;  %668 = vmatmul.mubr.bf16.gmra.mrb[20].mxu1 %v1032_v33 }
  0x53   : > { %948 = vmatprep.mubr.msk.bf16.mxu0 %vm482_vm0, %v1033_v34  ;;  %956 = vmatprep.mubr.msk.bf16.mxu1 %vm482_vm0, %v1035_v35 }
  0x5a   : > { %612 = vmatmul.mubr.bf16.gmra.mrb[24].mxu0 %v1037_v36  ;;  %676 = vmatmul.mubr.bf16.gmra.mrb[24].mxu1 %v1038_v37  ;;  %v697_v36 = vld [vmem:[%s1174_s17 + $0x28] sm:$0xff] }
  0x5b   : > { %949 = vmatprep.mubr.msk.bf16.mxu0 %vm482_vm0, %v1039_v38  ;;  %957 = vmatprep.mubr.msk.bf16.mxu1 %vm482_vm0, %v1041_v39  ;;  %v713_v38 = vld [vmem:[%s1174_s17 + $0xa8] sm:$0xff] }
  0x62   : > { %620 = vmatmul.mubr.bf16.gmra.mrb[28].mxu0 %v1043_v40  ;;  %684 = vmatmul.mubr.bf16.gmra.mrb[28].mxu1 %v1044_v41 }
  0xfd   : > { %v565_v43 = vpop.f32.mrb[0].mxu0  ;;  %v629_v45 = vpop.f32.mrb[0].mxu1 }
  0xfe   : > { %v566_v47 = vadd.f32 %v1179_v42, %v565_v43  ;;  %v630_v48 = vadd.f32 %v1179_v42, %v629_v45  ;;  %v567_v49 = vpop.f32.mrb[1].mxu0  ;;  %v631_v50 = vpop.f32.mrb[1].mxu1 }
  0xff   : > { %v568_v51 = vpop.f32.mrb[2].mxu0  ;;  %v632_v53 = vpop.f32.mrb[2].mxu1 }
 0x100   : > { %v724_v55 = vadd.f32 %v692_v44, %v566_v47  ;;  %v740_v56 = vadd.f32 %v708_v46, %v630_v48  ;;  %v569_v57 = vadd.f32 %v1179_v42, %v568_v51  ;;  %v633_v58 = vadd.f32 %v1179_v42, %v632_v53  ;;  %v570_v59 = vpop.f32.mrb[3].mxu0  ;;  %v634_v60 = vpop.f32.mrb[3].mxu1  ;;  %v698_v53 = vld [vmem:[%s1174_s17 + $0x30] sm:$0xff] }
 0x102   : > { %v756_v61 = vmax.f32 %v724_v55, 0.0  ;;  %v772_v62 = vmax.f32 %v740_v56, 0.0  ;;  %v725_v63 = vadd.f32 %v693_v52, %v569_v57  ;;  %v741_v0 = vadd.f32 %v709_v54, %v633_v58  ;;  %v714_v55 = vld [vmem:[%s1174_s17 + $0xb0] sm:$0xff] }
 0x104   : > { %788 = vst [vmem:[%s1193_s22] sm:$0xff] %v756_v61  ;;  %804 = vst [vmem:[%s1193_s22 + $0x80] sm:$0xff] %v772_v62  ;;  %v757_v1 = vmax.f32 %v725_v63, 0.0  ;;  %v773_v2 = vmax.f32 %v741_v0, 0.0  ;;  %v699_v61 = vld [vmem:[%s1174_s17 + $0x38] sm:$0xff] }
 0x105   : > { %v573_v3 = vpop.f32.mrb[4].mxu0  ;;  %v637_v5 = vpop.f32.mrb[4].mxu1  ;;  %v715_v63 = vld [vmem:[%s1174_s17 + $0xb8] sm:$0xff] }
 0x106   : > { %789 = vst [vmem:[%s1193_s22 + $0x8] sm:$0xff] %v757_v1  ;;  %805 = vst [vmem:[%s1193_s22 + $0x88] sm:$0xff] %v773_v2  ;;  %v574_v7 = vadd.f32 %v1179_v42, %v573_v3  ;;  %v638_v8 = vadd.f32 %v1179_v42, %v637_v5  ;;  %v575_v9 = vpop.f32.mrb[5].mxu0  ;;  %v639_v10 = vpop.f32.mrb[5].mxu1 }
 0x107   : > { %v576_v11 = vpop.f32.mrb[6].mxu0  ;;  %v640_v13 = vpop.f32.mrb[6].mxu1 }
 0x108   : > { %v726_v15 = vadd.f32 %v694_v4, %v574_v7  ;;  %v742_v16 = vadd.f32 %v710_v6, %v638_v8  ;;  %v577_v17 = vadd.f32 %v1179_v42, %v576_v11  ;;  %v641_v18 = vadd.f32 %v1179_v42, %v640_v13  ;;  %v578_v19 = vpop.f32.mrb[7].mxu0  ;;  %v642_v20 = vpop.f32.mrb[7].mxu1  ;;  %v700_v13 = vld [vmem:[%s1174_s17 + $0x40] sm:$0xff] }
 0x10a   : > { %v758_v21 = vmax.f32 %v726_v15, 0.0  ;;  %v774_v22 = vmax.f32 %v742_v16, 0.0  ;;  %v727_v23 = vadd.f32 %v695_v12, %v577_v17  ;;  %v743_v24 = vadd.f32 %v711_v14, %v641_v18  ;;  %v716_v15 = vld [vmem:[%s1174_s17 + $0xc0] sm:$0xff] }
 0x10c   : > { %790 = vst [vmem:[%s1193_s22 + $0x10] sm:$0xff] %v758_v21  ;;  %806 = vst [vmem:[%s1193_s22 + $0x90] sm:$0xff] %v774_v22  ;;  %v759_v25 = vmax.f32 %v727_v23, 0.0  ;;  %v775_v26 = vmax.f32 %v743_v24, 0.0  ;;  %v701_v21 = vld [vmem:[%s1174_s17 + $0x48] sm:$0xff] }
 0x10d   : > { %v581_v27 = vpop.f32.mrb[8].mxu0  ;;  %v645_v29 = vpop.f32.mrb[8].mxu1  ;;  %v717_v23 = vld [vmem:[%s1174_s17 + $0xc8] sm:$0xff] }
 0x10e   : > { %791 = vst [vmem:[%s1193_s22 + $0x18] sm:$0xff] %v759_v25  ;;  %807 = vst [vmem:[%s1193_s22 + $0x98] sm:$0xff] %v775_v26  ;;  %v582_v31 = vadd.f32 %v1179_v42, %v581_v27  ;;  %v646_v32 = vadd.f32 %v1179_v42, %v645_v29  ;;  %v583_v33 = vpop.f32.mrb[9].mxu0  ;;  %v647_v34 = vpop.f32.mrb[9].mxu1 }
 0x10f   : > { %v584_v35 = vpop.f32.mrb[10].mxu0  ;;  %v648_v37 = vpop.f32.mrb[10].mxu1 }
 0x110   : > { %v728_v39 = vadd.f32 %v696_v28, %v582_v31  ;;  %v744_v40 = vadd.f32 %v712_v30, %v646_v32  ;;  %v585_v41 = vadd.f32 %v1179_v42, %v584_v35  ;;  %v649_v43 = vadd.f32 %v1179_v42, %v648_v37  ;;  %v586_v44 = vpop.f32.mrb[11].mxu0  ;;  %v650_v45 = vpop.f32.mrb[11].mxu1  ;;  %v702_v37 = vld [vmem:[%s1174_s17 + $0x50] sm:$0xff] }
 0x112   : > { %v760_v46 = vmax.f32 %v728_v39, 0.0  ;;  %v776_v47 = vmax.f32 %v744_v40, 0.0  ;;  %v729_v48 = vadd.f32 %v697_v36, %v585_v41  ;;  %v745_v49 = vadd.f32 %v713_v38, %v649_v43  ;;  %v718_v39 = vld [vmem:[%s1174_s17 + $0xd0] sm:$0xff] }
 0x114   : > { %792 = vst [vmem:[%s1193_s22 + $0x20] sm:$0xff] %v760_v46  ;;  %808 = vst [vmem:[%s1193_s22 + $0xa0] sm:$0xff] %v776_v47  ;;  %v761_v50 = vmax.f32 %v729_v48, 0.0  ;;  %v777_v51 = vmax.f32 %v745_v49, 0.0  ;;  %v703_v46 = vld [vmem:[%s1174_s17 + $0x58] sm:$0xff] }
 0x115   : > { %v589_v52 = vpop.f32.mrb[12].mxu0  ;;  %v653_v54 = vpop.f32.mrb[12].mxu1  ;;  %v719_v48 = vld [vmem:[%s1174_s17 + $0xd8] sm:$0xff] }
 0x116   : > { %793 = vst [vmem:[%s1193_s22 + $0x28] sm:$0xff] %v761_v50  ;;  %809 = vst [vmem:[%s1193_s22 + $0xa8] sm:$0xff] %v777_v51  ;;  %v590_v56 = vadd.f32 %v1179_v42, %v589_v52  ;;  %v654_v57 = vadd.f32 %v1179_v42, %v653_v54  ;;  %v591_v58 = vpop.f32.mrb[13].mxu0  ;;  %v655_v59 = vpop.f32.mrb[13].mxu1 }
 0x117   : > { %v592_v60 = vpop.f32.mrb[14].mxu0  ;;  %v656_v62 = vpop.f32.mrb[14].mxu1 }
 0x118   : > { %v730_v0 = vadd.f32 %v698_v53, %v590_v56  ;;  %v746_v1 = vadd.f32 %v714_v55, %v654_v57  ;;  %v593_v2 = vadd.f32 %v1179_v42, %v592_v60  ;;  %v657_v3 = vadd.f32 %v1179_v42, %v656_v62  ;;  %v594_v4 = vpop.f32.mrb[15].mxu0  ;;  %v658_v5 = vpop.f32.mrb[15].mxu1  ;;  %v704_v62 = vld [vmem:[%s1174_s17 + $0x60] sm:$0xff] }
 0x11a   : > { %v762_v6 = vmax.f32 %v730_v0, 0.0  ;;  %v778_v7 = vmax.f32 %v746_v1, 0.0  ;;  %v731_v8 = vadd.f32 %v699_v61, %v593_v2  ;;  %v747_v9 = vadd.f32 %v715_v63, %v657_v3  ;;  %v720_v0 = vld [vmem:[%s1174_s17 + $0xe0] sm:$0xff] }
 0x11c   : > { %794 = vst [vmem:[%s1193_s22 + $0x30] sm:$0xff] %v762_v6  ;;  %810 = vst [vmem:[%s1193_s22 + $0xb0] sm:$0xff] %v778_v7  ;;  %v763_v10 = vmax.f32 %v731_v8, 0.0  ;;  %v779_v11 = vmax.f32 %v747_v9, 0.0  ;;  %v705_v6 = vld [vmem:[%s1174_s17 + $0x68] sm:$0xff] }
 0x11d   : > { %v597_v12 = vpop.f32.mrb[16].mxu0  ;;  %v661_v14 = vpop.f32.mrb[16].mxu1  ;;  %v721_v8 = vld [vmem:[%s1174_s17 + $0xe8] sm:$0xff] }
 0x11e   : > { %795 = vst [vmem:[%s1193_s22 + $0x38] sm:$0xff] %v763_v10  ;;  %811 = vst [vmem:[%s1193_s22 + $0xb8] sm:$0xff] %v779_v11  ;;  %v598_v16 = vadd.f32 %v1179_v42, %v597_v12  ;;  %v662_v17 = vadd.f32 %v1179_v42, %v661_v14  ;;  %v599_v18 = vpop.f32.mrb[17].mxu0  ;;  %v663_v19 = vpop.f32.mrb[17].mxu1 }
 0x11f   : > { %v600_v20 = vpop.f32.mrb[18].mxu0  ;;  %v664_v22 = vpop.f32.mrb[18].mxu1 }
 0x120   : > { %v732_v24 = vadd.f32 %v700_v13, %v598_v16  ;;  %v748_v25 = vadd.f32 %v716_v15, %v662_v17  ;;  %v601_v26 = vadd.f32 %v1179_v42, %v600_v20  ;;  %v665_v27 = vadd.f32 %v1179_v42, %v664_v22  ;;  %v602_v28 = vpop.f32.mrb[19].mxu0  ;;  %v666_v29 = vpop.f32.mrb[19].mxu1  ;;  %v706_v22 = vld [vmem:[%s1174_s17 + $0x70] sm:$0xff] }
 0x122   : > { %v764_v30 = vmax.f32 %v732_v24, 0.0  ;;  %v780_v31 = vmax.f32 %v748_v25, 0.0  ;;  %v733_v32 = vadd.f32 %v701_v21, %v601_v26  ;;  %v749_v33 = vadd.f32 %v717_v23, %v665_v27  ;;  %v722_v24 = vld [vmem:[%s1174_s17 + $0xf0] sm:$0xff] }
 0x124   : > { %796 = vst [vmem:[%s1193_s22 + $0x40] sm:$0xff] %v764_v30  ;;  %812 = vst [vmem:[%s1193_s22 + $0xc0] sm:$0xff] %v780_v31  ;;  %v765_v34 = vmax.f32 %v733_v32, 0.0  ;;  %v781_v35 = vmax.f32 %v749_v33, 0.0  ;;  %v707_v30 = vld [vmem:[%s1174_s17 + $0x78] sm:$0xff] }
 0x125   : > { %v605_v36 = vpop.f32.mrb[20].mxu0  ;;  %v669_v38 = vpop.f32.mrb[20].mxu1  ;;  %v723_v32 = vld [vmem:[%s1174_s17 + $0xf8] sm:$0xff] }
 0x126   : > { %797 = vst [vmem:[%s1193_s22 + $0x48] sm:$0xff] %v765_v34  ;;  %813 = vst [vmem:[%s1193_s22 + $0xc8] sm:$0xff] %v781_v35  ;;  %v606_v40 = vadd.f32 %v1179_v42, %v605_v36  ;;  %v670_v41 = vadd.f32 %v1179_v42, %v669_v38  ;;  %v607_v43 = vpop.f32.mrb[21].mxu0  ;;  %v671_v44 = vpop.f32.mrb[21].mxu1 }
 0x127   : > { %v608_v45 = vpop.f32.mrb[22].mxu0  ;;  %v672_v47 = vpop.f32.mrb[22].mxu1 }
 0x128   : > { %v734_v49 = vadd.f32 %v702_v37, %v606_v40  ;;  %v750_v50 = vadd.f32 %v718_v39, %v670_v41  ;;  %v609_v51 = vadd.f32 %v1179_v42, %v608_v45  ;;  %v673_v52 = vadd.f32 %v1179_v42, %v672_v47  ;;  %v610_v53 = vpop.f32.mrb[23].mxu0  ;;  %v674_v54 = vpop.f32.mrb[23].mxu1 }
 0x12a   : > { %v766_v55 = vmax.f32 %v734_v49, 0.0  ;;  %v782_v56 = vmax.f32 %v750_v50, 0.0  ;;  %v735_v57 = vadd.f32 %v703_v46, %v609_v51  ;;  %v751_v58 = vadd.f32 %v719_v48, %v673_v52 }
 0x12c   : > { %798 = vst [vmem:[%s1193_s22 + $0x50] sm:$0xff] %v766_v55  ;;  %814 = vst [vmem:[%s1193_s22 + $0xd0] sm:$0xff] %v782_v56  ;;  %v767_v59 = vmax.f32 %v735_v57, 0.0  ;;  %v783_v60 = vmax.f32 %v751_v58, 0.0 }
 0x12d   : > { %v613_v61 = vpop.f32.mrb[24].mxu0  ;;  %v677_v63 = vpop.f32.mrb[24].mxu1 }
 0x12e   : > { %799 = vst [vmem:[%s1193_s22 + $0x58] sm:$0xff] %v767_v59  ;;  %815 = vst [vmem:[%s1193_s22 + $0xd8] sm:$0xff] %v783_v60  ;;  %v614_v1 = vadd.f32 %v1179_v42, %v613_v61  ;;  %v678_v2 = vadd.f32 %v1179_v42, %v677_v63  ;;  %v615_v3 = vpop.f32.mrb[25].mxu0  ;;  %v679_v4 = vpop.f32.mrb[25].mxu1 }
 0x12f   : > { %v616_v5 = vpop.f32.mrb[26].mxu0  ;;  %v680_v7 = vpop.f32.mrb[26].mxu1 }
 0x130   : > { %v736_v9 = vadd.f32 %v704_v62, %v614_v1  ;;  %v752_v10 = vadd.f32 %v720_v0, %v678_v2  ;;  %v617_v11 = vadd.f32 %v1179_v42, %v616_v5  ;;  %v681_v12 = vadd.f32 %v1179_v42, %v680_v7  ;;  %v618_v13 = vpop.f32.mrb[27].mxu0  ;;  %v682_v14 = vpop.f32.mrb[27].mxu1 }
 0x132   : > { %v768_v15 = vmax.f32 %v736_v9, 0.0  ;;  %v784_v16 = vmax.f32 %v752_v10, 0.0  ;;  %v737_v17 = vadd.f32 %v705_v6, %v617_v11  ;;  %v753_v18 = vadd.f32 %v721_v8, %v681_v12 }
 0x134   : > { %800 = vst [vmem:[%s1193_s22 + $0x60] sm:$0xff] %v768_v15  ;;  %816 = vst [vmem:[%s1193_s22 + $0xe0] sm:$0xff] %v784_v16  ;;  %v769_v19 = vmax.f32 %v737_v17, 0.0  ;;  %v785_v20 = vmax.f32 %v753_v18, 0.0 }
 0x135   : > { %v621_v21 = vpop.f32.mrb[28].mxu0  ;;  %v685_v23 = vpop.f32.mrb[28].mxu1 }
 0x136   : > { %801 = vst [vmem:[%s1193_s22 + $0x68] sm:$0xff] %v769_v19  ;;  %817 = vst [vmem:[%s1193_s22 + $0xe8] sm:$0xff] %v785_v20  ;;  %v622_v25 = vadd.f32 %v1179_v42, %v621_v21  ;;  %v686_v26 = vadd.f32 %v1179_v42, %v685_v23  ;;  %v623_v27 = vpop.f32.mrb[29].mxu0  ;;  %v687_v28 = vpop.f32.mrb[29].mxu1 }
 0x137   : > { %v624_v29 = vpop.f32.mrb[30].mxu0  ;;  %v688_v31 = vpop.f32.mrb[30].mxu1 }
 0x138   : > { %v738_v33 = vadd.f32 %v706_v22, %v622_v25  ;;  %v754_v34 = vadd.f32 %v722_v24, %v686_v26  ;;  %v625_v35 = vadd.f32 %v1179_v42, %v624_v29  ;;  %v689_v36 = vadd.f32 %v1179_v42, %v688_v31  ;;  %v626_v37 = vpop.f32.mrb[31].mxu0  ;;  %v690_v38 = vpop.f32.mrb[31].mxu1 }
 0x13a   : > { %v770_v39 = vmax.f32 %v738_v33, 0.0  ;;  %v786_v40 = vmax.f32 %v754_v34, 0.0  ;;  %v739_v41 = vadd.f32 %v707_v30, %v625_v35  ;;  %v755_v43 = vadd.f32 %v723_v32, %v689_v36 }
 0x13c   : > { %802 = vst [vmem:[%s1193_s22 + $0x70] sm:$0xff] %v770_v39  ;;  %818 = vst [vmem:[%s1193_s22 + $0xf0] sm:$0xff] %v786_v40  ;;  %v771_v44 = vmax.f32 %v739_v41, 0.0  ;;  %v787_v45 = vmax.f32 %v755_v43, 0.0 }
 0x13e   : > { %803 = vst [vmem:[%s1193_s22 + $0x78] sm:$0xff] %v771_v44  ;;  %819 = vst [vmem:[%s1193_s22 + $0xf8] sm:$0xff] %v787_v45 }
 0x13f PF: > { %s14_s15 = sadd.s32 1, %s1051_s15  }
 0x140   : > { %p11_p4 = scmp.ge.s32.totalorder %s14_s15, 4  }
 0x142   :  { %13 = sbr.rel (!%p11_p4) target bundleno = 1 (0x1), region = 69 }

// kernel: resnet_forward.11
= control target key start
LH: loop header
LB: loop body
LE: loop exit
PB: predicated region body
PF: predicated region fallthrough
CT: control target
= control target key end

     0   :  { %v426_v0 = vmov 0   ;;  %vm182_vm0 = vcmask 130048   ;;  %s599_s1 = inlined_call_operand.vmem [shape: bf16[144,128], index: 1, kind: input, shape index: {}]   ;;  %s600_s0 = inlined_call_operand.vmem [shape: bf16[128,144], index: 0, kind: input, shape index: {}]   ;;  %s601_s2 = inlined_call_operand.vmem [shape: f32[1,128], index: 2, kind: input, shape index: {}]   ;;  %s602_s3 = inlined_call_operand.vmem [shape: f32[128,128], index: 3, kind: output, shape index: {}]  }
   0x1   :  { %207 = vmatprep.subr.bf16.mxu0 %v426_v0  ;;  %374 = vmatprep.subr.bf16.mxu1 %v426_v0  ;;  %v393_v1 = vld [vmem:[%s599_s1] sm:$0xff]   ;;  %v394_v2 = vld [vmem:[%s599_s1 + $0x8] sm:$0xff]   ;;  %v395_v3 = vld [vmem:[%s599_s1 + $0x10] sm:$0xff]  }
   0x2   :  { %208 = vmatpush1.bf16.msra.mxu0 %v393_v1  ;;  %383 = vmatpush1.bf16.msra.mxu1 %v393_v1  ;;  %v396_v4 = vld [vmem:[%s599_s1 + $0x18] sm:$0xff]   ;;  %v404_v5 = vld [vmem:[%s600_s0 + $0x4] ss:$8 sps:$4 sm:$0xff]   ;;  %v399_v9 = vld [vmem:[%s599_s1 + $0x30] sm:$0xff]  }
   0x3   :  { %209 = vmatprep.subr.bf16.mxu0 %v426_v0  ;;  %375 = vmatprep.subr.bf16.mxu1 %v426_v0  ;;  %v407_v6 = vld [vmem:[%s600_s0 + $0x44] ss:$8 sps:$4 sm:$0xff]   ;;  %v400_v10 = vld [vmem:[%s599_s1 + $0x38] sm:$0xff]   ;;  %v402_v12 = vld [vmem:[%s600_s0] ss:$8 sps:$4 sm:$0xff]  }
   0x4   :  { %366 = vmatprep.mubr.msk.bf16.mxu0 %vm182_vm0, %v404_v5  ;;  %370 = vmatprep.mubr.msk.bf16.mxu1 %vm182_vm0, %v407_v6  ;;  %v397_v7 = vld [vmem:[%s599_s1 + $0x20] sm:$0xff]   ;;  %v398_v8 = vld [vmem:[%s599_s1 + $0x28] sm:$0xff]   ;;  %v408_v14 = vld [vmem:[%s600_s0 + $0x14] ss:$8 sps:$4 sm:$0xff]  }
   0x5   :  { %v401_v11 = vld [vmem:[%s599_s1 + $0x40] sm:$0xff]   ;;  %v410_v15 = vld [vmem:[%s600_s0 + $0x54] ss:$8 sps:$4 sm:$0xff]   ;;  %v412_v16 = vld [vmem:[%s600_s0 + $0x10] ss:$8 sps:$4 sm:$0xff]  }
   0x6   :  { %210 = vmatpush1.bf16.msra.mxu0 %v394_v2  ;;  %384 = vmatpush1.bf16.msra.mxu1 %v394_v2  ;;  %v405_v13 = vld [vmem:[%s600_s0 + $0x40] ss:$8 sps:$4 sm:$0xff]   ;;  %v413_v17 = vld [vmem:[%s600_s0 + $0x50] ss:$8 sps:$4 sm:$0xff]   ;;  %v414_v18 = vld [vmem:[%s600_s0 + $0x24] ss:$8 sps:$4 sm:$0xff]  }
   0x7   :  { %211 = vmatprep.subr.bf16.mxu0 %v426_v0  ;;  %376 = vmatprep.subr.bf16.mxu1 %v426_v0  ;;  %v416_v19 = vld [vmem:[%s600_s0 + $0x64] ss:$8 sps:$4 sm:$0xff]   ;;  %v418_v20 = vld [vmem:[%s600_s0 + $0x20] ss:$8 sps:$4 sm:$0xff]   ;;  %v420_v22 = vld [vmem:[%s600_s0 + $0x34] ss:$8 sps:$4 sm:$0xff]  }
   0x8   :  { %v419_v21 = vld [vmem:[%s600_s0 + $0x60] ss:$8 sps:$4 sm:$0xff]   ;;  %v422_v23 = vld [vmem:[%s600_s0 + $0x74] ss:$8 sps:$4 sm:$0xff]   ;;  %v424_v24 = vld [vmem:[%s600_s0 + $0x30] ss:$8 sps:$4 sm:$0xff]  }
   0x9   :  { %v425_v25 = vld [vmem:[%s600_s0 + $0x70] ss:$8 sps:$4 sm:$0xff]   ;;  %v533_v26 = vld [vmem:[%s601_s2] ss:$0 sm:$0xff] }
   0xa   :  { %212 = vmatpush1.bf16.msra.mxu0 %v395_v3  ;;  %385 = vmatpush1.bf16.msra.mxu1 %v395_v3 }
   0xb   :  { %213 = vmatprep.subr.bf16.mxu0 %v426_v0  ;;  %377 = vmatprep.subr.bf16.mxu1 %v426_v0 }
   0xe   :  { %214 = vmatpush1.bf16.msra.mxu0 %v396_v4  ;;  %386 = vmatpush1.bf16.msra.mxu1 %v396_v4 }
   0xf   :  { %215 = vmatprep.subr.bf16.mxu0 %v426_v0  ;;  %378 = vmatprep.subr.bf16.mxu1 %v426_v0 }
  0x12   :  { %216 = vmatpush1.bf16.msra.mxu0 %v397_v7  ;;  %387 = vmatpush1.bf16.msra.mxu1 %v397_v7 }
  0x13   :  { %217 = vmatprep.subr.bf16.mxu0 %v426_v0  ;;  %379 = vmatprep.subr.bf16.mxu1 %v426_v0 }
  0x16   :  { %218 = vmatpush1.bf16.msra.mxu0 %v398_v8  ;;  %388 = vmatpush1.bf16.msra.mxu1 %v398_v8 }
  0x17   :  { %219 = vmatprep.subr.bf16.mxu0 %v426_v0  ;;  %380 = vmatprep.subr.bf16.mxu1 %v426_v0 }
  0x1a   :  { %220 = vmatpush1.bf16.msra.mxu0 %v399_v9  ;;  %389 = vmatpush1.bf16.msra.mxu1 %v399_v9 }
  0x1b   :  { %221 = vmatprep.subr.bf16.mxu0 %v426_v0  ;;  %381 = vmatprep.subr.bf16.mxu1 %v426_v0 }
  0x1e   :  { %222 = vmatpush1.bf16.msra.mxu0 %v400_v10  ;;  %390 = vmatpush1.bf16.msra.mxu1 %v400_v10 }
  0x1f   :  { %223 = vmatprep.subr.bf16.mxu0 %v426_v0  ;;  %382 = vmatprep.subr.bf16.mxu1 %v426_v0 }
  0x22   :  { %224 = vmatpush1.bf16.msra.mxu0 %v401_v11  ;;  %391 = vmatpush1.bf16.msra.mxu1 %v401_v11 }
  0x25   :  { %240 = vmatmul.mubr.bf16.vlgmr.msra.gmra.mrb[0].mxu0 %v402_v12  ;;  %272 = vmatmul.mubr.bf16.vlgmr.msra.gmra.mrb[0].mxu1 %v405_v13 }
  0x26   :  { %367 = vmatprep.mubr.msk.bf16.mxu0 %vm182_vm0, %v408_v14  ;;  %371 = vmatprep.mubr.msk.bf16.mxu1 %vm182_vm0, %v410_v15 }
  0x2d   :  { %248 = vmatmul.mubr.bf16.gmra.mrb[4].mxu0 %v412_v16  ;;  %280 = vmatmul.mubr.bf16.gmra.mrb[4].mxu1 %v413_v17 }
  0x2e   :  { %368 = vmatprep.mubr.msk.bf16.mxu0 %vm182_vm0, %v414_v18  ;;  %372 = vmatprep.mubr.msk.bf16.mxu1 %vm182_vm0, %v416_v19 }
  0x35   :  { %256 = vmatmul.mubr.bf16.gmra.mrb[8].mxu0 %v418_v20  ;;  %288 = vmatmul.mubr.bf16.gmra.mrb[8].mxu1 %v419_v21 }
  0x36   :  { %369 = vmatprep.mubr.msk.bf16.mxu0 %vm182_vm0, %v420_v22  ;;  %373 = vmatprep.mubr.msk.bf16.mxu1 %vm182_vm0, %v422_v23 }
  0x3d   :  { %264 = vmatmul.mubr.bf16.gmra.mrb[12].mxu0 %v424_v24  ;;  %296 = vmatmul.mubr.bf16.gmra.mrb[12].mxu1 %v425_v25 }
  0xf8   :  { %v241_v27 = vpop.f32.mrb[0].mxu0  ;;  %v273_v28 = vpop.f32.mrb[0].mxu1 }
  0xf9   :  { %v242_v29 = vadd.f32 %v533_v26, %v241_v27  ;;  %v274_v30 = vadd.f32 %v533_v26, %v273_v28  ;;  %v243_v31 = vpop.f32.mrb[1].mxu0  ;;  %v275_v32 = vpop.f32.mrb[1].mxu1 }
  0xfa   :  { %v244_v33 = vpop.f32.mrb[2].mxu0  ;;  %v276_v34 = vpop.f32.mrb[2].mxu1 }
  0xfb   :  { %v304_v35 = vmax.f32 %v242_v29, 0.0  ;;  %v312_v36 = vmax.f32 %v274_v30, 0.0  ;;  %v245_v37 = vadd.f32 %v533_v26, %v244_v33  ;;  %v277_v38 = vadd.f32 %v533_v26, %v276_v34  ;;  %v246_v39 = vpop.f32.mrb[3].mxu0  ;;  %v278_v40 = vpop.f32.mrb[3].mxu1 }
  0xfd   :  { %320 = vst [vmem:[%s602_s3] sm:$0xff] %v304_v35  ;;  %328 = vst [vmem:[%s602_s3 + $0x40] sm:$0xff] %v312_v36  ;;  %v305_v41 = vmax.f32 %v245_v37, 0.0  ;;  %v313_v42 = vmax.f32 %v277_v38, 0.0 }
  0xff   :  { %321 = vst [vmem:[%s602_s3 + $0x8] sm:$0xff] %v305_v41  ;;  %329 = vst [vmem:[%s602_s3 + $0x48] sm:$0xff] %v313_v42 }
 0x100   :  { %v249_v43 = vpop.f32.mrb[4].mxu0  ;;  %v281_v44 = vpop.f32.mrb[4].mxu1 }
 0x101   :  { %v250_v45 = vadd.f32 %v533_v26, %v249_v43  ;;  %v282_v46 = vadd.f32 %v533_v26, %v281_v44  ;;  %v251_v47 = vpop.f32.mrb[5].mxu0  ;;  %v283_v48 = vpop.f32.mrb[5].mxu1 }
 0x102   :  { %v252_v49 = vpop.f32.mrb[6].mxu0  ;;  %v284_v50 = vpop.f32.mrb[6].mxu1 }
 0x103   :  { %v306_v51 = vmax.f32 %v250_v45, 0.0  ;;  %v314_v52 = vmax.f32 %v282_v46, 0.0  ;;  %v253_v53 = vadd.f32 %v533_v26, %v252_v49  ;;  %v285_v54 = vadd.f32 %v533_v26, %v284_v50  ;;  %v254_v55 = vpop.f32.mrb[7].mxu0  ;;  %v286_v56 = vpop.f32.mrb[7].mxu1 }
 0x105   :  { %322 = vst [vmem:[%s602_s3 + $0x10] sm:$0xff] %v306_v51  ;;  %330 = vst [vmem:[%s602_s3 + $0x50] sm:$0xff] %v314_v52  ;;  %v307_v57 = vmax.f32 %v253_v53, 0.0  ;;  %v315_v58 = vmax.f32 %v285_v54, 0.0 }
 0x107   :  { %323 = vst [vmem:[%s602_s3 + $0x18] sm:$0xff] %v307_v57  ;;  %331 = vst [vmem:[%s602_s3 + $0x58] sm:$0xff] %v315_v58 }
 0x108   :  { %v257_v59 = vpop.f32.mrb[8].mxu0  ;;  %v289_v60 = vpop.f32.mrb[8].mxu1 }
 0x109   :  { %v258_v61 = vadd.f32 %v533_v26, %v257_v59  ;;  %v290_v62 = vadd.f32 %v533_v26, %v289_v60  ;;  %v259_v63 = vpop.f32.mrb[9].mxu0  ;;  %v291_v0 = vpop.f32.mrb[9].mxu1 }
 0x10a   :  { %v260_v1 = vpop.f32.mrb[10].mxu0  ;;  %v292_v2 = vpop.f32.mrb[10].mxu1 }
 0x10b   :  { %v308_v3 = vmax.f32 %v258_v61, 0.0  ;;  %v316_v4 = vmax.f32 %v290_v62, 0.0  ;;  %v261_v5 = vadd.f32 %v533_v26, %v260_v1  ;;  %v293_v6 = vadd.f32 %v533_v26, %v292_v2  ;;  %v262_v7 = vpop.f32.mrb[11].mxu0  ;;  %v294_v8 = vpop.f32.mrb[11].mxu1 }
 0x10d   :  { %324 = vst [vmem:[%s602_s3 + $0x20] sm:$0xff] %v308_v3  ;;  %332 = vst [vmem:[%s602_s3 + $0x60] sm:$0xff] %v316_v4  ;;  %v309_v9 = vmax.f32 %v261_v5, 0.0  ;;  %v317_v10 = vmax.f32 %v293_v6, 0.0 }
 0x10f   :  { %325 = vst [vmem:[%s602_s3 + $0x28] sm:$0xff] %v309_v9  ;;  %333 = vst [vmem:[%s602_s3 + $0x68] sm:$0xff] %v317_v10 }
 0x110   :  { %v265_v11 = vpop.f32.mrb[12].mxu0  ;;  %v297_v12 = vpop.f32.mrb[12].mxu1 }
 0x111   :  { %v266_v13 = vadd.f32 %v533_v26, %v265_v11  ;;  %v298_v14 = vadd.f32 %v533_v26, %v297_v12  ;;  %v267_v15 = vpop.f32.mrb[13].mxu0  ;;  %v299_v16 = vpop.f32.mrb[13].mxu1 }
 0x112   :  { %v268_v17 = vpop.f32.mrb[14].mxu0  ;;  %v300_v18 = vpop.f32.mrb[14].mxu1 }
 0x113   :  { %v310_v19 = vmax.f32 %v266_v13, 0.0  ;;  %v318_v20 = vmax.f32 %v298_v14, 0.0  ;;  %v269_v21 = vadd.f32 %v533_v26, %v268_v17  ;;  %v301_v22 = vadd.f32 %v533_v26, %v300_v18  ;;  %v270_v23 = vpop.f32.mrb[15].mxu0  ;;  %v302_v24 = vpop.f32.mrb[15].mxu1 }
 0x115   :  { %326 = vst [vmem:[%s602_s3 + $0x30] sm:$0xff] %v310_v19  ;;  %334 = vst [vmem:[%s602_s3 + $0x70] sm:$0xff] %v318_v20  ;;  %v311_v25 = vmax.f32 %v269_v21, 0.0  ;;  %v319_v27 = vmax.f32 %v301_v22, 0.0 }
 0x117   :  { %327 = vst [vmem:[%s602_s3 + $0x38] sm:$0xff] %v311_v25  ;;  %335 = vst [vmem:[%s602_s3 + $0x78] sm:$0xff] %v319_v27 }

// kernel: resnet_forward.12
= control target key start
LH: loop header
LB: loop body
LE: loop exit
PB: predicated region body
PF: predicated region fallthrough
CT: control target
= control target key end

     0   :  { %vm321_vm0 = vcmask 261120   ;;  %s1107_s1 = inlined_call_operand.vmem [shape: bf16[288,128], index: 1, kind: input, shape index: {}]   ;;  %s1108_s0 = inlined_call_operand.vmem [shape: bf16[128,288], index: 0, kind: input, shape index: {}]   ;;  %s1109_s2 = inlined_call_operand.vmem [shape: f32[1,128], index: 2, kind: input, shape index: {}]   ;;  %s1110_s3 = inlined_call_operand.vmem [shape: f32[128,128], index: 3, kind: input, shape index: {}]   ;;  %s1111_s4 = inlined_call_operand.vmem [shape: f32[128,128], index: 4, kind: output, shape index: {}]  }
   0x1   :  { %v769_v0 = vld [vmem:[%s1107_s1 + $0x40] sm:$0xff]   ;;  %v771_v2 = vld [vmem:[%s1107_s1 + $0x48] sm:$0xff]   ;;  %v773_v4 = vld [vmem:[%s1107_s1 + $0x50] sm:$0xff]  }
   0x2   :  { %v770_v1 = vld [vmem:[%s1107_s1] sm:$0xff]   ;;  %659 = vmatprep.subr.bf16.mxu0 %v769_v0  ;;  %753 = vmatprep.subr.bf16.mxu1 %v769_v0  ;;  %v772_v3 = vld [vmem:[%s1107_s1 + $0x8] sm:$0xff]   ;;  %v774_v5 = vld [vmem:[%s1107_s1 + $0x10] sm:$0xff]  }
   0x3   :  { %660 = vmatpush3.bf16.msra.mxu0 %v770_v1  ;;  %761 = vmatpush3.bf16.msra.mxu1 %v770_v1  ;;  %v775_v6 = vld [vmem:[%s1107_s1 + $0x58] sm:$0xff]   ;;  %v777_v8 = vld [vmem:[%s1107_s1 + $0x60] sm:$0xff]   ;;  %v779_v10 = vld [vmem:[%s1107_s1 + $0x68] sm:$0xff]  }
   0x4   :  { %661 = vmatprep.subr.bf16.mxu0 %v771_v2  ;;  %754 = vmatprep.subr.bf16.mxu1 %v771_v2  ;;  %v776_v7 = vld [vmem:[%s1107_s1 + $0x18] sm:$0xff]   ;;  %v778_v9 = vld [vmem:[%s1107_s1 + $0x20] sm:$0xff]   ;;  %v780_v13 = vld [vmem:[%s1107_s1 + $0x28] sm:$0xff]  }
   0x5   :  { %v787_v11 = vld [vmem:[%s1108_s0 + $0x4] ss:$12 sps:$4 sm:$0xff]   ;;  %v790_v12 = vld [vmem:[%s1108_s0 + $0x94] ss:$12 sps:$4 sm:$0xff]   ;;  %v783_v16 = vld [vmem:[%s1107_s1 + $0x78] sm:$0xff]  }
   0x6   :  { %v781_v14 = vld [vmem:[%s1107_s1 + $0x70] sm:$0xff]   ;;  %378 = vmatprep.mubr.bf16.mxu0 %v787_v11  ;;  %426 = vmatprep.mubr.bf16.mxu1 %v790_v12  ;;  %v784_v17 = vld [vmem:[%s1107_s1 + $0x38] sm:$0xff]   ;;  %v785_v18 = vld [vmem:[%s1108_s0] ss:$12 sps:$4 sm:$0xff]  }
   0x7   :  { %662 = vmatpush3.bf16.msra.mxu0 %v772_v3  ;;  %762 = vmatpush3.bf16.msra.mxu1 %v772_v3  ;;  %v782_v15 = vld [vmem:[%s1107_s1 + $0x30] sm:$0xff]   ;;  %v791_v19 = vld [vmem:[%s1107_s1 + $0x80] sm:$0xff]   ;;  %v792_v21 = vld [vmem:[%s1108_s0 + $0x1c] ss:$12 sps:$4 sm:$0xff]  }
   0x8   :  { %663 = vmatprep.subr.bf16.mxu0 %v773_v4  ;;  %755 = vmatprep.subr.bf16.mxu1 %v773_v4  ;;  %v788_v20 = vld [vmem:[%s1108_s0 + $0x90] ss:$12 sps:$4 sm:$0xff]   ;;  %v794_v22 = vld [vmem:[%s1108_s0 + $0xac] ss:$12 sps:$4 sm:$0xff]   ;;  %v797_v25 = vld [vmem:[%s1108_s0 + $0xa8] ss:$12 sps:$4 sm:$0xff]  }
   0x9   :  { %v798_v23 = vld [vmem:[%s1107_s1 + $0x88] sm:$0xff]   ;;  %v796_v24 = vld [vmem:[%s1108_s0 + $0x18] ss:$12 sps:$4 sm:$0xff]   ;;  %v799_v26 = vld [vmem:[%s1108_s0 + $0x34] ss:$12 sps:$4 sm:$0xff]  }
   0xa   :  { %v801_v27 = vld [vmem:[%s1108_s0 + $0x8] ss:$12 sps:$4 sm:$0xff]   ;;  %v802_v28 = vld [vmem:[%s1108_s0 + $0x30] ss:$12 sps:$4 sm:$0xff]   ;;  %v803_v29 = vld [vmem:[%s1108_s0 + $0x20] ss:$12 sps:$4 sm:$0xff]  }
   0xb   :  { %664 = vmatpush3.bf16.msra.mxu0 %v774_v5  ;;  %763 = vmatpush3.bf16.msra.mxu1 %v774_v5  ;;  %v804_v30 = vld [vmem:[%s1108_s0 + $0x4c] ss:$12 sps:$4 sm:$0xff]   ;;  %v807_v32 = vld [vmem:[%s1108_s0 + $0x48] ss:$12 sps:$4 sm:$0xff]   ;;  %v808_v33 = vld [vmem:[%s1108_s0 + $0x50] ss:$12 sps:$4 sm:$0xff]  }
   0xc   :  { %665 = vmatprep.subr.bf16.mxu0 %v775_v6  ;;  %756 = vmatprep.subr.bf16.mxu1 %v775_v6  ;;  %v806_v31 = vld [vmem:[%s1108_s0 + $0x38] ss:$12 sps:$4 sm:$0xff]   ;;  %v811_v35 = vld [vmem:[%s1108_s0 + $0x68] ss:$12 sps:$4 sm:$0xff]   ;;  %v812_v36 = vld [vmem:[%s1108_s0 + $0x60] ss:$12 sps:$4 sm:$0xff]  }
   0xd   :  { %v809_v34 = vld [vmem:[%s1108_s0 + $0x64] ss:$12 sps:$4 sm:$0xff]   ;;  %v813_v37 = vld [vmem:[%s1108_s0 + $0x80] ss:$12 sps:$4 sm:$0xff]   ;;  %v814_v38 = vld [vmem:[%s1108_s0 + $0x7c] ss:$12 sps:$4 sm:$0xff]  }
   0xe   :  { %v816_v39 = vld [vmem:[%s1108_s0 + $0x98] ss:$12 sps:$4 sm:$0xff]   ;;  %v818_v41 = vld [vmem:[%s1108_s0 + $0xb0] ss:$12 sps:$4 sm:$0xff]   ;;  %v989_v2 = vld [vmem:[%s1109_s2] ss:$0 sm:$0xff] }
   0xf   :  { %666 = vmatpush3.bf16.msra.mxu0 %v776_v7  ;;  %764 = vmatpush3.bf16.msra.mxu1 %v776_v7  ;;  %v817_v40 = vld [vmem:[%s1108_s0 + $0x78] ss:$12 sps:$4 sm:$0xff]   ;;  %v542_v6 = vld [vmem:[%s1110_s3 + $0x10] sm:$0xff] }
  0x10   :  { %667 = vmatprep.subr.bf16.mxu0 %v777_v8  ;;  %757 = vmatprep.subr.bf16.mxu1 %v777_v8  ;;  %v540_v11 = vld [vmem:[%s1110_s3] sm:$0xff] }
  0x13   :  { %668 = vmatpush3.bf16.msra.mxu0 %v778_v9  ;;  %765 = vmatpush3.bf16.msra.mxu1 %v778_v9 }
  0x14   :  { %669 = vmatprep.subr.bf16.mxu0 %v779_v10  ;;  %758 = vmatprep.subr.bf16.mxu1 %v779_v10 }
  0x17   :  { %670 = vmatpush3.bf16.msra.mxu0 %v780_v13  ;;  %766 = vmatpush3.bf16.msra.mxu1 %v780_v13 }
  0x18   :  { %671 = vmatprep.subr.bf16.mxu0 %v781_v14  ;;  %759 = vmatprep.subr.bf16.mxu1 %v781_v14 }
  0x1b   :  { %672 = vmatpush3.bf16.msra.mxu0 %v782_v15  ;;  %767 = vmatpush3.bf16.msra.mxu1 %v782_v15 }
  0x1c   :  { %673 = vmatprep.subr.bf16.mxu0 %v783_v16  ;;  %760 = vmatprep.subr.bf16.mxu1 %v783_v16 }
  0x1f   :  { %674 = vmatpush3.bf16.msra.mxu0 %v784_v17  ;;  %768 = vmatpush3.bf16.msra.mxu1 %v784_v17  ;;  %v543_v17 = vld [vmem:[%s1110_s3 + $0x18] sm:$0xff] }
  0x20   :  { %733 = vmatprep.subr.bf16.mxu1 %v791_v19 }
  0x22   :  { %379 = vmatmul.mubr.bf16.vlgmr.msra.gmra.mrb[0].mxu0 %v785_v18  ;;  %427 = vmatmul.mubr.bf16.vlgmr.msra.gmra.mrb[0].mxu1 %v788_v20 }
  0x23   :  { %734 = vmatpush3.bf16.msra.mxu1 %v791_v19  ;;  %386 = vmatprep.mubr.bf16.mxu0 %v792_v21 }
  0x24   :  { %434 = vmatprep.mubr.bf16.mxu1 %v794_v22  ;;  %735 = vmatprep.subr.bf16.mxu1 %v798_v23 }
  0x27   :  { %736 = vmatpush3.bf16.msra.mxu1 %v798_v23  ;;  %v541_v23 = vld [vmem:[%s1110_s3 + $0x8] sm:$0xff] }
  0x2a   :  { %387 = vmatmul.mubr.bf16.gmra.mrb[4].mxu0 %v796_v24  ;;  %435 = vmatmul.mubr.bf16.gmra.mrb[4].mxu1 %v797_v25 }
  0x2b   :  { %394 = vmatprep.mubr.bf16.mxu0 %v799_v26  ;;  %737 = vmatprep.mubr.msk.bf16.mxu1 %vm321_vm0, %v801_v27 }
  0x32   :  { %395 = vmatmul.mubr.bf16.gmra.mrb[8].mxu0 %v802_v28  ;;  %738 = vmatmul.mubr.msk.bf16.vlgmr.msra.gmra.mrb[8].mxu1 %vm321_vm0, %v803_v29 }
  0x33   :  { %402 = vmatprep.mubr.bf16.mxu0 %v804_v30  ;;  %741 = vmatprep.mubr.msk.bf16.mxu1 %vm321_vm0, %v806_v31 }
  0x3a   :  { %403 = vmatmul.mubr.bf16.gmra.mrb[12].mxu0 %v807_v32  ;;  %742 = vmatmul.mubr.msk.bf16.gmra.mrb[12].mxu1 %vm321_vm0, %v808_v33 }
  0x3b   :  { %410 = vmatprep.mubr.bf16.mxu0 %v809_v34  ;;  %745 = vmatprep.mubr.msk.bf16.mxu1 %vm321_vm0, %v811_v35 }
  0x42   :  { %411 = vmatmul.mubr.bf16.gmra.mrb[16].mxu0 %v812_v36  ;;  %746 = vmatmul.mubr.msk.bf16.gmra.mrb[16].mxu1 %vm321_vm0, %v813_v37 }
  0x43   :  { %418 = vmatprep.mubr.bf16.mxu0 %v814_v38  ;;  %749 = vmatprep.mubr.msk.bf16.mxu1 %vm321_vm0, %v816_v39  ;;  %v544_v38 = vld [vmem:[%s1110_s3 + $0x20] sm:$0xff] }
  0x4a   :  { %419 = vmatmul.mubr.bf16.gmra.mrb[20].mxu0 %v817_v40  ;;  %750 = vmatmul.mubr.msk.bf16.gmra.mrb[20].mxu1 %vm321_vm0, %v818_v41 }
  0xf5   :  { %v675_v42 = vpop.f32.mrb[0].mxu0  ;;  %v711_v43 = vpop.f32.mrb[0].mxu1 }
  0xf6   :  { %v676_v44 = vpop.f32.mrb[1].mxu0  ;;  %v712_v45 = vpop.f32.mrb[1].mxu1 }
  0xf7   :  { %v677_v46 = vadd.f32 %v676_v44, %v675_v42  ;;  %v678_v47 = vpop.f32.mrb[2].mxu0  ;;  %v978_v48 = vadd.f32 %v712_v45, %v711_v43  ;;  %v714_v49 = vpop.f32.mrb[2].mxu1 }
  0xf8   :  { %v679_v50 = vpop.f32.mrb[3].mxu0  ;;  %v715_v51 = vpop.f32.mrb[3].mxu1 }
  0xf9   :  { %v680_v52 = vadd.f32 %v679_v50, %v678_v47  ;;  %v980_v53 = vadd.f32 %v715_v51, %v714_v49  ;;  %v381_v7 = vadd.f32 %v677_v46, %v989_v2  ;;  %v545_v46 = vld [vmem:[%s1110_s3 + $0x28] sm:$0xff] }
  0xfb   :  { %v384_v18 = vadd.f32 %v680_v52, %v989_v2  ;;  %v546_v52 = vld [vmem:[%s1110_s3 + $0x30] sm:$0xff] }
  0xfd   :  { %v681_v54 = vpop.f32.mrb[4].mxu0  ;;  %v717_v55 = vpop.f32.mrb[4].mxu1 }
  0xfe   :  { %v682_v56 = vpop.f32.mrb[5].mxu0  ;;  %v718_v57 = vpop.f32.mrb[5].mxu1 }
  0xff   :  { %v683_v58 = vadd.f32 %v682_v56, %v681_v54  ;;  %v684_v59 = vpop.f32.mrb[6].mxu0  ;;  %v982_v60 = vadd.f32 %v718_v57, %v717_v55  ;;  %v720_v61 = vpop.f32.mrb[6].mxu1 }
 0x100   :  { %v685_v62 = vpop.f32.mrb[7].mxu0  ;;  %v721_v63 = vpop.f32.mrb[7].mxu1 }
 0x101   :  { %v686_v0 = vadd.f32 %v685_v62, %v684_v59  ;;  %v984_v1 = vadd.f32 %v721_v63, %v720_v61  ;;  %v389_v3 = vadd.f32 %v683_v58, %v989_v2  ;;  %v547_v58 = vld [vmem:[%s1110_s3 + $0x38] sm:$0xff] }
 0x103   :  { %v392_v12 = vadd.f32 %v686_v0, %v989_v2 }
 0x105   :  { %v687_v4 = vpop.f32.mrb[8].mxu0  ;;  %v739_v5 = vpop.f32.mrb[8].mxu1 }
 0x106   :  { %v486_v8 = vadd.f32 %v739_v5, %v389_v3  ;;  %v688_v9 = vpop.f32.mrb[9].mxu0  ;;  %v477_v10 = vpop.f32.mrb[9].mxu1 }
 0x107   :  { %v689_v13 = vadd.f32 %v688_v9, %v687_v4  ;;  %v478_v14 = vadd.f32 %v477_v10, %v381_v7  ;;  %v690_v15 = vpop.f32.mrb[10].mxu0  ;;  %v740_v16 = vpop.f32.mrb[10].mxu1 }
 0x108   :  { %v558_v19 = vadd.f32 %v542_v6, %v486_v8  ;;  %v489_v20 = vadd.f32 %v740_v16, %v392_v12  ;;  %v691_v21 = vpop.f32.mrb[11].mxu0  ;;  %v480_v22 = vpop.f32.mrb[11].mxu1 }
 0x109   :  { %v556_v24 = vadd.f32 %v540_v11, %v478_v14  ;;  %v692_v25 = vadd.f32 %v691_v21, %v690_v15  ;;  %v481_v26 = vadd.f32 %v480_v22, %v384_v18  ;;  %v397_v35 = vadd.f32 %v689_v13, %v989_v2  ;;  %v548_v15 = vld [vmem:[%s1110_s3 + $0x40] sm:$0xff]  ;;  %v549_v18 = vld [vmem:[%s1110_s3 + $0x48] sm:$0xff] }
 0x10a   :  { %v574_v27 = vmax.f32 %v558_v19, 0.0  ;;  %v559_v28 = vadd.f32 %v543_v17, %v489_v20  ;;  %v437_v19 = vadd.f32 %v982_v60, %v989_v2  ;;  %v440_v60 = vadd.f32 %v984_v1, %v989_v2 }
 0x10b   :  { %v572_v29 = vmax.f32 %v556_v24, 0.0  ;;  %v557_v30 = vadd.f32 %v541_v23, %v481_v26  ;;  %v400_v43 = vadd.f32 %v692_v25, %v989_v2  ;;  %v554_v24 = vld [vmem:[%s1110_s3 + $0x70] sm:$0xff]  ;;  %v429_v25 = vadd.f32 %v978_v48, %v989_v2  ;;  %v555_v48 = vld [vmem:[%s1110_s3 + $0x78] sm:$0xff] }
 0x10c   :  { %590 = vst [vmem:[%s1111_s4 + $0x10] sm:$0xff] %v574_v27  ;;  %v575_v31 = vmax.f32 %v559_v28, 0.0 }
 0x10d   :  { %588 = vst [vmem:[%s1111_s4] sm:$0xff] %v572_v29  ;;  %v573_v32 = vmax.f32 %v557_v30, 0.0  ;;  %v693_v33 = vpop.f32.mrb[12].mxu0  ;;  %v743_v34 = vpop.f32.mrb[12].mxu1  ;;  %v552_v29 = vld [vmem:[%s1110_s3 + $0x60] sm:$0xff] }
 0x10e   :  { %591 = vst [vmem:[%s1111_s4 + $0x18] sm:$0xff] %v575_v31  ;;  %v694_v36 = vpop.f32.mrb[13].mxu0  ;;  %v493_v37 = vpop.f32.mrb[13].mxu1 }
 0x10f   :  { %589 = vst [vmem:[%s1111_s4 + $0x8] sm:$0xff] %v573_v32  ;;  %v695_v39 = vadd.f32 %v694_v36, %v693_v33  ;;  %v494_v40 = vadd.f32 %v493_v37, %v397_v35  ;;  %v696_v41 = vpop.f32.mrb[14].mxu0  ;;  %v744_v42 = vpop.f32.mrb[14].mxu1 }
 0x110   :  { %v697_v44 = vpop.f32.mrb[15].mxu0  ;;  %v496_v45 = vpop.f32.mrb[15].mxu1 }
 0x111   :  { %v405_v47 = vadd.f32 %v695_v39, %v989_v2  ;;  %v560_v49 = vadd.f32 %v544_v38, %v494_v40  ;;  %v698_v50 = vadd.f32 %v697_v44, %v696_v41  ;;  %v497_v51 = vadd.f32 %v496_v45, %v400_v43  ;;  %v553_v44 = vld [vmem:[%s1110_s3 + $0x68] sm:$0xff] }
 0x112   :  { %v432_v39 = vadd.f32 %v980_v53, %v989_v2 }
 0x113   :  { %v502_v54 = vadd.f32 %v743_v34, %v405_v47  ;;  %v576_v55 = vmax.f32 %v560_v49, 0.0  ;;  %v408_v56 = vadd.f32 %v698_v50, %v989_v2  ;;  %v561_v57 = vadd.f32 %v545_v46, %v497_v51  ;;  %v550_v46 = vld [vmem:[%s1110_s3 + $0x50] sm:$0xff] }
 0x115   :  { %v562_v59 = vadd.f32 %v546_v52, %v502_v54  ;;  %592 = vst [vmem:[%s1111_s4 + $0x20] sm:$0xff] %v576_v55  ;;  %v505_v61 = vadd.f32 %v744_v42, %v408_v56  ;;  %v577_v62 = vmax.f32 %v561_v57, 0.0  ;;  %v699_v63 = vpop.f32.mrb[16].mxu0  ;;  %v747_v0 = vpop.f32.mrb[16].mxu1  ;;  %v551_v54 = vld [vmem:[%s1110_s3 + $0x58] sm:$0xff] }
 0x116   :  { %v700_v3 = vpop.f32.mrb[17].mxu0  ;;  %v509_v4 = vpop.f32.mrb[17].mxu1 }
 0x117   :  { %v578_v5 = vmax.f32 %v562_v59, 0.0  ;;  %v563_v6 = vadd.f32 %v547_v58, %v505_v61  ;;  %593 = vst [vmem:[%s1111_s4 + $0x28] sm:$0xff] %v577_v62  ;;  %v701_v7 = vadd.f32 %v700_v3, %v699_v63  ;;  %v702_v8 = vpop.f32.mrb[18].mxu0  ;;  %v748_v9 = vpop.f32.mrb[18].mxu1 }
 0x118   :  { %v703_v10 = vpop.f32.mrb[19].mxu0  ;;  %v512_v11 = vpop.f32.mrb[19].mxu1 }
 0x119   :  { %594 = vst [vmem:[%s1111_s4 + $0x30] sm:$0xff] %v578_v5  ;;  %v579_v12 = vmax.f32 %v563_v6, 0.0  ;;  %v413_v13 = vadd.f32 %v701_v7, %v989_v2  ;;  %v704_v14 = vadd.f32 %v703_v10, %v702_v8 }
 0x11b   :  { %595 = vst [vmem:[%s1111_s4 + $0x38] sm:$0xff] %v579_v12  ;;  %v510_v16 = vadd.f32 %v509_v4, %v413_v13  ;;  %v416_v17 = vadd.f32 %v704_v14, %v989_v2 }
 0x11d   :  { %v564_v20 = vadd.f32 %v548_v15, %v510_v16  ;;  %v513_v21 = vadd.f32 %v512_v11, %v416_v17  ;;  %v705_v22 = vpop.f32.mrb[20].mxu0  ;;  %v751_v23 = vpop.f32.mrb[20].mxu1 }
 0x11e   :  { %v534_v26 = vadd.f32 %v751_v23, %v437_v19  ;;  %v706_v27 = vpop.f32.mrb[21].mxu0  ;;  %v525_v28 = vpop.f32.mrb[21].mxu1 }
 0x11f   :  { %v580_v30 = vmax.f32 %v564_v20, 0.0  ;;  %v565_v31 = vadd.f32 %v549_v18, %v513_v21  ;;  %v707_v32 = vadd.f32 %v706_v27, %v705_v22  ;;  %v526_v33 = vadd.f32 %v525_v28, %v429_v25  ;;  %v708_v34 = vpop.f32.mrb[22].mxu0  ;;  %v752_v35 = vpop.f32.mrb[22].mxu1 }
 0x120   :  { %v570_v36 = vadd.f32 %v554_v24, %v534_v26  ;;  %v537_v37 = vadd.f32 %v752_v35, %v440_v60  ;;  %v709_v38 = vpop.f32.mrb[23].mxu0  ;;  %v528_v40 = vpop.f32.mrb[23].mxu1 }
 0x121   :  { %596 = vst [vmem:[%s1111_s4 + $0x40] sm:$0xff] %v580_v30  ;;  %v581_v1 = vmax.f32 %v565_v31, 0.0  ;;  %v421_v41 = vadd.f32 %v707_v32, %v989_v2  ;;  %v568_v42 = vadd.f32 %v552_v29, %v526_v33  ;;  %v710_v43 = vadd.f32 %v709_v38, %v708_v34 }
 0x122   :  { %v586_v45 = vmax.f32 %v570_v36, 0.0  ;;  %v571_v53 = vadd.f32 %v555_v48, %v537_v37  ;;  %v529_v47 = vadd.f32 %v528_v40, %v432_v39 }
 0x123   :  { %597 = vst [vmem:[%s1111_s4 + $0x48] sm:$0xff] %v581_v1  ;;  %v518_v49 = vadd.f32 %v747_v0, %v421_v41  ;;  %v584_v50 = vmax.f32 %v568_v42, 0.0  ;;  %v424_v51 = vadd.f32 %v710_v43, %v989_v2 }
 0x124   :  { %602 = vst [vmem:[%s1111_s4 + $0x70] sm:$0xff] %v586_v45  ;;  %v587_v52 = vmax.f32 %v571_v53, 0.0  ;;  %v569_v55 = vadd.f32 %v553_v44, %v529_v47 }
 0x125   :  { %v566_v56 = vadd.f32 %v550_v46, %v518_v49  ;;  %600 = vst [vmem:[%s1111_s4 + $0x60] sm:$0xff] %v584_v50  ;;  %v521_v57 = vadd.f32 %v748_v9, %v424_v51 }
 0x126   :  { %603 = vst [vmem:[%s1111_s4 + $0x78] sm:$0xff] %v587_v52  ;;  %v585_v2 = vmax.f32 %v569_v55, 0.0 }
 0x127   :  { %v582_v58 = vmax.f32 %v566_v56, 0.0  ;;  %v567_v59 = vadd.f32 %v551_v54, %v521_v57 }
 0x128   :  { %601 = vst [vmem:[%s1111_s4 + $0x68] sm:$0xff] %v585_v2 }
 0x129   :  { %598 = vst [vmem:[%s1111_s4 + $0x50] sm:$0xff] %v582_v58  ;;  %v583_v61 = vmax.f32 %v567_v59, 0.0 }
 0x12b   :  { %599 = vst [vmem:[%s1111_s4 + $0x58] sm:$0xff] %v583_v61 }

// kernel: resnet_forward.15
= control target key start
LH: loop header
LB: loop body
LE: loop exit
PB: predicated region body
PF: predicated region fallthrough
CT: control target
= control target key end

     0   :  { %v216_v3 = vmov 0.0|0.0   ;;  %vm217_vm0 = vmmov 0   ;;  %v218_v6 = vmov 0.0   ;;  %vm19_vm1 = vcmask 523264   ;;  %s296_s0 = inlined_call_operand.vmem [shape: f32[2,16,64], index: 0, kind: input, shape index: {}]   ;;  %s297_s1 = inlined_call_operand.vmem [shape: f32[64,128], index: 1, kind: input, shape index: {}]   ;;  %s298_s2 = inlined_call_operand.vmem [shape: f32[1,128], index: 2, kind: input, shape index: {}]   ;;  %s299_s3 = inlined_call_operand.hbm [shape: f32[2,128], index: 3, kind: output, shape index: {}]  }
   0x1   :  { %v40_v0 = vld [vmem:[%s297_s1] sm:$0xff]  ;;  %v41_v1 = vld [vmem:[%s297_s1 + $0x8] sm:$0xff]  ;;  %v42_v2 = vld [vmem:[%s297_s1 + $0x10] sm:$0xff]  ;;  %176 = vmatprep.subr.bf16.mxu0 %v216_v3  ;;  %173 = vmatprep.mubr.msk.f32.mxu0 %vm217_vm0, %v218_v6 }
   0x2   :  { %v177_v4 = vpack.c.bf16 %v41_v1, %v40_v0  ;;  %v43_v5 = vld [vmem:[%s297_s1 + $0x18] sm:$0xff]  ;;  %v15_v7 = vld [vmem:[%s296_s0] sm:$0xff]  ;;  %v16_v9 = vld [vmem:[%s296_s0 + $0x8] sm:$0xff] }
   0x3   :  { %v180_v8 = vpack.c.bf16 %v43_v5, %v42_v2  ;;  %v17_v10 = vld [vmem:[%s296_s0 + $0x10] sm:$0xff]  ;;  %v18_v11 = vld [vmem:[%s296_s0 + $0x18] sm:$0xff]  ;;  %v20_v12 = vsel %vm19_vm1, %v15_v7, 0.0  ;;  %v44_v13 = vld [vmem:[%s297_s1 + $0x20] sm:$0xff]  ;;  %v21_v15 = vsel %vm19_vm1, %v16_v9, 0.0 }
   0x4   :  { %178 = vmatpush3.bf16.msra.mxu0 %v177_v4  ;;  %v45_v14 = vld [vmem:[%s297_s1 + $0x28] sm:$0xff]  ;;  %v29_v16 = vsel %vm19_vm1, %v17_v10, 0.0  ;;  %v30_v17 = vsel %vm19_vm1, %v18_v11, 0.0  ;;  %v22_v18 = vadd.f32 %v21_v15, %v20_v12 }
   0x5   :  { %179 = vmatprep.subr.bf16.mxu0 %v216_v3  ;;  %v31_v19 = vadd.f32 %v30_v17, %v29_v16 }
   0x6   :  { %8 = vsyncpa [#allocation3], 0  ;;  %v183_v20 = vpack.c.bf16 %v45_v14, %v44_v13  ;;  %v23_v21 = vrot.slane %v22_v18, 4  ;;  %v46_v23 = vld [vmem:[%s297_s1 + $0x30] sm:$0xff]  ;;  %v47_v24 = vld [vmem:[%s297_s1 + $0x38] sm:$0xff]  ;;  %vm57_vm2 = vcmask 1041409  }
   0x7   :  { %v32_v22 = vrot.slane %v31_v19, 4  ;;  %v186_v27 = vpack.c.bf16 %v47_v24, %v46_v23  ;;  %v146_v39 = vld [vmem:[%s298_s2] ss:$0 sm:$0xff]  ;;  %s219_s9 = smov [#allocation2]  }
   0x8   :  { %181 = vmatpush3.bf16.msra.mxu0 %v180_v8  ;;  %v24_v25 = vadd.f32 %v23_v21, %v22_v18  ;;  %s138_s10 = sshll.u32 %s219_s9, 4  ;;  %s139_s10 = int_to_ptr.vmem [resolvable:$true] %s138_s10 }
   0x9   :  { %182 = vmatprep.subr.bf16.mxu0 %v216_v3  ;;  %v33_v26 = vadd.f32 %v32_v22, %v31_v19  ;;  %s192_s11 = scalar_lea.vmem %s139_s10, 32  ;;  %p197_p1 = scmp.lt.s32.totalorder %s139_s10, %s139_s10 }
   0xa   :  { %v25_v28 = vrot.slane %v24_v25, 2  ;;  %p193_p0 = scmp.ne.s32.totalorder %s139_s10, %s192_s11  ;;  %p198_p2 = scmp.lt.s32.totalorder %s192_s11, %s192_s11 }
   0xb   :  { %v34_v29 = vrot.slane %v33_v26, 2 }
   0xc   :  { %184 = vmatpush3.bf16.msra.mxu0 %v183_v20  ;;  %v26_v30 = vadd.f32 %v25_v28, %v24_v25  ;;  %p199_p3 = por %p198_p2, %p197_p1 }
   0xd   :  { %185 = vmatprep.subr.bf16.mxu0 %v216_v3  ;;  %v35_v31 = vadd.f32 %v34_v29, %v33_v26 }
   0xe   :  { %v27_v32 = vrot.slane %v26_v30, 1  ;;  %p200_p4 = pnand %p199_p3, %p193_p0 }
   0xf   :  { %v36_v33 = vrot.slane %v35_v31, 1 }
  0x10   :  { %187 = vmatpush3.bf16.msra.mxu0 %v186_v27  ;;  %v28_v34 = vadd.f32 %v27_v32, %v26_v30 }
  0x11   :  { %v37_v35 = vadd.f32 %v36_v33, %v35_v31 }
  0x12   :  { %v38_v36 = vmul.f32 0.0625, %v28_v34 }
  0x13   :  { %v39_v37 = vmul.f32 0.0625, %v37_v35 }
  0x15   :  { %v58_v38 = vsel %vm57_vm2, %v39_v37, %v38_v36 }
  0x16   :  { %174 = vmatmul.mubr.msk.f32.vlgmr.msra.gmra.mrb[0].mxu0 %vm19_vm1, %v58_v38 }
  0xe9   :  { %v127_v40 = vpop.f32.mrb[0].mxu0 }
  0xea   :  { %v128_v41 = vadd.f32 %v146_v39, %v127_v40  ;;  %v175_v42 = vpop.f32.mrb[1].mxu0 }
  0xec   :  { %131 = vst [vmem:[#allocation2] sm:$0x3] %v128_v41 }
  0xed   :  { %203 = shalt.err (!%p200_p4)
}
  0xee   :  { %s204_s14 = scalar_lea.hbm %s299_s3, 32 }
  0xef   :  { %p205_p5 = scmp.ne.s32.totalorder %s299_s3, %s204_s14  ;;  %p208_p6 = scmp.lt.u32.totalorder %s204_s14, %s299_s3 }
  0xf1   :  { %p210_p7 = pnand %p208_p6, %p205_p5 }
  0xf3   :  { %213 = shalt.err (!%p210_p7)
}
  0xf4   :  { %141 = dma.vmem_to_hbm [thread:$0]  %s139_s10, 32, %s299_s3, [#allocation3]  }
  0xf5   :  { %214 = dma.done.wait [#allocation3], 32  }
  0xf6   :  { %215 = vsyncadd [#allocation3], 4294967264 }
  0xf7   :  { %145 = vsyncpa [#allocation3], 1 }

// kernel: resnet_forward.13
= control target key start
LH: loop header
LB: loop body
LE: loop exit
PB: predicated region body
PF: predicated region fallthrough
CT: control target
= control target key end

     0   :  { %vm204_vm0 = vcmask 261120   ;;  %s521_s1 = inlined_call_operand.vmem [shape: bf16[288,128], index: 1, kind: input, shape index: {}]   ;;  %s522_s0 = inlined_call_operand.vmem [shape: bf16[32,288], index: 0, kind: input, shape index: {}]   ;;  %s523_s2 = inlined_call_operand.vmem [shape: f32[1,128], index: 2, kind: input, shape index: {}]   ;;  %s524_s3 = inlined_call_operand.vmem [shape: f32[32,128], index: 3, kind: output, shape index: {}]  }
   0x1   :  { %v388_v0 = vld [vmem:[%s521_s1 + $0x40] sm:$0xff]   ;;  %v390_v2 = vld [vmem:[%s521_s1 + $0x48] sm:$0xff]   ;;  %v392_v4 = vld [vmem:[%s521_s1 + $0x50] sm:$0xff]  }
   0x2   :  { %v389_v1 = vld [vmem:[%s521_s1] sm:$0xff]   ;;  %348 = vmatprep.subr.bf16.mxu0 %v388_v0  ;;  %v391_v3 = vld [vmem:[%s521_s1 + $0x8] sm:$0xff]   ;;  %v393_v5 = vld [vmem:[%s521_s1 + $0x10] sm:$0xff]  }
   0x3   :  { %349 = vmatpush3.bf16.msra.mxu0 %v389_v1  ;;  %v394_v6 = vld [vmem:[%s521_s1 + $0x58] sm:$0xff]   ;;  %v396_v8 = vld [vmem:[%s521_s1 + $0x60] sm:$0xff]   ;;  %v398_v11 = vld [vmem:[%s521_s1 + $0x68] sm:$0xff]  }
   0x4   :  { %350 = vmatprep.subr.bf16.mxu0 %v390_v2  ;;  %v395_v7 = vld [vmem:[%s521_s1 + $0x18] sm:$0xff]   ;;  %v397_v9 = vld [vmem:[%s521_s1 + $0x20] sm:$0xff]   ;;  %v399_v12 = vld [vmem:[%s521_s1 + $0x28] sm:$0xff]  }
   0x5   :  { %v403_v10 = vld [vmem:[%s521_s1 + $0x80] sm:$0xff]   ;;  %v400_v13 = vld [vmem:[%s521_s1 + $0x70] sm:$0xff]   ;;  %v408_v15 = vld [vmem:[%s521_s1 + $0x88] sm:$0xff]  }
   0x6   :  { %380 = vmatprep.subr.bf16.mxu1 %v403_v10  ;;  %v407_v14 = vld [vmem:[%s522_s0 + $0x4] ss:$12 sps:$4 sm:$0xff]   ;;  %v409_v16 = vld [vmem:[%s522_s0 + $0x8] ss:$12 sps:$4 sm:$0xff]   ;;  %v410_v17 = vld [vmem:[%s522_s0 + $0x20] ss:$12 sps:$4 sm:$0xff]  }
   0x7   :  { %351 = vmatpush3.bf16.msra.mxu0 %v391_v3  ;;  %381 = vmatpush3.bf16.msra.mxu1 %v403_v10  ;;  %v401_v18 = vld [vmem:[%s521_s1 + $0x30] sm:$0xff]   ;;  %v402_v19 = vld [vmem:[%s521_s1 + $0x78] sm:$0xff]   ;;  %v405_v21 = vld [vmem:[%s522_s0] ss:$12 sps:$4 sm:$0xff]  }
   0x8   :  { %352 = vmatprep.subr.bf16.mxu0 %v392_v4  ;;  %243 = vmatprep.mubr.bf16.mxu0 %v407_v14  ;;  %v404_v20 = vld [vmem:[%s521_s1 + $0x38] sm:$0xff]   ;;  %v321_v30 = vld [vmem:[%s523_s2] ss:$0 sm:$0xff] }
   0x9   :  { %382 = vmatprep.subr.bf16.mxu1 %v408_v15  ;;  %384 = vmatprep.mubr.msk.bf16.mxu1 %vm204_vm0, %v409_v16  ;;  %v411_v22 = vld [vmem:[%s522_s0 + $0x1c] ss:$12 sps:$4 sm:$0xff]   ;;  %v413_v23 = vld [vmem:[%s522_s0 + $0x18] ss:$12 sps:$4 sm:$0xff]  }
   0xb   :  { %353 = vmatpush3.bf16.msra.mxu0 %v393_v5  ;;  %383 = vmatpush3.bf16.msra.mxu1 %v408_v15 }
   0xc   :  { %354 = vmatprep.subr.bf16.mxu0 %v394_v6 }
   0xe   :  { %385 = vmatmul.mubr.msk.bf16.vlgmr.msra.gmra.mrb[0].mxu1 %vm204_vm0, %v410_v17 }
   0xf   :  { %355 = vmatpush3.bf16.msra.mxu0 %v395_v7 }
  0x10   :  { %356 = vmatprep.subr.bf16.mxu0 %v396_v8 }
  0x13   :  { %357 = vmatpush3.bf16.msra.mxu0 %v397_v9 }
  0x14   :  { %358 = vmatprep.subr.bf16.mxu0 %v398_v11 }
  0x17   :  { %359 = vmatpush3.bf16.msra.mxu0 %v399_v12 }
  0x18   :  { %360 = vmatprep.subr.bf16.mxu0 %v400_v13 }
  0x1b   :  { %361 = vmatpush3.bf16.msra.mxu0 %v401_v18 }
  0x1c   :  { %362 = vmatprep.subr.bf16.mxu0 %v402_v19 }
  0x1f   :  { %363 = vmatpush3.bf16.msra.mxu0 %v404_v20 }
  0x22   :  { %244 = vmatmul.mubr.bf16.vlgmr.msra.gmra.mrb[0].mxu0 %v405_v21 }
  0x23   :  { %251 = vmatprep.mubr.bf16.mxu0 %v411_v22 }
  0x2a   :  { %252 = vmatmul.mubr.bf16.gmra.mrb[4].mxu0 %v413_v23 }
  0xe1   :  { %v386_v24 = vpop.f32.mrb[0].mxu1 }
  0xe2   :  { %v294_v25 = vpop.f32.mrb[1].mxu1 }
  0xe3   :  { %v387_v26 = vpop.f32.mrb[2].mxu1 }
  0xe4   :  { %v297_v27 = vpop.f32.mrb[3].mxu1 }
  0xf5   :  { %v364_v28 = vpop.f32.mrb[0].mxu0 }
  0xf6   :  { %v365_v29 = vpop.f32.mrb[1].mxu0 }
  0xf7   :  { %v366_v31 = vadd.f32 %v365_v29, %v364_v28  ;;  %v367_v32 = vpop.f32.mrb[2].mxu0 }
  0xf8   :  { %v368_v33 = vpop.f32.mrb[3].mxu0 }
  0xf9   :  { %v369_v34 = vadd.f32 %v368_v33, %v367_v32  ;;  %v246_v35 = vadd.f32 %v366_v31, %v321_v30 }
  0xfb   :  { %v295_v36 = vadd.f32 %v294_v25, %v246_v35  ;;  %v249_v37 = vadd.f32 %v369_v34, %v321_v30 }
  0xfd   :  { %v309_v38 = vmax.f32 %v295_v36, 0.0  ;;  %v298_v39 = vadd.f32 %v297_v27, %v249_v37  ;;  %v370_v40 = vpop.f32.mrb[4].mxu0 }
  0xfe   :  { %v371_v41 = vpop.f32.mrb[5].mxu0 }
  0xff   :  { %313 = vst [vmem:[%s524_s3] sm:$0xff] %v309_v38  ;;  %v310_v42 = vmax.f32 %v298_v39, 0.0  ;;  %v372_v43 = vadd.f32 %v371_v41, %v370_v40  ;;  %v373_v44 = vpop.f32.mrb[6].mxu0 }
 0x100   :  { %v374_v45 = vpop.f32.mrb[7].mxu0 }
 0x101   :  { %314 = vst [vmem:[%s524_s3 + $0x8] sm:$0xff] %v310_v42  ;;  %v254_v46 = vadd.f32 %v372_v43, %v321_v30  ;;  %v375_v47 = vadd.f32 %v374_v45, %v373_v44 }
 0x103   :  { %v303_v48 = vadd.f32 %v386_v24, %v254_v46  ;;  %v257_v49 = vadd.f32 %v375_v47, %v321_v30 }
 0x105   :  { %v311_v50 = vmax.f32 %v303_v48, 0.0  ;;  %v306_v51 = vadd.f32 %v387_v26, %v257_v49 }
 0x107   :  { %315 = vst [vmem:[%s524_s3 + $0x10] sm:$0xff] %v311_v50  ;;  %v312_v52 = vmax.f32 %v306_v51, 0.0 }
 0x109   :  { %316 = vst [vmem:[%s524_s3 + $0x18] sm:$0xff] %v312_v52 }

// kernel: resnet_forward.14
= control target key start
LH: loop header
LB: loop body
LE: loop exit
PB: predicated region body
PF: predicated region fallthrough
CT: control target
= control target key end

     0   :  { %vm375_vm0 = vcmask 523264   ;;  %s912_s1 = inlined_call_operand.vmem [shape: bf16[576,128], index: 1, kind: input, shape index: {}]   ;;  %s913_s0 = inlined_call_operand.vmem [shape: bf16[32,576], index: 0, kind: input, shape index: {}]   ;;  %s914_s2 = inlined_call_operand.vmem [shape: f32[1,128], index: 2, kind: input, shape index: {}]   ;;  %s915_s3 = inlined_call_operand.vmem [shape: f32[32,128], index: 3, kind: input, shape index: {}]   ;;  %s916_s4 = inlined_call_operand.vmem [shape: f32[32,128], index: 4, kind: output, shape index: {}]  }
   0x1   :  { %v672_v0 = vld [vmem:[%s912_s1 + $0x40] sm:$0xff]   ;;  %v676_v4 = vld [vmem:[%s912_s1 + $0x48] sm:$0xff]   ;;  %v680_v8 = vld [vmem:[%s912_s1 + $0x50] sm:$0xff]  }
   0x2   :  { %v673_v1 = vld [vmem:[%s912_s1] sm:$0xff]   ;;  %598 = vmatprep.subr.bf16.mxu0 %v672_v0  ;;  %v677_v5 = vld [vmem:[%s912_s1 + $0x8] sm:$0xff]   ;;  %v681_v9 = vld [vmem:[%s912_s1 + $0x10] sm:$0xff]  }
   0x3   :  { %v674_v2 = vld [vmem:[%s912_s1 + $0xc0] sm:$0xff]   ;;  %599 = vmatpush3.bf16.msra.mxu0 %v673_v1  ;;  %v678_v6 = vld [vmem:[%s912_s1 + $0xc8] sm:$0xff]   ;;  %v682_v10 = vld [vmem:[%s912_s1 + $0xd0] sm:$0xff]  }
   0x4   :  { %v675_v3 = vld [vmem:[%s912_s1 + $0x80] sm:$0xff]   ;;  %626 = vmatprep.subr.bf16.mxu1 %v674_v2  ;;  %600 = vmatprep.subr.bf16.mxu0 %v676_v4  ;;  %v679_v7 = vld [vmem:[%s912_s1 + $0x88] sm:$0xff]   ;;  %v683_v11 = vld [vmem:[%s912_s1 + $0x90] sm:$0xff]  }
   0x5   :  { %627 = vmatpush3.bf16.msra.mxu1 %v675_v3  ;;  %v684_v12 = vld [vmem:[%s912_s1 + $0x58] sm:$0xff]   ;;  %v688_v16 = vld [vmem:[%s912_s1 + $0x60] sm:$0xff]   ;;  %v692_v20 = vld [vmem:[%s912_s1 + $0x68] sm:$0xff]  }
   0x6   :  { %628 = vmatprep.subr.bf16.mxu1 %v678_v6  ;;  %v685_v13 = vld [vmem:[%s912_s1 + $0x18] sm:$0xff]   ;;  %v689_v17 = vld [vmem:[%s912_s1 + $0x20] sm:$0xff]   ;;  %v693_v21 = vld [vmem:[%s912_s1 + $0x28] sm:$0xff]  }
   0x7   :  { %601 = vmatpush3.bf16.msra.mxu0 %v677_v5  ;;  %v686_v14 = vld [vmem:[%s912_s1 + $0xd8] sm:$0xff]   ;;  %v690_v18 = vld [vmem:[%s912_s1 + $0xe0] sm:$0xff]   ;;  %v694_v22 = vld [vmem:[%s912_s1 + $0xe8] sm:$0xff]  }
   0x8   :  { %602 = vmatprep.subr.bf16.mxu0 %v680_v8  ;;  %v687_v15 = vld [vmem:[%s912_s1 + $0x98] sm:$0xff]   ;;  %v691_v19 = vld [vmem:[%s912_s1 + $0xa0] sm:$0xff]   ;;  %v695_v23 = vld [vmem:[%s912_s1 + $0xa8] sm:$0xff]  }
   0x9   :  { %629 = vmatpush3.bf16.msra.mxu1 %v679_v7  ;;  %v696_v24 = vld [vmem:[%s912_s1 + $0x70] sm:$0xff]   ;;  %v700_v28 = vld [vmem:[%s912_s1 + $0x78] sm:$0xff]   ;;  %v707_v34 = vld [vmem:[%s912_s1 + $0x100] sm:$0xff]  }
   0xa   :  { %630 = vmatprep.subr.bf16.mxu1 %v682_v10  ;;  %v697_v25 = vld [vmem:[%s912_s1 + $0x30] sm:$0xff]   ;;  %v701_v29 = vld [vmem:[%s912_s1 + $0x38] sm:$0xff]   ;;  %v710_v36 = vld [vmem:[%s913_s0 + $0xc] ss:$20 sps:$4 sm:$0xff]  }
   0xb   :  { %603 = vmatpush3.bf16.msra.mxu0 %v681_v9  ;;  %v698_v26 = vld [vmem:[%s912_s1 + $0xf0] sm:$0xff]   ;;  %v702_v30 = vld [vmem:[%s912_s1 + $0xf8] sm:$0xff]   ;;  %v711_v37 = vld [vmem:[%s912_s1 + $0x108] sm:$0xff]   ;;  %463 = vmatprep.mubr.bf16.mxu1 %v710_v36 }
   0xc   :  { %604 = vmatprep.subr.bf16.mxu0 %v684_v12  ;;  %v699_v27 = vld [vmem:[%s912_s1 + $0xb0] sm:$0xff]   ;;  %v705_v32 = vld [vmem:[%s913_s0 + $0x4] ss:$20 sps:$4 sm:$0xff]   ;;  %v708_v35 = vld [vmem:[%s913_s0 + $0x8] ss:$20 sps:$4 sm:$0xff]  }
   0xd   :  { %631 = vmatpush3.bf16.msra.mxu1 %v683_v11  ;;  %v703_v31 = vld [vmem:[%s913_s0] ss:$20 sps:$4 sm:$0xff]   ;;  %v706_v33 = vld [vmem:[%s912_s1 + $0xb8] sm:$0xff]   ;;  %414 = vmatprep.mubr.bf16.mxu0 %v705_v32  ;;  %v718_v42 = vld [vmem:[%s913_s0 + $0x30] ss:$20 sps:$4 sm:$0xff]  }
   0xe   :  { %632 = vmatprep.subr.bf16.mxu1 %v686_v14  ;;  %v712_v38 = vld [vmem:[%s913_s0 + $0x2c] ss:$20 sps:$4 sm:$0xff]   ;;  %v714_v39 = vld [vmem:[%s913_s0 + $0x28] ss:$20 sps:$4 sm:$0xff]   ;;  %v715_v40 = vld [vmem:[%s912_s1 + $0x110] sm:$0xff]  }
   0xf   :  { %605 = vmatpush3.bf16.msra.mxu0 %v685_v13  ;;  %v716_v41 = vld [vmem:[%s913_s0 + $0x34] ss:$20 sps:$4 sm:$0xff]   ;;  %v719_v43 = vld [vmem:[%s912_s1 + $0x118] sm:$0xff]   ;;  %v720_v44 = vld [vmem:[%s913_s0 + $0x10] ss:$20 sps:$4 sm:$0xff]  }
  0x10   :  { %606 = vmatprep.subr.bf16.mxu0 %v688_v16  ;;  %v721_v45 = vld [vmem:[%s913_s0 + $0x38] ss:$20 sps:$4 sm:$0xff]   ;;  %v549_v47 = vld [vmem:[%s914_s2] ss:$0 sm:$0xff] }
  0x11   :  { %633 = vmatpush3.bf16.msra.mxu1 %v687_v15  ;;  %v531_v15 = vld [vmem:[%s915_s3 + $0x10] sm:$0xff] }
  0x12   :  { %634 = vmatprep.subr.bf16.mxu1 %v690_v18 }
  0x13   :  { %607 = vmatpush3.bf16.msra.mxu0 %v689_v17 }
  0x14   :  { %608 = vmatprep.subr.bf16.mxu0 %v692_v20 }
  0x15   :  { %635 = vmatpush3.bf16.msra.mxu1 %v691_v19  ;;  %v529_v19 = vld [vmem:[%s915_s3] sm:$0xff] }
  0x16   :  { %636 = vmatprep.subr.bf16.mxu1 %v694_v22  ;;  %v532_v22 = vld [vmem:[%s915_s3 + $0x18] sm:$0xff] }
  0x17   :  { %609 = vmatpush3.bf16.msra.mxu0 %v693_v21 }
  0x18   :  { %610 = vmatprep.subr.bf16.mxu0 %v696_v24 }
  0x19   :  { %637 = vmatpush3.bf16.msra.mxu1 %v695_v23 }
  0x1a   :  { %638 = vmatprep.subr.bf16.mxu1 %v698_v26  ;;  %v530_v26 = vld [vmem:[%s915_s3 + $0x8] sm:$0xff] }
  0x1b   :  { %611 = vmatpush3.bf16.msra.mxu0 %v697_v25 }
  0x1c   :  { %612 = vmatprep.subr.bf16.mxu0 %v700_v28 }
  0x1d   :  { %639 = vmatpush3.bf16.msra.mxu1 %v699_v27 }
  0x1e   :  { %640 = vmatprep.subr.bf16.mxu1 %v702_v30 }
  0x1f   :  { %613 = vmatpush3.bf16.msra.mxu0 %v701_v29 }
  0x20   :  { %660 = vmatprep.subr.bf16.mxu0 %v707_v34 }
  0x21   :  { %641 = vmatpush3.bf16.msra.mxu1 %v706_v33 }
  0x22   :  { %415 = vmatmul.mubr.bf16.vlgmr.msra.gmra.mrb[0].mxu0 %v703_v31 }
  0x23   :  { %661 = vmatpush3.bf16.msra.mxu0 %v707_v34  ;;  %422 = vmatprep.mubr.bf16.mxu0 %v712_v38 }
  0x24   :  { %464 = vmatmul.mubr.bf16.vlgmr.msra.gmra.mrb[0].mxu1 %v708_v35  ;;  %662 = vmatprep.subr.bf16.mxu0 %v711_v37 }
  0x25   :  { %471 = vmatprep.mubr.bf16.mxu1 %v716_v41 }
  0x27   :  { %663 = vmatpush3.bf16.msra.mxu0 %v711_v37 }
  0x28   :  { %664 = vmatprep.subr.bf16.mxu0 %v715_v40 }
  0x2a   :  { %423 = vmatmul.mubr.bf16.gmra.mrb[4].mxu0 %v714_v39 }
  0x2b   :  { %668 = vmatprep.mubr.msk.bf16.mxu0 %vm375_vm0, %v720_v44  ;;  %665 = vmatpush3.bf16.msra.mxu0 %v715_v40 }
  0x2c   :  { %472 = vmatmul.mubr.bf16.gmra.mrb[4].mxu1 %v718_v42  ;;  %666 = vmatprep.subr.bf16.mxu0 %v719_v43 }
  0x2f   :  { %667 = vmatpush3.bf16.msra.mxu0 %v719_v43 }
  0x32   :  { %669 = vmatmul.mubr.msk.bf16.vlgmr.msra.gmra.mrb[8].mxu0 %vm375_vm0, %v721_v45 }
  0xf5   :  { %v614_v46 = vpop.f32.mrb[0].mxu0 }
  0xf6   :  { %v615_v48 = vpop.f32.mrb[1].mxu0 }
  0xf7   :  { %v616_v49 = vadd.f32 %v615_v48, %v614_v46  ;;  %v617_v50 = vpop.f32.mrb[2].mxu0  ;;  %v642_v51 = vpop.f32.mrb[0].mxu1 }
  0xf8   :  { %v618_v52 = vpop.f32.mrb[3].mxu0  ;;  %v643_v55 = vpop.f32.mrb[1].mxu1 }
  0xf9   :  { %v417_v53 = vadd.f32 %v616_v49, %v549_v47  ;;  %v619_v54 = vadd.f32 %v618_v52, %v617_v50  ;;  %v644_v56 = vadd.f32 %v643_v55, %v642_v51  ;;  %v645_v57 = vpop.f32.mrb[2].mxu1 }
  0xfa   :  { %v646_v59 = vpop.f32.mrb[3].mxu1 }
  0xfb   :  { %v420_v58 = vadd.f32 %v619_v54, %v549_v47  ;;  %v647_v60 = vadd.f32 %v646_v59, %v645_v57  ;;  %v466_v61 = vadd.f32 %v644_v56, %v417_v53 }
  0xfd   :  { %v620_v62 = vpop.f32.mrb[4].mxu0  ;;  %v469_v0 = vadd.f32 %v647_v60, %v420_v58 }
  0xfe   :  { %v621_v63 = vpop.f32.mrb[5].mxu0 }
  0xff   :  { %v622_v1 = vadd.f32 %v621_v63, %v620_v62  ;;  %v623_v2 = vpop.f32.mrb[6].mxu0  ;;  %v648_v3 = vpop.f32.mrb[4].mxu1 }
 0x100   :  { %v624_v4 = vpop.f32.mrb[7].mxu0  ;;  %v649_v7 = vpop.f32.mrb[5].mxu1 }
 0x101   :  { %v425_v5 = vadd.f32 %v622_v1, %v549_v47  ;;  %v625_v6 = vadd.f32 %v624_v4, %v623_v2  ;;  %v650_v8 = vadd.f32 %v649_v7, %v648_v3  ;;  %v651_v9 = vpop.f32.mrb[6].mxu1 }
 0x102   :  { %v652_v11 = vpop.f32.mrb[7].mxu1 }
 0x103   :  { %v428_v10 = vadd.f32 %v625_v6, %v549_v47  ;;  %v653_v12 = vadd.f32 %v652_v11, %v651_v9  ;;  %v474_v13 = vadd.f32 %v650_v8, %v425_v5 }
 0x105   :  { %v670_v14 = vpop.f32.mrb[8].mxu0  ;;  %v477_v16 = vadd.f32 %v653_v12, %v428_v10 }
 0x106   :  { %v523_v17 = vadd.f32 %v670_v14, %v474_v13  ;;  %v514_v18 = vpop.f32.mrb[9].mxu0 }
 0x107   :  { %v515_v20 = vadd.f32 %v514_v18, %v466_v61  ;;  %v671_v21 = vpop.f32.mrb[10].mxu0 }
 0x108   :  { %v535_v23 = vadd.f32 %v531_v15, %v523_v17  ;;  %v526_v24 = vadd.f32 %v671_v21, %v477_v16  ;;  %v517_v25 = vpop.f32.mrb[11].mxu0 }
 0x109   :  { %v533_v27 = vadd.f32 %v529_v19, %v515_v20  ;;  %v518_v28 = vadd.f32 %v517_v25, %v469_v0 }
 0x10a   :  { %v539_v29 = vmax.f32 %v535_v23, 0.0  ;;  %v536_v30 = vadd.f32 %v532_v22, %v526_v24 }
 0x10b   :  { %v537_v31 = vmax.f32 %v533_v27, 0.0  ;;  %v534_v32 = vadd.f32 %v530_v26, %v518_v28 }
 0x10c   :  { %543 = vst [vmem:[%s916_s4 + $0x10] sm:$0xff] %v539_v29  ;;  %v540_v33 = vmax.f32 %v536_v30, 0.0 }
 0x10d   :  { %541 = vst [vmem:[%s916_s4] sm:$0xff] %v537_v31  ;;  %v538_v34 = vmax.f32 %v534_v32, 0.0 }
 0x10e   :  { %544 = vst [vmem:[%s916_s4 + $0x18] sm:$0xff] %v540_v33 }
 0x10f   :  { %542 = vst [vmem:[%s916_s4 + $0x8] sm:$0xff] %v538_v34 }

</bundles_post_ra>
